<compile_context>
chip_gen: v7x
topology: tpu7x:2x2x1
jax: 0.10.0
libtpu: 0.0.40
codegen_flags: <defaults>
</compile_context>

<pallas_src>
import numpy as np
import jax
import jax.numpy as jnp
from jax.experimental import pallas as pl
from jax.experimental.pallas import tpu as pltpu


_TAPS = tuple((dy, dx) for dy in (-1, 0, 1) for dx in (-1, 0, 1))
_CENTER = 4  # tap index of (dy, dx) == (0, 0)


def _sigmoid(x):
    # Exact divide (tiny tensors) keeps the test tolerance tight.
    return 1.0 / (1.0 + jnp.exp(-x))


def _tree_sum(terms):
    """Balanced pairwise sum -> log2(n) dependency depth (ILP on the VALUs)."""
    terms = list(terms)
    while len(terms) > 1:
        nxt = [terms[i] + terms[i + 1] for i in range(0, len(terms) - 1, 2)]
        if len(terms) % 2:
            nxt.append(terms[-1])
        terms = nxt
    return terms[0]


def _build_tap_masks(H, W):
    """masks[t, p] = 1 iff the source pixel (y+dy, x+dx) of flat output
    position p=(y,x) is inside the image, for tap t=(dy+1)*3+(dx+1) of a 3x3
    conv with zero padding=1 (bakes the padding into the lane-roll trick).
    Dense (9, HW) layout -> no wasted 1->8 sublane padding."""
    ys, xs = np.meshgrid(np.arange(H), np.arange(W), indexing="ij")
    ys = ys.reshape(-1)
    xs = xs.reshape(-1)
    masks = np.zeros((9, H * W), np.float32)
    for t, (dy, dx) in enumerate(_TAPS):
        ok = (ys + dy >= 0) & (ys + dy < H) & (xs + dx >= 0) & (xs + dx < W)
        masks[t, :] = ok.astype(np.float32)
    return jnp.asarray(masks)


def _vmem_capacity_bytes():
    """Physical VMEM of the current generation; conservative fallback."""
    try:
        info = pltpu.get_tpu_info()
        cap = getattr(info, "vmem_capacity_bytes", None)
        if cap:
            return int(cap)
    except Exception:
        pass
    return 64 << 20  # v7x per-TC physical VMEM (smallest of the generations)


def _pick_block_batch(B, C, HW, budget_bytes):
    """Largest Bt dividing B whose double-buffered in/out blocks fit the
    budget, preferring >=2 grid steps so both v7x TensorCores have work.
    Returns (Bt, double_buffered_bytes_per_batch_element)."""
    slab = 4 * C * HW * 4          # thermal + rgb + out_t + out_r, per element
    wori = 8 * HW * 4              # w_ori block, 1 -> 8 padded sublanes
    per_elem_db = 2 * (slab + wori)  # x2 pipeline buffers
    cap = max(1, int(budget_bytes) // per_elem_db)
    divisors = [d for d in range(1, B + 1) if B % d == 0 and d <= cap] or [1]
    two_step = [d for d in divisors if B // d >= 2]
    return (max(two_step) if two_step else max(divisors)), per_elem_db


def _make_kernel(Bt, C, C16, H, W):
    HW = H * W

    def kernel(thermal_ref, rgb_ref,          # (Bt, C, HW) VMEM blocks
               w1_ref, w2t_ref,               # (C16, C) each, VMEM
               masks_ref,                     # (9, HW) VMEM boundary masks
               c1w_ref, c1b_ref,              # SMEM: (36,), (2,)  conv1 3x3
               c2w_ref, c2b_ref,              # SMEM: (36,), (2,)  conv2 3x3
               c3w_ref, c3b_ref,              # SMEM: (2,),  (1,)  conv3 1x1
               out_t_ref, out_r_ref, w_ori_ref):
        thermal = thermal_ref[...]            # (Bt, C, HW)
        rgb = rgb_ref[...]                    # (Bt, C, HW)

        # ---- conv_shared: GAP -> Linear -> ReLU -> Linear -> Sigmoid -------
        # Both streams batched into one (2Bt, C) chain, kept OFF the MXU:
        # per hidden unit j: lane-reduce (XLU) + ReLU + broadcast-FMA (VPU).
        v = jnp.concatenate([jnp.mean(thermal, axis=2),
                             jnp.mean(rgb, axis=2)], axis=0)          # (2Bt, C)
        w1 = w1_ref[...]                      # (C16, C)  Linear1.weight
        w2t = w2t_ref[...]                    # (C16, C)  Linear2.weight.T
        mlp_terms = []
        for j in range(C16):
            hj = jnp.maximum(jnp.sum(v * w1[j], axis=1, keepdims=True), 0.0)
            mlp_terms.append(hj * w2t[j])                             # (2Bt, C)
        act = _sigmoid(_tree_sum(mlp_terms))                          # (2Bt, C)
        act_t = act[:Bt][:, :, None]          # (Bt, C, 1)  <- conv_shared(v_t)
        act_r = act[Bt:][:, :, None]          # (Bt, C, 1)  <- conv_shared(v_rgb)

        # ---- w_conv on cat([mean_rgb, mean_t]) -----------------------------
        mean_r = jnp.mean(rgb, axis=1)        # (Bt, HW)
        mean_t = jnp.mean(thermal, axis=1)    # (Bt, HW)

        # Hoist boundary-mask loads + sublane broadcasts once (8 of them),
        # reused by both conv layers (32 tap multiplies total).
        m_all = masks_ref[...]                                        # (9, HW)
        mask_b = [None] * 9
        for t in range(9):
            if t != _CENTER:
                mask_b[t] = jnp.broadcast_to(m_all[t:t + 1, :], (Bt, HW))

        def conv3x3(planes, w_ref, b_ref):
            # 3x3 conv (2 in -> 2 out channels): lane rolls (XLU) + boundary
            # masks + per-tap products collected in lists and tree-summed so
            # each output channel has a log-depth, not 18-deep, add chain.
            t0 = [jnp.full((Bt, HW), b_ref[0], dtype=jnp.float32)]
            t1 = [jnp.full((Bt, HW), b_ref[1], dtype=jnp.float32)]
            for ci, plane in enumerate(planes):
                for t, (dy, dx) in enumerate(_TAPS):
                    if t == _CENTER:
                        sh = plane                                    # center tap
                    else:
                        amt = (-(dy * W + dx)) % HW
                        sh = pltpu.roll(plane, amt, axis=1) * mask_b[t]
                    t0.append(w_ref[ci * 9 + t] * sh)
                    t1.append(w_ref[(2 + ci) * 9 + t] * sh)
            return _tree_sum(t0), _tree_sum(t1)

        h1a, h1b = conv3x3((mean_r, mean_t), c1w_ref, c1b_ref)
        h1a = jnp.maximum(h1a, 0.0)
        h1b = jnp.maximum(h1b, 0.0)
        h2a, h2b = conv3x3((h1a, h1b), c2w_ref, c2b_ref)
        h2a = jnp.maximum(h2a, 0.0)
        h2b = jnp.maximum(h2b, 0.0)
        w_ori = _sigmoid(c3b_ref[0] + c3w_ref[0] * h2a + c3w_ref[1] * h2b)  # (Bt, HW)
        w_b = w_ori[:, None, :]               # (Bt, 1, HW)

        # ---- fusion (pre_w is None => w_new == w_ori); one store each ------
        out_t_ref[...] = (thermal + act_r * rgb * w_b).astype(out_t_ref.dtype)
        out_r_ref[...] = (rgb + act_t * thermal * w_b).astype(out_r_ref.dtype)
        w_ori_ref[...] = w_b

    return kernel


def mutual_related(thermal, rgb, params, out_dtype=jnp.float32):
    """thermal, rgb: (B, C, H, W) float32 (NCHW, like the PyTorch module).
    out_dtype: dtype of out_thermal/out_rgb (bf16 halves write bandwidth on
    this HBM-bound fusion); w_ori stays float32."""
    B, C, H, W = thermal.shape
    HW = H * W
    C16 = params["w1"].shape[0]

    # Generation-aware block sizing: ~1/3 of physical VMEM for the pipelined
    # blocks (-> ~42 MiB on v5e/v6e, ~21 MiB on v7x), >=2 grid steps preferred.
    capacity = _vmem_capacity_bytes()
    Bt, per_elem_db = _pick_block_batch(B, C, HW, capacity // 3)

    # Explicit scoped-VMEM limit: double-buffered blocks + masks/weights +
    # intermediate headroom, clamped below physical.  The 16 MiB (v5e) /
    # 32 MiB (v6e/v7x) defaults are too small at production VGG16 shapes.
    fixed = (16 * HW * 4 * 2) + (4 * C16 * C * 4) + (64 * 8 * HW * 4) + (2 << 20)
    need = Bt * per_elem_db + fixed
    vmem_limit = int(min(max(need + (8 << 20), 32 << 20), int(capacity * 0.9)))

    t2 = thermal.reshape(B, C, HW).astype(jnp.float32)
    r2 = rgb.reshape(B, C, HW).astype(jnp.float32)

    w1 = params["w1"].astype(jnp.float32)                # (C16, C)
    w2t = params["w2"].T.astype(jnp.float32)             # (C16, C)
    masks = _build_tap_masks(H, W)                       # (9, HW)
    c1w = params["c1w"].reshape(-1).astype(jnp.float32)  # (36,)
    c2w = params["c2w"].reshape(-1).astype(jnp.float32)  # (36,)
    c3w = params["c3w"].reshape(-1).astype(jnp.float32)  # (2,)
    c1b = params["c1b"].astype(jnp.float32)
    c2b = params["c2b"].astype(jnp.float32)
    c3b = params["c3b"].astype(jnp.float32)

    batch_spec = lambda: pl.BlockSpec((Bt, C, HW), lambda b: (b, 0, 0))
    smem_spec = lambda: pl.BlockSpec(memory_space=pltpu.MemorySpace.SMEM)

    # Small, HBM-bound fusion: advisory cost so XLA schedules around it.
    cost = pl.CostEstimate(
        flops=6 * B * C * HW + 160 * B * HW + 8 * B * C * C16,
        transcendentals=B * (2 * C + HW),
        bytes_accessed=(4 * C * HW + HW) * B * 4,
    )

    out_t, out_r, w_ori = pl.pallas_call(
        _make_kernel(Bt, C, C16, H, W),
        out_shape=(
            jax.ShapeDtypeStruct((B, C, HW), out_dtype),
            jax.ShapeDtypeStruct((B, C, HW), out_dtype),
            jax.ShapeDtypeStruct((B, 1, HW), jnp.float32),
        ),
        grid_spec=pltpu.PrefetchScalarGridSpec(
            num_scalar_prefetch=0,
            grid=(B // Bt,),
            in_specs=[
                batch_spec(), batch_spec(),
                pl.BlockSpec((C16, C), lambda b: (0, 0)),
                pl.BlockSpec((C16, C), lambda b: (0, 0)),
                pl.BlockSpec((9, HW), lambda b: (0, 0)),
                smem_spec(), smem_spec(),
                smem_spec(), smem_spec(),
                smem_spec(), smem_spec(),
            ],
            out_specs=[
                batch_spec(),
                batch_spec(),
                pl.BlockSpec((Bt, 1, HW), lambda b: (b, 0, 0)),
            ],
        ),
        compiler_params=pltpu.CompilerParams(
            dimension_semantics=("parallel",),
            vmem_limit_bytes=vmem_limit,
        ),
        cost_estimate=cost,
    )(t2, r2, w1, w2t, masks, c1w, c1b, c2w, c2b, c3w, c3b)

    return (out_t.reshape(B, C, H, W),
            out_r.reshape(B, C, H, W),
            w_ori.reshape(B, 1, H, W))


# ------------------------- pure-JAX reference --------------------------------
def mutual_related_reference(thermal, rgb, p):
    hp = jax.lax.Precision.HIGHEST

    def mlp(v):
        h = jax.nn.relu(jnp.dot(v, p["w1"].T, precision=hp))
        return jax.nn.sigmoid(jnp.dot(h, p["w2"].T, precision=hp))

    v_t = thermal.mean(axis=(2, 3))
    v_r = rgb.mean(axis=(2, 3))
    act_t = mlp(v_t)[:, :, None, None]
    act_r = mlp(v_r)[:, :, None, None]

    mean_r = rgb.mean(axis=1, keepdims=True)
    mean_t = thermal.mean(axis=1, keepdims=True)
    cat = jnp.concatenate([mean_r, mean_t], axis=1)

    def conv(x, w, b, pad):
        y = jax.lax.conv_general_dilated(
            x, w, (1, 1), [(pad, pad), (pad, pad)],
            dimension_numbers=("NCHW", "OIHW", "NCHW"), precision=hp)
        return y + b[None, :, None, None]

    h = jax.nn.relu(conv(cat, p["c1w"], p["c1b"], 1))
    h = jax.nn.relu(conv(h, p["c2w"], p["c2b"], 1))
    w_ori = jax.nn.sigmoid(conv(h, p["c3w"], p["c3b"], 0))

    out_t = thermal + act_r * rgb * w_ori
    out_r = rgb + act_t * thermal * w_ori
    return out_t, out_r, w_ori


# ------------------------------- main -----------------------------------------
def _run_case(B, C, H, W):
    C16 = C // 16
    key = jax.random.PRNGKey(0)
    ks = jax.random.split(key, 10)

    thermal = jax.random.normal(ks[0], (B, C, H, W), jnp.float32)
    rgb = jax.random.normal(ks[1], (B, C, H, W), jnp.float32)

    params = {
        "w1": jax.random.normal(ks[2], (C16, C), jnp.float32) * 0.2,   # Linear(c, c//16)
        "w2": jax.random.normal(ks[3], (C, C16), jnp.float32) * 0.2,   # Linear(c//16, c)
        "c1w": jax.random.normal(ks[4], (2, 2, 3, 3), jnp.float32) * 0.3,
        "c1b": jax.random.normal(ks[5], (2,), jnp.float32) * 0.1,
        "c2w": jax.random.normal(ks[6], (2, 2, 3, 3), jnp.float32) * 0.3,
        "c2b": jax.random.normal(ks[7], (2,), jnp.float32) * 0.1,
        "c3w": jax.random.normal(ks[8], (1, 2, 1, 1), jnp.float32) * 0.3,
        "c3b": jax.random.normal(ks[9], (1,), jnp.float32) * 0.1,
    }

    out_t, out_r, w_ori = mutual_related(thermal, rgb, params)
    jax.block_until_ready((out_t, out_r, w_ori))

    ref_t, ref_r, ref_w = mutual_related_reference(thermal, rgb, params)
    # All-f32 kernel, no MXU anywhere -> only tiny transcendental rounding.
    np.testing.assert_allclose(np.asarray(out_t), np.asarray(ref_t), rtol=1e-3, atol=1e-3)
    np.testing.assert_allclose(np.asarray(out_r), np.asarray(ref_r), rtol=1e-3, atol=1e-3)
    np.testing.assert_allclose(np.asarray(w_ori), np.asarray(ref_w), rtol=1e-3, atol=1e-3)


if __name__ == "__main__":
    _run_case(B=2, C=32, H=16, W=16)   # Bt=1 -> grid=(2,): both v7x cores busy
    _run_case(B=4, C=32, H=16, W=16)   # Bt=2 -> multi-batch blocks, grid=(2,)
    print("KERNEL_OK")
</pallas_src>

<mosaic_0001>
module attributes {stable_mosaic.version = 11 : i64} {
  func.func @kernel(%arg0: i32, %arg1: memref<1x32x256xf32, #tpu.memory_space<vmem>>, %arg2: memref<1x32x256xf32, #tpu.memory_space<vmem>>, %arg3: memref<2x32xf32, #tpu.memory_space<vmem>>, %arg4: memref<2x32xf32, #tpu.memory_space<vmem>>, %arg5: memref<9x256xf32, #tpu.memory_space<vmem>>, %arg6: memref<36xf32, #tpu.memory_space<smem>>, %arg7: memref<2xf32, #tpu.memory_space<smem>>, %arg8: memref<36xf32, #tpu.memory_space<smem>>, %arg9: memref<2xf32, #tpu.memory_space<smem>>, %arg10: memref<2xf32, #tpu.memory_space<smem>>, %arg11: memref<1xf32, #tpu.memory_space<smem>>, %arg12: memref<1x32x256xf32, #tpu.memory_space<vmem>>, %arg13: memref<1x32x256xf32, #tpu.memory_space<vmem>>, %arg14: memref<1x1x256xf32, #tpu.memory_space<vmem>>) attributes {dimension_semantics = [#tpu.dimension_semantics<parallel>], iteration_bounds = array<i64: 2>, scalar_prefetch = 0 : i64, scratch_operands = 0 : i64, tpu.core_type = #tpu.core_type<tc>, window_params = [{transform_indices = @transform_0, window_bounds = array<i64: 1, 32, 256>}, {transform_indices = @transform_1, window_bounds = array<i64: 1, 32, 256>}, {pipeline_mode = #tpu.pipeline_mode<synchronous>, transform_indices = @transform_2, window_bounds = array<i64: 2, 32>}, {pipeline_mode = #tpu.pipeline_mode<synchronous>, transform_indices = @transform_3, window_bounds = array<i64: 2, 32>}, {pipeline_mode = #tpu.pipeline_mode<synchronous>, transform_indices = @transform_4, window_bounds = array<i64: 9, 256>}, {transform_indices = @transform_5, window_bounds = array<i64: 36>}, {transform_indices = @transform_6, window_bounds = array<i64: 2>}, {transform_indices = @transform_7, window_bounds = array<i64: 36>}, {transform_indices = @transform_8, window_bounds = array<i64: 2>}, {transform_indices = @transform_9, window_bounds = array<i64: 2>}, {transform_indices = @transform_10, window_bounds = array<i64: 1>}, {transform_indices = @transform_11, window_bounds = array<i64: 1, 32, 256>}, {transform_indices = @transform_12, window_bounds = array<i64: 1, 32, 256>}, {transform_indices = @transform_13, window_bounds = array<i64: 1, 1, 256>}]} {
    %c0 = arith.constant 0 : index
    %c0_0 = arith.constant 0 : index
    %c0_1 = arith.constant 0 : index
    %0 = vector.load %arg1[%c0, %c0_0, %c0_1] : memref<1x32x256xf32, #tpu.memory_space<vmem>>, vector<1x32x256xf32>
    %c0_2 = arith.constant 0 : index
    %c0_3 = arith.constant 0 : index
    %c0_4 = arith.constant 0 : index
    %1 = vector.load %arg2[%c0_2, %c0_3, %c0_4] : memref<1x32x256xf32, #tpu.memory_space<vmem>>, vector<1x32x256xf32>
    %cst = arith.constant dense<0.000000e+00> : vector<1x32xf32>
    %2 = vector.multi_reduction <add>, %0, %cst [2] : vector<1x32x256xf32> to vector<1x32xf32>
    %cst_5 = arith.constant 2.560000e+02 : f32
    %3 = vector.broadcast %cst_5 : f32 to vector<1x32xf32>
    %4 = arith.divf %2, %3 : vector<1x32xf32>
    %cst_6 = arith.constant dense<0.000000e+00> : vector<1x32xf32>
    %5 = vector.multi_reduction <add>, %1, %cst_6 [2] : vector<1x32x256xf32> to vector<1x32xf32>
    %cst_7 = arith.constant 2.560000e+02 : f32
    %6 = vector.broadcast %cst_7 : f32 to vector<1x32xf32>
    %7 = arith.divf %5, %6 : vector<1x32xf32>
    %8 = tpu.concatenate %4, %7 in 0 : vector<1x32xf32>, vector<1x32xf32> -> vector<2x32xf32>
    %c0_8 = arith.constant 0 : index
    %c0_9 = arith.constant 0 : index
    %9 = vector.load %arg3[%c0_8, %c0_9] : memref<2x32xf32, #tpu.memory_space<vmem>>, vector<2x32xf32>
    %c0_10 = arith.constant 0 : index
    %c0_11 = arith.constant 0 : index
    %10 = vector.load %arg4[%c0_10, %c0_11] : memref<2x32xf32, #tpu.memory_space<vmem>>, vector<2x32xf32>
    %11 = vector.extract_strided_slice %9 {offsets = [0, 0], sizes = [1, 32], strides = [1, 1]} : vector<2x32xf32> to vector<1x32xf32>
    %12 = vector.shape_cast %11 : vector<1x32xf32> to vector<32xf32>
    %13 = vector.shape_cast %12 : vector<32xf32> to vector<1x32xf32>
    %14 = vector.broadcast %13 : vector<1x32xf32> to vector<2x32xf32>
    %15 = arith.mulf %8, %14 : vector<2x32xf32>
    %cst_12 = arith.constant dense<0.000000e+00> : vector<2xf32>
    %16 = vector.multi_reduction <add>, %15, %cst_12 [1] : vector<2x32xf32> to vector<2xf32>
    %17 = vector.shape_cast %16 : vector<2xf32> to vector<2x1xf32>
    %cst_13 = arith.constant 0.000000e+00 : f32
    %18 = vector.broadcast %cst_13 : f32 to vector<2x1xf32>
    %19 = arith.maximumf %17, %18 : vector<2x1xf32>
    %20 = vector.extract_strided_slice %10 {offsets = [0, 0], sizes = [1, 32], strides = [1, 1]} : vector<2x32xf32> to vector<1x32xf32>
    %21 = vector.shape_cast %20 : vector<1x32xf32> to vector<32xf32>
    %22 = vector.shape_cast %21 : vector<32xf32> to vector<1x32xf32>
    %23 = vector.broadcast %19 : vector<2x1xf32> to vector<2x32xf32>
    %24 = vector.broadcast %22 : vector<1x32xf32> to vector<2x32xf32>
    %25 = arith.mulf %23, %24 : vector<2x32xf32>
    %26 = vector.extract_strided_slice %9 {offsets = [1, 0], sizes = [1, 32], strides = [1, 1]} : vector<2x32xf32> to vector<1x32xf32>
    %27 = vector.shape_cast %26 : vector<1x32xf32> to vector<32xf32>
    %28 = vector.shape_cast %27 : vector<32xf32> to vector<1x32xf32>
    %29 = vector.broadcast %28 : vector<1x32xf32> to vector<2x32xf32>
    %30 = arith.mulf %8, %29 : vector<2x32xf32>
    %cst_14 = arith.constant dense<0.000000e+00> : vector<2xf32>
    %31 = vector.multi_reduction <add>, %30, %cst_14 [1] : vector<2x32xf32> to vector<2xf32>
    %32 = vector.shape_cast %31 : vector<2xf32> to vector<2x1xf32>
    %cst_15 = arith.constant 0.000000e+00 : f32
    %33 = vector.broadcast %cst_15 : f32 to vector<2x1xf32>
    %34 = arith.maximumf %32, %33 : vector<2x1xf32>
    %35 = vector.extract_strided_slice %10 {offsets = [1, 0], sizes = [1, 32], strides = [1, 1]} : vector<2x32xf32> to vector<1x32xf32>
    %36 = vector.shape_cast %35 : vector<1x32xf32> to vector<32xf32>
    %37 = vector.shape_cast %36 : vector<32xf32> to vector<1x32xf32>
    %38 = vector.broadcast %34 : vector<2x1xf32> to vector<2x32xf32>
    %39 = vector.broadcast %37 : vector<1x32xf32> to vector<2x32xf32>
    %40 = arith.mulf %38, %39 : vector<2x32xf32>
    %41 = arith.addf %25, %40 : vector<2x32xf32>
    %cst_16 = arith.constant 0.000000e+00 : f32
    %42 = vector.broadcast %cst_16 : f32 to vector<2x32xf32>
    %43 = arith.subf %42, %41 : vector<2x32xf32>
    %44 = math.exp %43 : vector<2x32xf32>
    %cst_17 = arith.constant 1.000000e+00 : f32
    %45 = vector.broadcast %cst_17 : f32 to vector<2x32xf32>
    %46 = arith.addf %45, %44 : vector<2x32xf32>
    %cst_18 = arith.constant 1.000000e+00 : f32
    %47 = vector.broadcast %cst_18 : f32 to vector<2x32xf32>
    %48 = arith.divf %47, %46 : vector<2x32xf32>
    %49 = vector.extract_strided_slice %48 {offsets = [0, 0], sizes = [1, 32], strides = [1, 1]} : vector<2x32xf32> to vector<1x32xf32>
    %50 = vector.shape_cast %49 : vector<1x32xf32> to vector<1x32x1xf32>
    %51 = vector.extract_strided_slice %48 {offsets = [1, 0], sizes = [1, 32], strides = [1, 1]} : vector<2x32xf32> to vector<1x32xf32>
    %52 = vector.shape_cast %51 : vector<1x32xf32> to vector<1x32x1xf32>
    %cst_19 = arith.constant dense<0.000000e+00> : vector<1x256xf32>
    %53 = vector.multi_reduction <add>, %1, %cst_19 [1] : vector<1x32x256xf32> to vector<1x256xf32>
    %cst_20 = arith.constant 3.200000e+01 : f32
    %54 = vector.broadcast %cst_20 : f32 to vector<1x256xf32>
    %55 = arith.divf %53, %54 : vector<1x256xf32>
    %cst_21 = arith.constant dense<0.000000e+00> : vector<1x256xf32>
    %56 = vector.multi_reduction <add>, %0, %cst_21 [1] : vector<1x32x256xf32> to vector<1x256xf32>
    %cst_22 = arith.constant 3.200000e+01 : f32
    %57 = vector.broadcast %cst_22 : f32 to vector<1x256xf32>
    %58 = arith.divf %56, %57 : vector<1x256xf32>
    %c0_23 = arith.constant 0 : index
    %c0_24 = arith.constant 0 : index
    %59 = vector.load %arg5[%c0_23, %c0_24] : memref<9x256xf32, #tpu.memory_space<vmem>>, vector<9x256xf32>
    %60 = vector.extract_strided_slice %59 {offsets = [0, 0], sizes = [1, 256], strides = [1, 1]} : vector<9x256xf32> to vector<1x256xf32>
    %61 = vector.extract_strided_slice %59 {offsets = [1, 0], sizes = [1, 256], strides = [1, 1]} : vector<9x256xf32> to vector<1x256xf32>
    %62 = vector.extract_strided_slice %59 {offsets = [2, 0], sizes = [1, 256], strides = [1, 1]} : vector<9x256xf32> to vector<1x256xf32>
    %63 = vector.extract_strided_slice %59 {offsets = [3, 0], sizes = [1, 256], strides = [1, 1]} : vector<9x256xf32> to vector<1x256xf32>
    %64 = vector.extract_strided_slice %59 {offsets = [5, 0], sizes = [1, 256], strides = [1, 1]} : vector<9x256xf32> to vector<1x256xf32>
    %65 = vector.extract_strided_slice %59 {offsets = [6, 0], sizes = [1, 256], strides = [1, 1]} : vector<9x256xf32> to vector<1x256xf32>
    %66 = vector.extract_strided_slice %59 {offsets = [7, 0], sizes = [1, 256], strides = [1, 1]} : vector<9x256xf32> to vector<1x256xf32>
    %67 = vector.extract_strided_slice %59 {offsets = [8, 0], sizes = [1, 256], strides = [1, 1]} : vector<9x256xf32> to vector<1x256xf32>
    %c0_25 = arith.constant 0 : index
    %68 = memref.load %arg7[%c0_25] : memref<2xf32, #tpu.memory_space<smem>>
    %69 = vector.broadcast %68 : f32 to vector<1x256xf32>
    %c1 = arith.constant 1 : index
    %70 = memref.load %arg7[%c1] : memref<2xf32, #tpu.memory_space<smem>>
    %71 = vector.broadcast %70 : f32 to vector<1x256xf32>
    %c17_i32 = arith.constant 17 : i32
    %72 = tpu.dynamic_rotate %55 by %c17_i32 dim 1 : vector<1x256xf32>, i32 -> vector<1x256xf32>
    %73 = arith.mulf %72, %60 : vector<1x256xf32>
    %c0_26 = arith.constant 0 : index
    %74 = memref.load %arg6[%c0_26] : memref<36xf32, #tpu.memory_space<smem>>
    %75 = vector.broadcast %74 : f32 to vector<1x256xf32>
    %76 = arith.mulf %75, %73 : vector<1x256xf32>
    %c18 = arith.constant 18 : index
    %77 = memref.load %arg6[%c18] : memref<36xf32, #tpu.memory_space<smem>>
    %78 = vector.broadcast %77 : f32 to vector<1x256xf32>
    %79 = arith.mulf %78, %73 : vector<1x256xf32>
    %c16_i32 = arith.constant 16 : i32
    %80 = tpu.dynamic_rotate %55 by %c16_i32 dim 1 : vector<1x256xf32>, i32 -> vector<1x256xf32>
    %81 = arith.mulf %80, %61 : vector<1x256xf32>
    %c1_27 = arith.constant 1 : index
    %82 = memref.load %arg6[%c1_27] : memref<36xf32, #tpu.memory_space<smem>>
    %83 = vector.broadcast %82 : f32 to vector<1x256xf32>
    %84 = arith.mulf %83, %81 : vector<1x256xf32>
    %c19 = arith.constant 19 : index
    %85 = memref.load %arg6[%c19] : memref<36xf32, #tpu.memory_space<smem>>
    %86 = vector.broadcast %85 : f32 to vector<1x256xf32>
    %87 = arith.mulf %86, %81 : vector<1x256xf32>
    %c15_i32 = arith.constant 15 : i32
    %88 = tpu.dynamic_rotate %55 by %c15_i32 dim 1 : vector<1x256xf32>, i32 -> vector<1x256xf32>
    %89 = arith.mulf %88, %62 : vector<1x256xf32>
    %c2 = arith.constant 2 : index
    %90 = memref.load %arg6[%c2] : memref<36xf32, #tpu.memory_space<smem>>
    %91 = vector.broadcast %90 : f32 to vector<1x256xf32>
    %92 = arith.mulf %91, %89 : vector<1x256xf32>
    %c20 = arith.constant 20 : index
    %93 = memref.load %arg6[%c20] : memref<36xf32, #tpu.memory_space<smem>>
    %94 = vector.broadcast %93 : f32 to vector<1x256xf32>
    %95 = arith.mulf %94, %89 : vector<1x256xf32>
    %c1_i32 = arith.constant 1 : i32
    %96 = tpu.dynamic_rotate %55 by %c1_i32 dim 1 : vector<1x256xf32>, i32 -> vector<1x256xf32>
    %97 = arith.mulf %96, %63 : vector<1x256xf32>
    %c3 = arith.constant 3 : index
    %98 = memref.load %arg6[%c3] : memref<36xf32, #tpu.memory_space<smem>>
    %99 = vector.broadcast %98 : f32 to vector<1x256xf32>
    %100 = arith.mulf %99, %97 : vector<1x256xf32>
    %c21 = arith.constant 21 : index
    %101 = memref.load %arg6[%c21] : memref<36xf32, #tpu.memory_space<smem>>
    %102 = vector.broadcast %101 : f32 to vector<1x256xf32>
    %103 = arith.mulf %102, %97 : vector<1x256xf32>
    %c4 = arith.constant 4 : index
    %104 = memref.load %arg6[%c4] : memref<36xf32, #tpu.memory_space<smem>>
    %105 = vector.broadcast %104 : f32 to vector<1x256xf32>
    %106 = arith.mulf %105, %55 : vector<1x256xf32>
    %c22 = arith.constant 22 : index
    %107 = memref.load %arg6[%c22] : memref<36xf32, #tpu.memory_space<smem>>
    %108 = vector.broadcast %107 : f32 to vector<1x256xf32>
    %109 = arith.mulf %108, %55 : vector<1x256xf32>
    %c255_i32 = arith.constant 255 : i32
    %110 = tpu.dynamic_rotate %55 by %c255_i32 dim 1 : vector<1x256xf32>, i32 -> vector<1x256xf32>
    %111 = arith.mulf %110, %64 : vector<1x256xf32>
    %c5 = arith.constant 5 : index
    %112 = memref.load %arg6[%c5] : memref<36xf32, #tpu.memory_space<smem>>
    %113 = vector.broadcast %112 : f32 to vector<1x256xf32>
    %114 = arith.mulf %113, %111 : vector<1x256xf32>
    %c23 = arith.constant 23 : index
    %115 = memref.load %arg6[%c23] : memref<36xf32, #tpu.memory_space<smem>>
    %116 = vector.broadcast %115 : f32 to vector<1x256xf32>
    %117 = arith.mulf %116, %111 : vector<1x256xf32>
    %c241_i32 = arith.constant 241 : i32
    %118 = tpu.dynamic_rotate %55 by %c241_i32 dim 1 : vector<1x256xf32>, i32 -> vector<1x256xf32>
    %119 = arith.mulf %118, %65 : vector<1x256xf32>
    %c6 = arith.constant 6 : index
    %120 = memref.load %arg6[%c6] : memref<36xf32, #tpu.memory_space<smem>>
    %121 = vector.broadcast %120 : f32 to vector<1x256xf32>
    %122 = arith.mulf %121, %119 : vector<1x256xf32>
    %c24 = arith.constant 24 : index
    %123 = memref.load %arg6[%c24] : memref<36xf32, #tpu.memory_space<smem>>
    %124 = vector.broadcast %123 : f32 to vector<1x256xf32>
    %125 = arith.mulf %124, %119 : vector<1x256xf32>
    %c240_i32 = arith.constant 240 : i32
    %126 = tpu.dynamic_rotate %55 by %c240_i32 dim 1 : vector<1x256xf32>, i32 -> vector<1x256xf32>
    %127 = arith.mulf %126, %66 : vector<1x256xf32>
    %c7 = arith.constant 7 : index
    %128 = memref.load %arg6[%c7] : memref<36xf32, #tpu.memory_space<smem>>
    %129 = vector.broadcast %128 : f32 to vector<1x256xf32>
    %130 = arith.mulf %129, %127 : vector<1x256xf32>
    %c25 = arith.constant 25 : index
    %131 = memref.load %arg6[%c25] : memref<36xf32, #tpu.memory_space<smem>>
    %132 = vector.broadcast %131 : f32 to vector<1x256xf32>
    %133 = arith.mulf %132, %127 : vector<1x256xf32>
    %c239_i32 = arith.constant 239 : i32
    %134 = tpu.dynamic_rotate %55 by %c239_i32 dim 1 : vector<1x256xf32>, i32 -> vector<1x256xf32>
    %135 = arith.mulf %134, %67 : vector<1x256xf32>
    %c8 = arith.constant 8 : index
    %136 = memref.load %arg6[%c8] : memref<36xf32, #tpu.memory_space<smem>>
    %137 = vector.broadcast %136 : f32 to vector<1x256xf32>
    %138 = arith.mulf %137, %135 : vector<1x256xf32>
    %c26 = arith.constant 26 : index
    %139 = memref.load %arg6[%c26] : memref<36xf32, #tpu.memory_space<smem>>
    %140 = vector.broadcast %139 : f32 to vector<1x256xf32>
    %141 = arith.mulf %140, %135 : vector<1x256xf32>
    %c17_i32_28 = arith.constant 17 : i32
    %142 = tpu.dynamic_rotate %58 by %c17_i32_28 dim 1 : vector<1x256xf32>, i32 -> vector<1x256xf32>
    %143 = arith.mulf %142, %60 : vector<1x256xf32>
    %c9 = arith.constant 9 : index
    %144 = memref.load %arg6[%c9] : memref<36xf32, #tpu.memory_space<smem>>
    %145 = vector.broadcast %144 : f32 to vector<1x256xf32>
    %146 = arith.mulf %145, %143 : vector<1x256xf32>
    %c27 = arith.constant 27 : index
    %147 = memref.load %arg6[%c27] : memref<36xf32, #tpu.memory_space<smem>>
    %148 = vector.broadcast %147 : f32 to vector<1x256xf32>
    %149 = arith.mulf %148, %143 : vector<1x256xf32>
    %c16_i32_29 = arith.constant 16 : i32
    %150 = tpu.dynamic_rotate %58 by %c16_i32_29 dim 1 : vector<1x256xf32>, i32 -> vector<1x256xf32>
    %151 = arith.mulf %150, %61 : vector<1x256xf32>
    %c10 = arith.constant 10 : index
    %152 = memref.load %arg6[%c10] : memref<36xf32, #tpu.memory_space<smem>>
    %153 = vector.broadcast %152 : f32 to vector<1x256xf32>
    %154 = arith.mulf %153, %151 : vector<1x256xf32>
    %c28 = arith.constant 28 : index
    %155 = memref.load %arg6[%c28] : memref<36xf32, #tpu.memory_space<smem>>
    %156 = vector.broadcast %155 : f32 to vector<1x256xf32>
    %157 = arith.mulf %156, %151 : vector<1x256xf32>
    %c15_i32_30 = arith.constant 15 : i32
    %158 = tpu.dynamic_rotate %58 by %c15_i32_30 dim 1 : vector<1x256xf32>, i32 -> vector<1x256xf32>
    %159 = arith.mulf %158, %62 : vector<1x256xf32>
    %c11 = arith.constant 11 : index
    %160 = memref.load %arg6[%c11] : memref<36xf32, #tpu.memory_space<smem>>
    %161 = vector.broadcast %160 : f32 to vector<1x256xf32>
    %162 = arith.mulf %161, %159 : vector<1x256xf32>
    %c29 = arith.constant 29 : index
    %163 = memref.load %arg6[%c29] : memref<36xf32, #tpu.memory_space<smem>>
    %164 = vector.broadcast %163 : f32 to vector<1x256xf32>
    %165 = arith.mulf %164, %159 : vector<1x256xf32>
    %c1_i32_31 = arith.constant 1 : i32
    %166 = tpu.dynamic_rotate %58 by %c1_i32_31 dim 1 : vector<1x256xf32>, i32 -> vector<1x256xf32>
    %167 = arith.mulf %166, %63 : vector<1x256xf32>
    %c12 = arith.constant 12 : index
    %168 = memref.load %arg6[%c12] : memref<36xf32, #tpu.memory_space<smem>>
    %169 = vector.broadcast %168 : f32 to vector<1x256xf32>
    %170 = arith.mulf %169, %167 : vector<1x256xf32>
    %c30 = arith.constant 30 : index
    %171 = memref.load %arg6[%c30] : memref<36xf32, #tpu.memory_space<smem>>
    %172 = vector.broadcast %171 : f32 to vector<1x256xf32>
    %173 = arith.mulf %172, %167 : vector<1x256xf32>
    %c13 = arith.constant 13 : index
    %174 = memref.load %arg6[%c13] : memref<36xf32, #tpu.memory_space<smem>>
    %175 = vector.broadcast %174 : f32 to vector<1x256xf32>
    %176 = arith.mulf %175, %58 : vector<1x256xf32>
    %c31 = arith.constant 31 : index
    %177 = memref.load %arg6[%c31] : memref<36xf32, #tpu.memory_space<smem>>
    %178 = vector.broadcast %177 : f32 to vector<1x256xf32>
    %179 = arith.mulf %178, %58 : vector<1x256xf32>
    %c255_i32_32 = arith.constant 255 : i32
    %180 = tpu.dynamic_rotate %58 by %c255_i32_32 dim 1 : vector<1x256xf32>, i32 -> vector<1x256xf32>
    %181 = arith.mulf %180, %64 : vector<1x256xf32>
    %c14 = arith.constant 14 : index
    %182 = memref.load %arg6[%c14] : memref<36xf32, #tpu.memory_space<smem>>
    %183 = vector.broadcast %182 : f32 to vector<1x256xf32>
    %184 = arith.mulf %183, %181 : vector<1x256xf32>
    %c32 = arith.constant 32 : index
    %185 = memref.load %arg6[%c32] : memref<36xf32, #tpu.memory_space<smem>>
    %186 = vector.broadcast %185 : f32 to vector<1x256xf32>
    %187 = arith.mulf %186, %181 : vector<1x256xf32>
    %c241_i32_33 = arith.constant 241 : i32
    %188 = tpu.dynamic_rotate %58 by %c241_i32_33 dim 1 : vector<1x256xf32>, i32 -> vector<1x256xf32>
    %189 = arith.mulf %188, %65 : vector<1x256xf32>
    %c15 = arith.constant 15 : index
    %190 = memref.load %arg6[%c15] : memref<36xf32, #tpu.memory_space<smem>>
    %191 = vector.broadcast %190 : f32 to vector<1x256xf32>
    %192 = arith.mulf %191, %189 : vector<1x256xf32>
    %c33 = arith.constant 33 : index
    %193 = memref.load %arg6[%c33] : memref<36xf32, #tpu.memory_space<smem>>
    %194 = vector.broadcast %193 : f32 to vector<1x256xf32>
    %195 = arith.mulf %194, %189 : vector<1x256xf32>
    %c240_i32_34 = arith.constant 240 : i32
    %196 = tpu.dynamic_rotate %58 by %c240_i32_34 dim 1 : vector<1x256xf32>, i32 -> vector<1x256xf32>
    %197 = arith.mulf %196, %66 : vector<1x256xf32>
    %c16 = arith.constant 16 : index
    %198 = memref.load %arg6[%c16] : memref<36xf32, #tpu.memory_space<smem>>
    %199 = vector.broadcast %198 : f32 to vector<1x256xf32>
    %200 = arith.mulf %199, %197 : vector<1x256xf32>
    %c34 = arith.constant 34 : index
    %201 = memref.load %arg6[%c34] : memref<36xf32, #tpu.memory_space<smem>>
    %202 = vector.broadcast %201 : f32 to vector<1x256xf32>
    %203 = arith.mulf %202, %197 : vector<1x256xf32>
    %c239_i32_35 = arith.constant 239 : i32
    %204 = tpu.dynamic_rotate %58 by %c239_i32_35 dim 1 : vector<1x256xf32>, i32 -> vector<1x256xf32>
    %205 = arith.mulf %204, %67 : vector<1x256xf32>
    %c17 = arith.constant 17 : index
    %206 = memref.load %arg6[%c17] : memref<36xf32, #tpu.memory_space<smem>>
    %207 = vector.broadcast %206 : f32 to vector<1x256xf32>
    %208 = arith.mulf %207, %205 : vector<1x256xf32>
    %c35 = arith.constant 35 : index
    %209 = memref.load %arg6[%c35] : memref<36xf32, #tpu.memory_space<smem>>
    %210 = vector.broadcast %209 : f32 to vector<1x256xf32>
    %211 = arith.mulf %210, %205 : vector<1x256xf32>
    %212 = arith.addf %69, %76 : vector<1x256xf32>
    %213 = arith.addf %84, %92 : vector<1x256xf32>
    %214 = arith.addf %100, %106 : vector<1x256xf32>
    %215 = arith.addf %114, %122 : vector<1x256xf32>
    %216 = arith.addf %130, %138 : vector<1x256xf32>
    %217 = arith.addf %146, %154 : vector<1x256xf32>
    %218 = arith.addf %162, %170 : vector<1x256xf32>
    %219 = arith.addf %176, %184 : vector<1x256xf32>
    %220 = arith.addf %192, %200 : vector<1x256xf32>
    %221 = arith.addf %212, %213 : vector<1x256xf32>
    %222 = arith.addf %214, %215 : vector<1x256xf32>
    %223 = arith.addf %216, %217 : vector<1x256xf32>
    %224 = arith.addf %218, %219 : vector<1x256xf32>
    %225 = arith.addf %220, %208 : vector<1x256xf32>
    %226 = arith.addf %221, %222 : vector<1x256xf32>
    %227 = arith.addf %223, %224 : vector<1x256xf32>
    %228 = arith.addf %226, %227 : vector<1x256xf32>
    %229 = arith.addf %228, %225 : vector<1x256xf32>
    %230 = arith.addf %71, %79 : vector<1x256xf32>
    %231 = arith.addf %87, %95 : vector<1x256xf32>
    %232 = arith.addf %103, %109 : vector<1x256xf32>
    %233 = arith.addf %117, %125 : vector<1x256xf32>
    %234 = arith.addf %133, %141 : vector<1x256xf32>
    %235 = arith.addf %149, %157 : vector<1x256xf32>
    %236 = arith.addf %165, %173 : vector<1x256xf32>
    %237 = arith.addf %179, %187 : vector<1x256xf32>
    %238 = arith.addf %195, %203 : vector<1x256xf32>
    %239 = arith.addf %230, %231 : vector<1x256xf32>
    %240 = arith.addf %232, %233 : vector<1x256xf32>
    %241 = arith.addf %234, %235 : vector<1x256xf32>
    %242 = arith.addf %236, %237 : vector<1x256xf32>
    %243 = arith.addf %238, %211 : vector<1x256xf32>
    %244 = arith.addf %239, %240 : vector<1x256xf32>
    %245 = arith.addf %241, %242 : vector<1x256xf32>
    %246 = arith.addf %244, %245 : vector<1x256xf32>
    %247 = arith.addf %246, %243 : vector<1x256xf32>
    %cst_36 = arith.constant 0.000000e+00 : f32
    %248 = vector.broadcast %cst_36 : f32 to vector<1x256xf32>
    %249 = arith.maximumf %229, %248 : vector<1x256xf32>
    %cst_37 = arith.constant 0.000000e+00 : f32
    %250 = vector.broadcast %cst_37 : f32 to vector<1x256xf32>
    %251 = arith.maximumf %247, %250 : vector<1x256xf32>
    %c0_38 = arith.constant 0 : index
    %252 = memref.load %arg9[%c0_38] : memref<2xf32, #tpu.memory_space<smem>>
    %253 = vector.broadcast %252 : f32 to vector<1x256xf32>
    %c1_39 = arith.constant 1 : index
    %254 = memref.load %arg9[%c1_39] : memref<2xf32, #tpu.memory_space<smem>>
    %255 = vector.broadcast %254 : f32 to vector<1x256xf32>
    %c17_i32_40 = arith.constant 17 : i32
    %256 = tpu.dynamic_rotate %249 by %c17_i32_40 dim 1 : vector<1x256xf32>, i32 -> vector<1x256xf32>
    %257 = arith.mulf %256, %60 : vector<1x256xf32>
    %c0_41 = arith.constant 0 : index
    %258 = memref.load %arg8[%c0_41] : memref<36xf32, #tpu.memory_space<smem>>
    %259 = vector.broadcast %258 : f32 to vector<1x256xf32>
    %260 = arith.mulf %259, %257 : vector<1x256xf32>
    %c18_42 = arith.constant 18 : index
    %261 = memref.load %arg8[%c18_42] : memref<36xf32, #tpu.memory_space<smem>>
    %262 = vector.broadcast %261 : f32 to vector<1x256xf32>
    %263 = arith.mulf %262, %257 : vector<1x256xf32>
    %c16_i32_43 = arith.constant 16 : i32
    %264 = tpu.dynamic_rotate %249 by %c16_i32_43 dim 1 : vector<1x256xf32>, i32 -> vector<1x256xf32>
    %265 = arith.mulf %264, %61 : vector<1x256xf32>
    %c1_44 = arith.constant 1 : index
    %266 = memref.load %arg8[%c1_44] : memref<36xf32, #tpu.memory_space<smem>>
    %267 = vector.broadcast %266 : f32 to vector<1x256xf32>
    %268 = arith.mulf %267, %265 : vector<1x256xf32>
    %c19_45 = arith.constant 19 : index
    %269 = memref.load %arg8[%c19_45] : memref<36xf32, #tpu.memory_space<smem>>
    %270 = vector.broadcast %269 : f32 to vector<1x256xf32>
    %271 = arith.mulf %270, %265 : vector<1x256xf32>
    %c15_i32_46 = arith.constant 15 : i32
    %272 = tpu.dynamic_rotate %249 by %c15_i32_46 dim 1 : vector<1x256xf32>, i32 -> vector<1x256xf32>
    %273 = arith.mulf %272, %62 : vector<1x256xf32>
    %c2_47 = arith.constant 2 : index
    %274 = memref.load %arg8[%c2_47] : memref<36xf32, #tpu.memory_space<smem>>
    %275 = vector.broadcast %274 : f32 to vector<1x256xf32>
    %276 = arith.mulf %275, %273 : vector<1x256xf32>
    %c20_48 = arith.constant 20 : index
    %277 = memref.load %arg8[%c20_48] : memref<36xf32, #tpu.memory_space<smem>>
    %278 = vector.broadcast %277 : f32 to vector<1x256xf32>
    %279 = arith.mulf %278, %273 : vector<1x256xf32>
    %c1_i32_49 = arith.constant 1 : i32
    %280 = tpu.dynamic_rotate %249 by %c1_i32_49 dim 1 : vector<1x256xf32>, i32 -> vector<1x256xf32>
    %281 = arith.mulf %280, %63 : vector<1x256xf32>
    %c3_50 = arith.constant 3 : index
    %282 = memref.load %arg8[%c3_50] : memref<36xf32, #tpu.memory_space<smem>>
    %283 = vector.broadcast %282 : f32 to vector<1x256xf32>
    %284 = arith.mulf %283, %281 : vector<1x256xf32>
    %c21_51 = arith.constant 21 : index
    %285 = memref.load %arg8[%c21_51] : memref<36xf32, #tpu.memory_space<smem>>
    %286 = vector.broadcast %285 : f32 to vector<1x256xf32>
    %287 = arith.mulf %286, %281 : vector<1x256xf32>
    %c4_52 = arith.constant 4 : index
    %288 = memref.load %arg8[%c4_52] : memref<36xf32, #tpu.memory_space<smem>>
    %289 = vector.broadcast %288 : f32 to vector<1x256xf32>
    %290 = arith.mulf %289, %249 : vector<1x256xf32>
    %c22_53 = arith.constant 22 : index
    %291 = memref.load %arg8[%c22_53] : memref<36xf32, #tpu.memory_space<smem>>
    %292 = vector.broadcast %291 : f32 to vector<1x256xf32>
    %293 = arith.mulf %292, %249 : vector<1x256xf32>
    %c255_i32_54 = arith.constant 255 : i32
    %294 = tpu.dynamic_rotate %249 by %c255_i32_54 dim 1 : vector<1x256xf32>, i32 -> vector<1x256xf32>
    %295 = arith.mulf %294, %64 : vector<1x256xf32>
    %c5_55 = arith.constant 5 : index
    %296 = memref.load %arg8[%c5_55] : memref<36xf32, #tpu.memory_space<smem>>
    %297 = vector.broadcast %296 : f32 to vector<1x256xf32>
    %298 = arith.mulf %297, %295 : vector<1x256xf32>
    %c23_56 = arith.constant 23 : index
    %299 = memref.load %arg8[%c23_56] : memref<36xf32, #tpu.memory_space<smem>>
    %300 = vector.broadcast %299 : f32 to vector<1x256xf32>
    %301 = arith.mulf %300, %295 : vector<1x256xf32>
    %c241_i32_57 = arith.constant 241 : i32
    %302 = tpu.dynamic_rotate %249 by %c241_i32_57 dim 1 : vector<1x256xf32>, i32 -> vector<1x256xf32>
    %303 = arith.mulf %302, %65 : vector<1x256xf32>
    %c6_58 = arith.constant 6 : index
    %304 = memref.load %arg8[%c6_58] : memref<36xf32, #tpu.memory_space<smem>>
    %305 = vector.broadcast %304 : f32 to vector<1x256xf32>
    %306 = arith.mulf %305, %303 : vector<1x256xf32>
    %c24_59 = arith.constant 24 : index
    %307 = memref.load %arg8[%c24_59] : memref<36xf32, #tpu.memory_space<smem>>
    %308 = vector.broadcast %307 : f32 to vector<1x256xf32>
    %309 = arith.mulf %308, %303 : vector<1x256xf32>
    %c240_i32_60 = arith.constant 240 : i32
    %310 = tpu.dynamic_rotate %249 by %c240_i32_60 dim 1 : vector<1x256xf32>, i32 -> vector<1x256xf32>
    %311 = arith.mulf %310, %66 : vector<1x256xf32>
    %c7_61 = arith.constant 7 : index
    %312 = memref.load %arg8[%c7_61] : memref<36xf32, #tpu.memory_space<smem>>
    %313 = vector.broadcast %312 : f32 to vector<1x256xf32>
    %314 = arith.mulf %313, %311 : vector<1x256xf32>
    %c25_62 = arith.constant 25 : index
    %315 = memref.load %arg8[%c25_62] : memref<36xf32, #tpu.memory_space<smem>>
    %316 = vector.broadcast %315 : f32 to vector<1x256xf32>
    %317 = arith.mulf %316, %311 : vector<1x256xf32>
    %c239_i32_63 = arith.constant 239 : i32
    %318 = tpu.dynamic_rotate %249 by %c239_i32_63 dim 1 : vector<1x256xf32>, i32 -> vector<1x256xf32>
    %319 = arith.mulf %318, %67 : vector<1x256xf32>
    %c8_64 = arith.constant 8 : index
    %320 = memref.load %arg8[%c8_64] : memref<36xf32, #tpu.memory_space<smem>>
    %321 = vector.broadcast %320 : f32 to vector<1x256xf32>
    %322 = arith.mulf %321, %319 : vector<1x256xf32>
    %c26_65 = arith.constant 26 : index
    %323 = memref.load %arg8[%c26_65] : memref<36xf32, #tpu.memory_space<smem>>
    %324 = vector.broadcast %323 : f32 to vector<1x256xf32>
    %325 = arith.mulf %324, %319 : vector<1x256xf32>
    %c17_i32_66 = arith.constant 17 : i32
    %326 = tpu.dynamic_rotate %251 by %c17_i32_66 dim 1 : vector<1x256xf32>, i32 -> vector<1x256xf32>
    %327 = arith.mulf %326, %60 : vector<1x256xf32>
    %c9_67 = arith.constant 9 : index
    %328 = memref.load %arg8[%c9_67] : memref<36xf32, #tpu.memory_space<smem>>
    %329 = vector.broadcast %328 : f32 to vector<1x256xf32>
    %330 = arith.mulf %329, %327 : vector<1x256xf32>
    %c27_68 = arith.constant 27 : index
    %331 = memref.load %arg8[%c27_68] : memref<36xf32, #tpu.memory_space<smem>>
    %332 = vector.broadcast %331 : f32 to vector<1x256xf32>
    %333 = arith.mulf %332, %327 : vector<1x256xf32>
    %c16_i32_69 = arith.constant 16 : i32
    %334 = tpu.dynamic_rotate %251 by %c16_i32_69 dim 1 : vector<1x256xf32>, i32 -> vector<1x256xf32>
    %335 = arith.mulf %334, %61 : vector<1x256xf32>
    %c10_70 = arith.constant 10 : index
    %336 = memref.load %arg8[%c10_70] : memref<36xf32, #tpu.memory_space<smem>>
    %337 = vector.broadcast %336 : f32 to vector<1x256xf32>
    %338 = arith.mulf %337, %335 : vector<1x256xf32>
    %c28_71 = arith.constant 28 : index
    %339 = memref.load %arg8[%c28_71] : memref<36xf32, #tpu.memory_space<smem>>
    %340 = vector.broadcast %339 : f32 to vector<1x256xf32>
    %341 = arith.mulf %340, %335 : vector<1x256xf32>
    %c15_i32_72 = arith.constant 15 : i32
    %342 = tpu.dynamic_rotate %251 by %c15_i32_72 dim 1 : vector<1x256xf32>, i32 -> vector<1x256xf32>
    %343 = arith.mulf %342, %62 : vector<1x256xf32>
    %c11_73 = arith.constant 11 : index
    %344 = memref.load %arg8[%c11_73] : memref<36xf32, #tpu.memory_space<smem>>
    %345 = vector.broadcast %344 : f32 to vector<1x256xf32>
    %346 = arith.mulf %345, %343 : vector<1x256xf32>
    %c29_74 = arith.constant 29 : index
    %347 = memref.load %arg8[%c29_74] : memref<36xf32, #tpu.memory_space<smem>>
    %348 = vector.broadcast %347 : f32 to vector<1x256xf32>
    %349 = arith.mulf %348, %343 : vector<1x256xf32>
    %c1_i32_75 = arith.constant 1 : i32
    %350 = tpu.dynamic_rotate %251 by %c1_i32_75 dim 1 : vector<1x256xf32>, i32 -> vector<1x256xf32>
    %351 = arith.mulf %350, %63 : vector<1x256xf32>
    %c12_76 = arith.constant 12 : index
    %352 = memref.load %arg8[%c12_76] : memref<36xf32, #tpu.memory_space<smem>>
    %353 = vector.broadcast %352 : f32 to vector<1x256xf32>
    %354 = arith.mulf %353, %351 : vector<1x256xf32>
    %c30_77 = arith.constant 30 : index
    %355 = memref.load %arg8[%c30_77] : memref<36xf32, #tpu.memory_space<smem>>
    %356 = vector.broadcast %355 : f32 to vector<1x256xf32>
    %357 = arith.mulf %356, %351 : vector<1x256xf32>
    %c13_78 = arith.constant 13 : index
    %358 = memref.load %arg8[%c13_78] : memref<36xf32, #tpu.memory_space<smem>>
    %359 = vector.broadcast %358 : f32 to vector<1x256xf32>
    %360 = arith.mulf %359, %251 : vector<1x256xf32>
    %c31_79 = arith.constant 31 : index
    %361 = memref.load %arg8[%c31_79] : memref<36xf32, #tpu.memory_space<smem>>
    %362 = vector.broadcast %361 : f32 to vector<1x256xf32>
    %363 = arith.mulf %362, %251 : vector<1x256xf32>
    %c255_i32_80 = arith.constant 255 : i32
    %364 = tpu.dynamic_rotate %251 by %c255_i32_80 dim 1 : vector<1x256xf32>, i32 -> vector<1x256xf32>
    %365 = arith.mulf %364, %64 : vector<1x256xf32>
    %c14_81 = arith.constant 14 : index
    %366 = memref.load %arg8[%c14_81] : memref<36xf32, #tpu.memory_space<smem>>
    %367 = vector.broadcast %366 : f32 to vector<1x256xf32>
    %368 = arith.mulf %367, %365 : vector<1x256xf32>
    %c32_82 = arith.constant 32 : index
    %369 = memref.load %arg8[%c32_82] : memref<36xf32, #tpu.memory_space<smem>>
    %370 = vector.broadcast %369 : f32 to vector<1x256xf32>
    %371 = arith.mulf %370, %365 : vector<1x256xf32>
    %c241_i32_83 = arith.constant 241 : i32
    %372 = tpu.dynamic_rotate %251 by %c241_i32_83 dim 1 : vector<1x256xf32>, i32 -> vector<1x256xf32>
    %373 = arith.mulf %372, %65 : vector<1x256xf32>
    %c15_84 = arith.constant 15 : index
    %374 = memref.load %arg8[%c15_84] : memref<36xf32, #tpu.memory_space<smem>>
    %375 = vector.broadcast %374 : f32 to vector<1x256xf32>
    %376 = arith.mulf %375, %373 : vector<1x256xf32>
    %c33_85 = arith.constant 33 : index
    %377 = memref.load %arg8[%c33_85] : memref<36xf32, #tpu.memory_space<smem>>
    %378 = vector.broadcast %377 : f32 to vector<1x256xf32>
    %379 = arith.mulf %378, %373 : vector<1x256xf32>
    %c240_i32_86 = arith.constant 240 : i32
    %380 = tpu.dynamic_rotate %251 by %c240_i32_86 dim 1 : vector<1x256xf32>, i32 -> vector<1x256xf32>
    %381 = arith.mulf %380, %66 : vector<1x256xf32>
    %c16_87 = arith.constant 16 : index
    %382 = memref.load %arg8[%c16_87] : memref<36xf32, #tpu.memory_space<smem>>
    %383 = vector.broadcast %382 : f32 to vector<1x256xf32>
    %384 = arith.mulf %383, %381 : vector<1x256xf32>
    %c34_88 = arith.constant 34 : index
    %385 = memref.load %arg8[%c34_88] : memref<36xf32, #tpu.memory_space<smem>>
    %386 = vector.broadcast %385 : f32 to vector<1x256xf32>
    %387 = arith.mulf %386, %381 : vector<1x256xf32>
    %c239_i32_89 = arith.constant 239 : i32
    %388 = tpu.dynamic_rotate %251 by %c239_i32_89 dim 1 : vector<1x256xf32>, i32 -> vector<1x256xf32>
    %389 = arith.mulf %388, %67 : vector<1x256xf32>
    %c17_90 = arith.constant 17 : index
    %390 = memref.load %arg8[%c17_90] : memref<36xf32, #tpu.memory_space<smem>>
    %391 = vector.broadcast %390 : f32 to vector<1x256xf32>
    %392 = arith.mulf %391, %389 : vector<1x256xf32>
    %c35_91 = arith.constant 35 : index
    %393 = memref.load %arg8[%c35_91] : memref<36xf32, #tpu.memory_space<smem>>
    %394 = vector.broadcast %393 : f32 to vector<1x256xf32>
    %395 = arith.mulf %394, %389 : vector<1x256xf32>
    %396 = arith.addf %253, %260 : vector<1x256xf32>
    %397 = arith.addf %268, %276 : vector<1x256xf32>
    %398 = arith.addf %284, %290 : vector<1x256xf32>
    %399 = arith.addf %298, %306 : vector<1x256xf32>
    %400 = arith.addf %314, %322 : vector<1x256xf32>
    %401 = arith.addf %330, %338 : vector<1x256xf32>
    %402 = arith.addf %346, %354 : vector<1x256xf32>
    %403 = arith.addf %360, %368 : vector<1x256xf32>
    %404 = arith.addf %376, %384 : vector<1x256xf32>
    %405 = arith.addf %396, %397 : vector<1x256xf32>
    %406 = arith.addf %398, %399 : vector<1x256xf32>
    %407 = arith.addf %400, %401 : vector<1x256xf32>
    %408 = arith.addf %402, %403 : vector<1x256xf32>
    %409 = arith.addf %404, %392 : vector<1x256xf32>
    %410 = arith.addf %405, %406 : vector<1x256xf32>
    %411 = arith.addf %407, %408 : vector<1x256xf32>
    %412 = arith.addf %410, %411 : vector<1x256xf32>
    %413 = arith.addf %412, %409 : vector<1x256xf32>
    %414 = arith.addf %255, %263 : vector<1x256xf32>
    %415 = arith.addf %271, %279 : vector<1x256xf32>
    %416 = arith.addf %287, %293 : vector<1x256xf32>
    %417 = arith.addf %301, %309 : vector<1x256xf32>
    %418 = arith.addf %317, %325 : vector<1x256xf32>
    %419 = arith.addf %333, %341 : vector<1x256xf32>
    %420 = arith.addf %349, %357 : vector<1x256xf32>
    %421 = arith.addf %363, %371 : vector<1x256xf32>
    %422 = arith.addf %379, %387 : vector<1x256xf32>
    %423 = arith.addf %414, %415 : vector<1x256xf32>
    %424 = arith.addf %416, %417 : vector<1x256xf32>
    %425 = arith.addf %418, %419 : vector<1x256xf32>
    %426 = arith.addf %420, %421 : vector<1x256xf32>
    %427 = arith.addf %422, %395 : vector<1x256xf32>
    %428 = arith.addf %423, %424 : vector<1x256xf32>
    %429 = arith.addf %425, %426 : vector<1x256xf32>
    %430 = arith.addf %428, %429 : vector<1x256xf32>
    %431 = arith.addf %430, %427 : vector<1x256xf32>
    %cst_92 = arith.constant 0.000000e+00 : f32
    %432 = vector.broadcast %cst_92 : f32 to vector<1x256xf32>
    %433 = arith.maximumf %413, %432 : vector<1x256xf32>
    %cst_93 = arith.constant 0.000000e+00 : f32
    %434 = vector.broadcast %cst_93 : f32 to vector<1x256xf32>
    %435 = arith.maximumf %431, %434 : vector<1x256xf32>
    %c0_94 = arith.constant 0 : index
    %436 = memref.load %arg11[%c0_94] : memref<1xf32, #tpu.memory_space<smem>>
    %c0_95 = arith.constant 0 : index
    %437 = memref.load %arg10[%c0_95] : memref<2xf32, #tpu.memory_space<smem>>
    %438 = vector.broadcast %437 : f32 to vector<1x256xf32>
    %439 = arith.mulf %438, %433 : vector<1x256xf32>
    %440 = vector.broadcast %436 : f32 to vector<1x256xf32>
    %441 = arith.addf %440, %439 : vector<1x256xf32>
    %c1_96 = arith.constant 1 : index
    %442 = memref.load %arg10[%c1_96] : memref<2xf32, #tpu.memory_space<smem>>
    %443 = vector.broadcast %442 : f32 to vector<1x256xf32>
    %444 = arith.mulf %443, %435 : vector<1x256xf32>
    %445 = arith.addf %441, %444 : vector<1x256xf32>
    %cst_97 = arith.constant 0.000000e+00 : f32
    %446 = vector.broadcast %cst_97 : f32 to vector<1x256xf32>
    %447 = arith.subf %446, %445 : vector<1x256xf32>
    %448 = math.exp %447 : vector<1x256xf32>
    %cst_98 = arith.constant 1.000000e+00 : f32
    %449 = vector.broadcast %cst_98 : f32 to vector<1x256xf32>
    %450 = arith.addf %449, %448 : vector<1x256xf32>
    %cst_99 = arith.constant 1.000000e+00 : f32
    %451 = vector.broadcast %cst_99 : f32 to vector<1x256xf32>
    %452 = arith.divf %451, %450 : vector<1x256xf32>
    %453 = vector.shape_cast %452 : vector<1x256xf32> to vector<1x1x256xf32>
    %454 = vector.broadcast %52 : vector<1x32x1xf32> to vector<1x32x256xf32>
    %455 = arith.mulf %454, %1 : vector<1x32x256xf32>
    %456 = vector.broadcast %453 : vector<1x1x256xf32> to vector<1x32x256xf32>
    %457 = arith.mulf %455, %456 : vector<1x32x256xf32>
    %458 = arith.addf %0, %457 : vector<1x32x256xf32>
    %c0_100 = arith.constant 0 : index
    %c0_101 = arith.constant 0 : index
    %c0_102 = arith.constant 0 : index
    %459 = vector.load %arg12[%c0_100, %c0_101, %c0_102] : memref<1x32x256xf32, #tpu.memory_space<vmem>>, vector<1x32x256xf32>
    tpu.vector_store %arg12[%c0_100, %c0_101, %c0_102], %458 {strides = array<i32>} : memref<1x32x256xf32, #tpu.memory_space<vmem>>, vector<1x32x256xf32>,
    %460 = vector.broadcast %50 : vector<1x32x1xf32> to vector<1x32x256xf32>
    %461 = arith.mulf %460, %0 : vector<1x32x256xf32>
    %462 = vector.broadcast %453 : vector<1x1x256xf32> to vector<1x32x256xf32>
    %463 = arith.mulf %461, %462 : vector<1x32x256xf32>
    %464 = arith.addf %1, %463 : vector<1x32x256xf32>
    %c0_103 = arith.constant 0 : index
    %c0_104 = arith.constant 0 : index
    %c0_105 = arith.constant 0 : index
    %465 = vector.load %arg13[%c0_103, %c0_104, %c0_105] : memref<1x32x256xf32, #tpu.memory_space<vmem>>, vector<1x32x256xf32>
    tpu.vector_store %arg13[%c0_103, %c0_104, %c0_105], %464 {strides = array<i32>} : memref<1x32x256xf32, #tpu.memory_space<vmem>>, vector<1x32x256xf32>,
    %c0_106 = arith.constant 0 : index
    %c0_107 = arith.constant 0 : index
    %c0_108 = arith.constant 0 : index
    %466 = vector.load %arg14[%c0_106, %c0_107, %c0_108] : memref<1x1x256xf32, #tpu.memory_space<vmem>>, vector<1x1x256xf32>
    tpu.vector_store %arg14[%c0_106, %c0_107, %c0_108], %453 {strides = array<i32>} : memref<1x1x256xf32, #tpu.memory_space<vmem>>, vector<1x1x256xf32>,
    return
  }
  func.func @transform_0(%arg0: i32) -> (i32, i32, i32) {
    %c0_i32 = arith.constant 0 : i32
    %c0_i32_0 = arith.constant 0 : i32
    %c0_i32_1 = arith.constant 0 : i32
    return %arg0, %c0_i32, %c0_i32_0 : i32, i32, i32
  }
  func.func @transform_1(%arg0: i32) -> (i32, i32, i32) {
    %c0_i32 = arith.constant 0 : i32
    %c0_i32_0 = arith.constant 0 : i32
    %c0_i32_1 = arith.constant 0 : i32
    return %arg0, %c0_i32, %c0_i32_0 : i32, i32, i32
  }
  func.func @transform_2(%arg0: i32) -> (i32, i32) {
    %c0_i32 = arith.constant 0 : i32
    %c0_i32_0 = arith.constant 0 : i32
    %c0_i32_1 = arith.constant 0 : i32
    return %c0_i32, %c0_i32_0 : i32, i32
  }
  func.func @transform_3(%arg0: i32) -> (i32, i32) {
    %c0_i32 = arith.constant 0 : i32
    %c0_i32_0 = arith.constant 0 : i32
    %c0_i32_1 = arith.constant 0 : i32
    return %c0_i32, %c0_i32_0 : i32, i32
  }
  func.func @transform_4(%arg0: i32) -> (i32, i32) {
    %c0_i32 = arith.constant 0 : i32
    %c0_i32_0 = arith.constant 0 : i32
    %c0_i32_1 = arith.constant 0 : i32
    return %c0_i32, %c0_i32_0 : i32, i32
  }
  func.func @transform_5(%arg0: i32) -> i32 {
    %c0_i32 = arith.constant 0 : i32
    %c0_i32_0 = arith.constant 0 : i32
    return %c0_i32 : i32
  }
  func.func @transform_6(%arg0: i32) -> i32 {
    %c0_i32 = arith.constant 0 : i32
    %c0_i32_0 = arith.constant 0 : i32
    return %c0_i32 : i32
  }
  func.func @transform_7(%arg0: i32) -> i32 {
    %c0_i32 = arith.constant 0 : i32
    %c0_i32_0 = arith.constant 0 : i32
    return %c0_i32 : i32
  }
  func.func @transform_8(%arg0: i32) -> i32 {
    %c0_i32 = arith.constant 0 : i32
    %c0_i32_0 = arith.constant 0 : i32
    return %c0_i32 : i32
  }
  func.func @transform_9(%arg0: i32) -> i32 {
    %c0_i32 = arith.constant 0 : i32
    %c0_i32_0 = arith.constant 0 : i32
    return %c0_i32 : i32
  }
  func.func @transform_10(%arg0: i32) -> i32 {
    %c0_i32 = arith.constant 0 : i32
    %c0_i32_0 = arith.constant 0 : i32
    return %c0_i32 : i32
  }
  func.func @transform_11(%arg0: i32) -> (i32, i32, i32) {
    %c0_i32 = arith.constant 0 : i32
    %c0_i32_0 = arith.constant 0 : i32
    %c0_i32_1 = arith.constant 0 : i32
    return %arg0, %c0_i32, %c0_i32_0 : i32, i32, i32
  }
  func.func @transform_12(%arg0: i32) -> (i32, i32, i32) {
    %c0_i32 = arith.constant 0 : i32
    %c0_i32_0 = arith.constant 0 : i32
    %c0_i32_1 = arith.constant 0 : i32
    return %arg0, %c0_i32, %c0_i32_0 : i32, i32, i32
  }
  func.func @transform_13(%arg0: i32) -> (i32, i32, i32) {
    %c0_i32 = arith.constant 0 : i32
    %c0_i32_0 = arith.constant 0 : i32
    %c0_i32_1 = arith.constant 0 : i32
    return %arg0, %c0_i32, %c0_i32_0 : i32, i32, i32
  }
}

</mosaic_0001>

<bundles_post_ra>
// kernel: tpu_custom_call.1
= control target key start
LH: loop header
LB: loop body
LE: loop exit
PB: predicated region body
PF: predicated region fallthrough
CT: control target
= control target key end

     0   :  { %s4257_s0 = inlined_call_operand.hbm [shape: f32[2,32,256], index: 0, kind: input, shape index: {}]   ;;  %s4258_s1 = inlined_call_operand.hbm [shape: f32[2,32,256], index: 1, kind: input, shape index: {}]   ;;  %s4259_s2 = inlined_call_operand.vmem [shape: f32[2,32], index: 2, kind: input, shape index: {}]   ;;  %s4260_s3 = inlined_call_operand.vmem [shape: f32[2,32], index: 3, kind: input, shape index: {}]   ;;  %s4261_s4 = inlined_call_operand.hbm [shape: f32[9,256], index: 4, kind: input, shape index: {}]   ;;  %s4262_s5 = inlined_call_operand.vmem [shape: f32[36], index: 5, kind: input, shape index: {}]   ;;  %s4263_s6 = inlined_call_operand.vmem [shape: f32[2], index: 6, kind: input, shape index: {}]   ;;  %s4264_s7 = inlined_call_operand.vmem [shape: f32[36], index: 7, kind: input, shape index: {}]   ;;  %s4265_s8 = inlined_call_operand.vmem [shape: f32[2], index: 8, kind: input, shape index: {}]   ;;  %s4266_s9 = inlined_call_operand.vmem [shape: f32[2], index: 9, kind: input, shape index: {}]   ;;  %s4267_s10 = inlined_call_operand.<no memory space> [shape: f32[1], index: 10, kind: input, shape index: {}]   ;;  %s4268_s11 = inlined_call_operand.hbm [shape: f32[2,32,256], index: 11, kind: output, shape index: {0}]   ;;  %s4269_s12 = inlined_call_operand.hbm [shape: f32[2,32,256], index: 12, kind: output, shape index: {1}]   ;;  %s4270_s13 = inlined_call_operand.hbm [shape: f32[2,1,256], index: 13, kind: output, shape index: {2}]  }
   0x1   :  { %4335 = sst [smem:[#allocation52_spill]] %s4257_s0 }
   0x2   :  { %4336 = sst [smem:[#allocation53_spill]] %s4258_s1 }
   0x3   :  { %4337 = sst [smem:[#allocation54_spill]] %s4259_s2 }
   0x4   :  { %4338 = sst [smem:[#allocation55_spill]] %s4260_s3 }
   0x5   :  { %4339 = sst [smem:[#allocation56_spill]] %s4261_s4 }
   0x6   :  { %4340 = sst [smem:[#allocation57_spill]] %s4262_s5 }
   0x7   :  { %4341 = sst [smem:[#allocation58_spill]] %s4263_s6 }
   0x8   :  { %4342 = sst [smem:[#allocation59_spill]] %s4264_s7 }
   0x9   :  { %4343 = sst [smem:[#allocation60_spill]] %s4265_s8 }
   0xa   :  { %4344 = sst [smem:[#allocation61_spill]] %s4266_s9 }
   0xb   :  { %4345 = sst [smem:[#allocation62_spill]] %s4268_s11 }
   0xc   :  { %4346 = sst [smem:[#allocation63_spill]] %s4269_s12 }
   0xd   :  { %4347 = sst [smem:[#allocation64_spill]] %s4270_s13 }
   0xe   :  { %19 = sst [smem:[#allocation2]] %s4267_s10 }
   0xf   :  { %20 = vsyncpa [#allocation4], 0 }
  0x10   :  { %22 = vsyncpa [#allocation4 + $0x1], 0 }
  0x11   :  { %23 = vsyncpa [#allocation8], 0 }
  0x12   :  { %25 = vsyncpa [#allocation8 + $0x1], 0 }
  0x13   :  { %26 = vsyncpa [#allocation6], 0 }
  0x14   :  { %27 = vsyncpa [#allocation12], 0 }
  0x15   :  { %28 = vsyncpa [#allocation15], 0 }
  0x16   :  { %29 = vsyncpa [#allocation5], 0 }
  0x17   :  { %31 = vsyncpa [#allocation5 + $0x1], 0 }
  0x18   :  { %32 = vsyncpa [#allocation19], 0 }
  0x19   :  { %34 = vsyncpa [#allocation19 + $0x1], 0  ;;  %s2642_s27 = smov 0   ;;  %s2644_s28 = smov 0  }
  0x1a   :  { %s2646_s29 = smov 0   ;;  %s2648_s30 = smov 0  }
  0x1b LB: > { %4348 = sst [smem:[#allocation29_spill]] %s2532_s27  ;;  %s2546_s10 = smov [#allocation9]   ;;  %s2544_s30 = sphi %s2648_s30, %s4532_s30   ;;  %s2540_s29 = sphi %s2646_s29, %s4535_s29   ;;  %s2536_s28 = sphi %s2644_s28, %s4534_s28   ;;  %s2532_s27 = sphi %s2642_s27, %s4533_s27  }
  0x1c   : > { %4349 = sst [smem:[#allocation30_spill]] %s2536_s28  ;;  %s382_s14 = sshll.u32 %s2546_s10, 4  ;;  %s2668_s14 = int_to_ptr.vmem [resolvable:$true] %s382_s14 }
  0x1d   : > { %4350 = sst [smem:[#allocation31_spill]] %s2540_s29  ;;  %s2663_s15 = sadd.s32 4294967295, %s2544_s30  }
  0x1e   : > { %4351 = sst [smem:[#allocation32_spill]] %s2544_s30  ;;  %p1954_p0 = scmp.ge.s32.totalorder %s2544_s30, 1 }
  0x1f   : > { %4352 = sst [smem:[#allocation33_spill]] %s2663_s15  ;;  %p4273_p1 = scmp.eq.s32.totalorder %s2663_s15, 0 }
  0x20   : > { %p364_p2 = scmp.lt.s32.totalorder %s2544_s30, 3  ;;  %s4354_s6 = sld [smem:[#allocation58_spill]] }
  0x21   : > { %s4356_s8 = sld [smem:[#allocation60_spill]]  ;;  %s4357_s5 = sld [smem:[#allocation57_spill]] }
  0x22   : > { %p2670_p3 = pnand %p1954_p0, %p364_p2  ;;  %s4358_s4 = sld [smem:[#allocation56_spill]] }
  0x24   : > { %s4353_s16 = scalar_select %p2670_p3, 1, 0 }
  0x25   : > { %p2103_p5 = pneg %p2670_p3 }
  0x26   : > { %s407_s19 = sshll.u32 %s4354_s6, 4  ;;  %s2680_s19 = int_to_ptr.vmem [resolvable:$true] %s407_s19 }
  0x27   : > { %p2684_p6 = pnand %p2103_p5, %p4273_p1  ;;  %s429_s23 = sshll.u32 %s4356_s8, 4  ;;  %s2691_s23 = int_to_ptr.vmem [resolvable:$true] %s429_s23 }
  0x28   : > { %s396_s26 = sshll.u32 %s4357_s5, 4  ;;  %s2235_s18 = scalar_lea.hbm %s4358_s4, 512  ;;  %s397_s26 = int_to_ptr.vmem [resolvable:$true] %s396_s26 }
  0x29   : > { %p2236_p7 = scmp.ne.s32.totalorder %s4358_s4, %s2235_s18  ;;  %p2704_p8 = pneg %p2684_p6 }
  0x2a   : > { %p2242_p11 = scmp.lt.u32.totalorder %s2235_s18, %s4358_s4 }
  0x2b   : > { %p2238_p9 = pnand %p2704_p8, %p2236_p7 }
  0x2d   : > { %p2239_p10 = pneg %p2238_p9 }
  0x2f   : > { %p2244_p12 = pnand %p2242_p11, %p2239_p10 }
  0x31   : > { %2247 = shalt.err (!%p2244_p12)
}
  0x32   : > { %s2248_s6 = scalar_lea.vmem %s2668_s14, 512  ;;  %p2256_p5 = scmp.lt.s32.totalorder %s2668_s14, %s2668_s14 }
  0x33   : > { %p2249_p13 = scmp.ne.s32.totalorder %s2668_s14, %s2248_s6  ;;  %p2257_p4 = scmp.lt.s32.totalorder %s2248_s6, %s2248_s6 }
  0x35   : > { %p2251_p0 = pnand %p2249_p13, %p2704_p8  ;;  %p2258_p7 = por %p2257_p4, %p2256_p5 }
  0x37   : > { %p2252_p2 = pneg %p2251_p0 }
  0x39   : > { %p2259_p9 = pnand %p2258_p7, %p2252_p2 }
  0x3b   : > { %2262 = shalt.err (!%p2259_p9)
}
  0x3c   : > { %s4276_s11 = smov 256   ;;  %s4278_s24 = smov 16  }
  0x3d   : > { %2106 = dma.hbm_to_vmem [thread:$0]  (!%p2684_p6), %s4358_s4, 512, %s2668_s14, [#allocation8], %s4276_s11, %s4276_s11, %s4278_s24  }
  0x3e   : > { %s2263_s17 = scalar_lea.vmem %s2680_s19, 16  ;;  %p2271_p12 = scmp.lt.s32.totalorder %s2680_s19, %s2680_s19 }
  0x3f   : > { %p2264_p4 = scmp.ne.s32.totalorder %s2680_s19, %s2263_s17  ;;  %p2272_p13 = scmp.lt.s32.totalorder %s2263_s17, %s2263_s17 }
  0x41   : > { %p2266_p10 = pnand %p2264_p4, %p2704_p8  ;;  %p2273_p0 = por %p2272_p13, %p2271_p12 }
  0x43   : > { %p2267_p11 = pneg %p2266_p10 }
  0x45   : > { %p2274_p2 = pnand %p2273_p0, %p2267_p11 }
  0x47   : > { %2277 = shalt.err (!%p2274_p2)
}
  0x48   : > { %s2549_s18 = smov [#allocation11]   ;;  %s2278_s14 = scalar_lea.vmem %s2691_s23, 16 }
  0x49   : > { %2112 = dma.vmem_to_smem (!%p2684_p6), %s2680_s19, 16, %s2549_s18, [#allocation12]  }
  0x4a   : > { %p2279_p5 = scmp.ne.s32.totalorder %s2691_s23, %s2278_s14  ;;  %p2286_p4 = scmp.lt.s32.totalorder %s2691_s23, %s2691_s23 }
  0x4b   : > { %p2287_p10 = scmp.lt.s32.totalorder %s2278_s14, %s2278_s14 }
  0x4c   : > { %p2281_p7 = pnand %p2279_p5, %p2704_p8 }
  0x4d   : > { %p2288_p12 = por %p2287_p10, %p2286_p4 }
  0x4e   : > { %p2282_p9 = pneg %p2281_p7 }
  0x50   : > { %p2289_p11 = pnand %p2288_p12, %p2282_p9 }
  0x52   : > { %2292 = shalt.err (!%p2289_p11)
}
  0x53   : > { %s2550_s21 = smov [#allocation14]   ;;  %s2293_s19 = scalar_lea.vmem %s397_s26, 16 }
  0x54   : > { %2118 = dma.vmem_to_smem (!%p2684_p6), %s2691_s23, 16, %s2550_s21, [#allocation15]  }
  0x55   : > { %p2294_p13 = scmp.ne.s32.totalorder %s397_s26, %s2293_s19  ;;  %p2301_p5 = scmp.lt.s32.totalorder %s397_s26, %s397_s26 }
  0x56   : > { %p2302_p7 = scmp.lt.s32.totalorder %s2293_s19, %s2293_s19 }
  0x57   : > { %p2296_p0 = pnand %p2294_p13, %p2704_p8 }
  0x58   : > { %p2303_p9 = por %p2302_p7, %p2301_p5 }
  0x59   : > { %p2297_p2 = pneg %p2296_p0 }
  0x5b   : > { %p2304_p4 = pnand %p2303_p9, %p2297_p2 }
  0x5d   : > { %2307 = shalt.err (!%p2304_p4)
}
  0x5e   : > { %s2551_s25 = smov [#allocation10]   ;;  %s4360_s7 = sld [smem:[#allocation59_spill]] }
  0x5f   : > { %2109 = dma.vmem_to_smem (!%p2684_p6), %s397_s26, 16, %s2551_s25, [#allocation6]  }
  0x60   : > { %s4361_s9 = sld [smem:[#allocation61_spill]] }
  0x64   : > { %s418_s17 = sshll.u32 %s4360_s7, 4  ;;  %s419_s17 = int_to_ptr.vmem [resolvable:$true] %s418_s17 }
  0x65   : > { %s2308_s22 = scalar_lea.vmem %s419_s17, 16  ;;  %p2316_p13 = scmp.lt.s32.totalorder %s419_s17, %s419_s17 }
  0x66   : > { %s440_s21 = sshll.u32 %s4361_s9, 4  ;;  %p2309_p10 = scmp.ne.s32.totalorder %s419_s17, %s2308_s22  ;;  %s441_s21 = int_to_ptr.vmem [resolvable:$true] %s440_s21 }
  0x67   : > { %p2317_p0 = scmp.lt.s32.totalorder %s2308_s22, %s2308_s22 }
  0x68   : > { %p2311_p12 = pnand %p2309_p10, %p2704_p8 }
  0x69   : > { %p2318_p2 = por %p2317_p0, %p2316_p13 }
  0x6a   : > { %p2312_p11 = pneg %p2311_p12 }
  0x6c   : > { %p2319_p5 = pnand %p2318_p2, %p2312_p11 }
  0x6e   : > { %2322 = shalt.err (!%p2319_p5)
}
  0x6f   : > { %s2552_s26 = smov [#allocation13]   ;;  %s2323_s6 = scalar_lea.vmem %s441_s21, 16 }
  0x70   : > { %2115 = dma.vmem_to_smem (!%p2684_p6), %s419_s17, 16, %s2552_s26, [#allocation12]  }
  0x71   : > { %p2324_p7 = scmp.ne.s32.totalorder %s441_s21, %s2323_s6  ;;  %p2331_p1 = scmp.lt.s32.totalorder %s441_s21, %s441_s21 }
  0x72   : > { %p2332_p3 = scmp.lt.s32.totalorder %s2323_s6, %s2323_s6 }
  0x73   : > { %p2326_p9 = pnand %p2324_p7, %p2704_p8 }
  0x74   : > { %p2333_p10 = por %p2332_p3, %p2331_p1 }
  0x75   : > { %p2327_p4 = pneg %p2326_p9 }
  0x77   : > { %p2334_p12 = pnand %p2333_p10, %p2327_p4 }
  0x79   : > { %2337 = shalt.err (!%p2334_p12)
}
  0x7a   : > { %s2553_s19 = smov [#allocation16]   ;;  %s4275_s13 = sadd.s32 4294967294, %s2544_s30  }
  0x7b   : > { %2121 = dma.vmem_to_smem (!%p2684_p6), %s441_s21, 16, %s2553_s19, [#allocation15]  }
  0x7c   : > { %s2770_s25 = sadd.s32 1, %s2544_s30   ;;  %s47_s23 = sadd.s32 1, %s2540_s29 }
  0x7d   : > { %4362 = sst [smem:[#allocation34_spill]] %s2770_s25  ;;  %s44_s20 = ssub.s32 %s2544_s30, %s2770_s25 }
  0x7e   : > { %p45_p1 = scmp.eq.s32.totalorder %s44_s20, 0  ;;  %p54_p3 = scmp.ne.s32.totalorder %s2540_s29, %s2536_s28 }
  0x7f   : > { %p55_p8 = scmp.eq.s32.totalorder %s2544_s30, 0  ;;  %p60_p11 = scmp.ne.s32.totalorder %s2536_s28, %s2532_s27 }
  0x80   : > { %s2781_s10 = scalar_select %p45_p1, %s2540_s29, %s47_s23  }
  0x81   : > { %p2783_p13 = por %p55_p8, %p54_p3  ;;  %p4365_p0 = scmp.eq.s32.totalorder %s2663_s15, 0 }
  0x82   : > { %4363 = sst [smem:[#allocation35_spill]] %s2781_s10  ;;  %p299_p2 = scmp.eq.s32.totalorder %s2663_s15, 1 }
  0x83   : > { %p2789_p6 = por %p4365_p0, %p60_p11  ;;  %p305_p5 = scmp.eq.s32.totalorder %s4275_s13, 1 }
  0x84   : > { %p2145_p7 = scmp.lt.s32.totalorder %s2544_s30, 2  ;;  %s454_s14 = sand.u32 1, %s2540_s29  }
  0x85   : > { %p2798_p9 = por %p299_p2, %p54_p3  ;;  %p2802_p4 = por %p305_p5, %p60_p11 }
  0x86   : > { %s1962_s26 = sshll.u32 %s454_s14, 6  ;;  %s2064_s6 = sshll.u32 %s2544_s30, 10 }
  0x87   : > { %s4367_s21 = scalar_select %p2798_p9, 1, 0 }
  0x88   : > { %s4369_s22 = scalar_select %p2802_p4, 1, 0 }
  0x89   : > { %4368 = sst [smem:[#allocation36_spill]] %s4367_s21  ;;  %s4371_s0 = sld [smem:[#allocation52_spill]] }
  0x8a   : > { %4370 = sst [smem:[#allocation37_spill]] %s4369_s22  ;;  %s458_s13 = scalar_lea.vmem [#allocation3], %s1962_s26 }
  0x8b   : > { %s465_s11 = sshll.u32 %s458_s13, 4  ;;  %p2816_p10 = pnand %p2145_p7, %p2783_p13  ;;  %s2812_s11 = int_to_ptr.vmem [resolvable:$true] %s465_s11 }
  0x8c   : > { %s4373_s1 = sld [smem:[#allocation53_spill]]  ;;  %s479_s20 = scalar_lea.vmem [#allocation7], %s1962_s26 }
  0x8d   : > { %s2825_s7 = sshll.u32 %s479_s20, 4  ;;  %s2827_s8 = scalar_lea.sflag [#allocation4], %s454_s14  ;;  %s2859_s7 = int_to_ptr.vmem [resolvable:$true] %s2825_s7 }
  0x8e   : > { %p2340_p1 = pneg %p2816_p10 }
  0x8f   : > { %s2810_s23 = scalar_lea.hbm %s4371_s0, %s2064_s6  ;;  %s2343_s4 = scalar_lea.hbm %s4371_s0, 2048 }
  0x90   : > { %s2338_s13 = scalar_lea.hbm %s2810_s23, 1024  ;;  %p2344_p11 = scmp.lt.u32.totalorder %s2810_s23, %s4371_s0 }
  0x91   : > { %p2339_p12 = scmp.ne.s32.totalorder %s2810_s23, %s2338_s13  ;;  %p2345_p13 = scmp.lt.u32.totalorder %s2343_s4, %s2338_s13 }
  0x92   : > { %s2823_s19 = scalar_lea.hbm %s4373_s1, %s2064_s6  ;;  %p2347_p2 = scmp.lt.u32.totalorder %s2338_s13, %s2810_s23 }
  0x93   : > { %p2341_p3 = pnand %p2340_p1, %p2339_p12  ;;  %p2346_p0 = por %p2345_p13, %p2344_p11 }
  0x95   : > { %p2342_p8 = pneg %p2341_p3  ;;  %p2348_p5 = por %p2347_p2, %p2346_p0 }
  0x97   : > { %p2349_p7 = pnand %p2348_p5, %p2342_p8 }
  0x99   : > { %2352 = shalt.err (!%p2349_p7)
}
  0x9a   : > { %s2353_s14 = scalar_lea.vmem %s2812_s11, 1024  ;;  %s2554_s9 = smov [#allocation3]  }
  0x9b   : > { %p2354_p12 = scmp.ne.s32.totalorder %s2812_s11, %s2353_s14  ;;  %s2358_s26 = sshll.u32 %s2554_s9, 4  ;;  %s2359_s26 = int_to_ptr.vmem [resolvable:$false] %s2358_s26 }
  0x9c   : > { %s2360_s20 = scalar_lea.vmem %s2359_s26, 2048  ;;  %p2361_p9 = scmp.lt.s32.totalorder %s2812_s11, %s2359_s26 }
  0x9d   : > { %p2356_p3 = pnand %p2354_p12, %p2340_p1  ;;  %p2362_p11 = scmp.lt.s32.totalorder %s2360_s20, %s2353_s14 }
  0x9f   : > { %p2357_p4 = pneg %p2356_p3  ;;  %p2363_p13 = por %p2362_p11, %p2361_p9 }
  0xa1   : > { %p2364_p0 = pnand %p2363_p13, %p2357_p4 }
  0xa3   : > { %2367 = shalt.err (!%p2364_p0)
}
  0xa4   : > { %s4374_s13 = smov 16   ;;  %s4375_s17 = smov 256  }
  0xa5   : > { %2125 = dma.hbm_to_vmem [thread:$0]  (!%p2816_p10), %s2810_s23, 1024, %s2812_s11, %s2827_s8, %s4375_s17, %s4375_s17, %s4374_s13  }
  0xa6   : > { %s475_s4 = sand.u32 1, %s2544_s30   ;;  %s2368_s6 = scalar_lea.hbm %s2823_s19, 1024 }
  0xa7   : > { %s2862_s5 = scalar_lea.sflag [#allocation8], %s475_s4  ;;  %p2369_p9 = scmp.ne.s32.totalorder %s2823_s19, %s2368_s6 }
  0xa8   : > { %s2373_s26 = scalar_lea.hbm %s4373_s1, 2048  ;;  %p2374_p2 = scmp.lt.u32.totalorder %s2823_s19, %s4373_s1 }
  0xa9   : > { %p2371_p4 = pnand %p2369_p9, %p2340_p1  ;;  %p2375_p5 = scmp.lt.u32.totalorder %s2373_s26, %s2368_s6 }
  0xaa   : > { %p2377_p12 = scmp.lt.u32.totalorder %s2368_s6, %s2823_s19 }
  0xab   : > { %p2372_p8 = pneg %p2371_p4  ;;  %p2376_p7 = por %p2375_p5, %p2374_p2 }
  0xad   : > { %p2378_p3 = por %p2377_p12, %p2376_p7 }
  0xaf   : > { %p2379_p11 = pnand %p2378_p3, %p2372_p8 }
  0xb1   : > { %2382 = shalt.err (!%p2379_p11)
}
  0xb2   : > { %s2383_s8 = scalar_lea.vmem %s2859_s7, 1024  ;;  %s2555_s11 = smov [#allocation7]  }
  0xb3   : > { %p2384_p13 = scmp.ne.s32.totalorder %s2859_s7, %s2383_s8  ;;  %s2388_s23 = sshll.u32 %s2555_s11, 4  ;;  %s2389_s23 = int_to_ptr.vmem [resolvable:$false] %s2388_s23 }
  0xb4   : > { %s2390_s0 = scalar_lea.vmem %s2389_s23, 2048  ;;  %p2391_p4 = scmp.lt.s32.totalorder %s2859_s7, %s2389_s23 }
  0xb5   : > { %p2386_p0 = pnand %p2384_p13, %p2340_p1  ;;  %p2392_p2 = scmp.lt.s32.totalorder %s2390_s0, %s2383_s8 }
  0xb7   : > { %p2387_p9 = pneg %p2386_p0  ;;  %p2393_p5 = por %p2392_p2, %p2391_p4 }
  0xb9   : > { %p2394_p7 = pnand %p2393_p5, %p2387_p9 }
  0xbb   : > { %2397 = shalt.err (!%p2394_p7)
}
  0xbc   : > { %2128 = dma.hbm_to_vmem [thread:$0]  (!%p2816_p10), %s2823_s19, 1024, %s2859_s7, %s2862_s5, %s4375_s17, %s4375_s17, %s4374_s13  }
  0xbd   : > { %p4376_p1 = scmp.ne.s32.totalorder %s4353_s16, 0 }
  0xbf   : > { %498 = sbr.rel (%p4376_p1) target bundleno = 880 (0x370), region = 64 }
  0xc6   : > { %s2894_s4 = sand.u32 1, %s2536_s28  }
  0xc7   : > { %4377 = sst [smem:[#allocation38_spill]] %s2894_s4  ;;  %s2897_s6 = sshll.u32 %s2894_s4, 6 }
  0xc8   : > { %4378 = sst [smem:[#allocation39_spill]] %s2897_s6  ;;  %s501_s24 = scalar_lea.sflag [#allocation4], %s2894_s4 }
  0xc9   : > { %s2901_s14 = scalar_lea.vmem [#allocation3], %s2897_s6 }
  0xca   : > { %4379 = sst [smem:[#allocation40_spill]] %s2901_s14 }
  0xcb   : > { %2499 = dma.done.wait (%p2789_p6), %s501_s24, 1024  }
  0xcc   : > { %2501 = vsyncadd (%p2789_p6), %s501_s24, 4294966272  ;;  %s4281_s7 = sand.u32 1, %s2663_s15   ;;  %s2911_s19 = scalar_lea.vmem [#allocation7], %s2897_s6 }
  0xcd   : > { %s510_s16 = scalar_lea.sflag [#allocation8], %s4281_s7  ;;  %4380 = sst [smem:[#allocation41_spill]] %s2911_s19 }
  0xce   : > { %2503 = dma.done.wait (%p2789_p6), %s510_s16, 1024  }
  0xcf   : > { %2505 = vsyncadd (%p2789_p6), %s510_s16, 4294966272  ;;  %p4381_p10 = scmp.eq.s32.totalorder %s2663_s15, 0 }
  0xd1   : > { %2507 = dma.done.wait (%p4381_p10), [#allocation8], 512   ;;  %p4382_p8 = pmov %p4381_p10 }
  0xd3   : > { %2509 = vsyncadd (%p4382_p8), [#allocation8], 4294966784  ;;  %p4383_p12 = pmov %p4382_p8 }
  0xd4   : > { %p4384_p3 = pmov %p4382_p8 }
  0xd5   : > { %2511 = dma.done.wait (%p4383_p12), [#allocation6], 16  }
  0xd6   : > { %2513 = vsyncadd (%p4384_p3), [#allocation6], 4294967280  ;;  %p4385_p11 = pmov %p4384_p3 }
  0xd7   : > { %p4386_p13 = pmov %p4384_p3 }
  0xd8   : > { %2515 = dma.done.wait (%p4385_p11), [#allocation12], 32  }
  0xd9   : > { %2517 = vsyncadd (%p4386_p13), [#allocation12], 4294967264  ;;  %p4387_p6 = pmov %p4384_p3 }
  0xda   : > { %p4388_p0 = pmov %p4384_p3 }
  0xdb   : > { %2519 = dma.done.wait (%p4387_p6), [#allocation15], 32  }
  0xdc   : > { %2521 = vsyncadd (%p4388_p0), [#allocation15], 4294967264 }
  0xdd   : > { %542 = sfence }
  0xde   : > { %v604_v0 = vld [vmem:[%s2911_s19] sm:$0xff]  ;;  %v605_v1 = vld [vmem:[%s2911_s19 + $0x8] sm:$0xff]  ;;  %v606_v5 = vld [vmem:[%s2911_s19 + $0x10] sm:$0xff]  ;;  %s4296_s18 = smov 17   ;;  %s4294_s13 = smov 16   ;;  %vm660_vm0 = vcmask 130112  }
  0xdf   : > { %v596_v2 = vld [vmem:[%s2901_s14] sm:$0xff]  ;;  %v629_v3 = vadd.f32 %v605_v1, %v604_v0  ;;  %v597_v4 = vld [vmem:[%s2901_s14 + $0x8] sm:$0xff]  ;;  %v607_v6 = vld [vmem:[%s2911_s19 + $0x18] sm:$0xff]  ;;  %v779_v8 = vadd.f32 %v606_v5, %v604_v0  ;;  %s4292_s17 = smov 15   ;;  %s4290_s5 = smov 1   ;;  %v4319_v0 = vlaneseq  ;;  %vm667_vm1 = vcmask 195712  }
  0xe0   : > { %v612_v7 = vadd.f32 %v597_v4, %v596_v2  ;;  %v788_v9 = vadd.f32 %v607_v6, %v605_v1  ;;  %v598_v10 = vld [vmem:[%s2901_s14 + $0x10] sm:$0xff]  ;;  %v599_v11 = vld [vmem:[%s2901_s14 + $0x18] sm:$0xff]  ;;  %v632_v12 = vadd.f32 %v607_v6, %v606_v5  ;;  %v608_v13 = vld [vmem:[%s2911_s19 + $0x20] sm:$0xff]  ;;  %s4288_s9 = smov 127   ;;  %s4286_s26 = smov 113   ;;  %vm674_vm2 = vcmask 261312  }
  0xe1   : > { %630 = vadd.xlane.f32.xlu1 %v629_v3  ;;  %v609_v14 = vld [vmem:[%s2911_s19 + $0x28] sm:$0xff]  ;;  %v615_v15 = vadd.f32 %v599_v11, %v598_v10  ;;  %v780_v16 = vadd.f32 %v779_v8, %v608_v13  ;;  %v600_v18 = vld [vmem:[%s2901_s14 + $0x20] sm:$0xff]  ;;  %v610_v20 = vld [vmem:[%s2911_s19 + $0x30] sm:$0xff]  ;;  %v800_v40 = vadd.f32 %v598_v10, %v596_v2  ;;  %v809_v42 = vadd.f32 %v599_v11, %v597_v4  ;;  %s4284_s20 = smov 112   ;;  %s4282_s8 = smov 111  }
  0xe2   : > { %613 = vadd.xlane.f32.xlu0 %v612_v7  ;;  %v789_v17 = vadd.f32 %v788_v9, %v609_v14  ;;  %v601_v19 = vld [vmem:[%s2901_s14 + $0x28] sm:$0xff]  ;;  %v611_v21 = vld [vmem:[%s2911_s19 + $0x38] sm:$0xff]  ;;  %v635_v24 = vadd.f32 %v609_v14, %v608_v13  ;;  %v602_v27 = vld [vmem:[%s2901_s14 + $0x30] sm:$0xff]  ;;  %v3022_v1 = vand.u32 127, %v4319_v0  ;;  %v3025_v2 = vshrl.u32 %v4319_v0, 7  ;;  %s3035_s11 = sld [smem:[#allocation10]] }
  0xe3   : > { %v781_v22 = vadd.f32 %v780_v16, %v610_v20  ;;  %v618_v25 = vadd.f32 %v601_v19, %v600_v18  ;;  %v603_v28 = vld [vmem:[%s2901_s14 + $0x38] sm:$0xff]  ;;  %v638_v31 = vadd.f32 %v611_v21, %v610_v20  ;;  %v801_v44 = vadd.f32 %v800_v40, %v600_v18  ;;  %s3037_s23 = sld [smem:[#allocation11]]  ;;  %s3039_s0 = sld [smem:[#allocation10 + $0x12]] }
  0xe4   : > { %v790_v23 = vadd.f32 %v789_v17, %v611_v21  ;;  %v621_v33 = vadd.f32 %v603_v28, %v602_v27  ;;  %v810_v46 = vadd.f32 %v809_v42, %v601_v19  ;;  %4389 = vst [vmem:[#allocation42_spill] sm:$0xff] %v3025_v2  ;;  %v655_v3 = vadd.s32 4294967288, %v3022_v1  ;;  %s3041_s24 = sld [smem:[#allocation11 + $0x1]]  ;;  %s3045_s7 = sld [smem:[#allocation10 + $0x13]] }
  0xe5   : > { %633 = vadd.xlane.f32.xlu1 %v632_v12  ;;  %v782_v29 = vrot.slane %v781_v22, 4  ;;  %v802_v48 = vadd.f32 %v801_v44, %v602_v27  ;;  %v653_v7 = vsub.s32 %v3022_v1, %v3025_v2  ;;  %v662_v10 = vadd.s32 4294967280, %v3022_v1  ;;  %s3043_s16 = sld [smem:[#allocation10 + $0x1]]  ;;  %s3168_s1 = sld [smem:[#allocation10 + $0x1b]] }
  0xe6   : > { %616 = vadd.xlane.f32.xlu0 %v615_v15  ;;  %v791_v26 = vrot.slane %v790_v23, 4  ;;  %v811_v49 = vadd.f32 %v810_v46, %v603_v28  ;;  %v658_v9 = vsub.s32 %v655_v3, %v3025_v2  ;;  %v669_v19 = vadd.s32 4294967272, %v3022_v1  ;;  %s3170_s10 = sld [smem:[#allocation10 + $0xa]]  ;;  %s3172_s29 = sld [smem:[#allocation10 + $0x1c]] }
  0xe7   : > { %v783_v34 = vadd.f32 %v782_v29, %v781_v22  ;;  %v803_v50 = vrot.slane %v802_v48, 4  ;;  %v665_v18 = vsub.s32 %v662_v10, %v3025_v2  ;;  %vm701_vm3 = vcmask 1040384   ;;  %s3184_s28 = sld [smem:[#allocation10 + $0xb]]  ;;  %s3186_s25 = sld [smem:[#allocation10 + $0xd]] }
  0xe8   : > { %v792_v30 = vadd.f32 %v791_v26, %v790_v23  ;;  %v812_v51 = vrot.slane %v811_v49, 4  ;;  %v672_v28 = vsub.s32 %v669_v19, %v3025_v2  ;;  %vm832_vm4 = vcmp.lt.s32.totalorder %v3022_v1, 17  ;;  %s3194_s30 = sld [smem:[#allocation10 + $0x1d]]  ;;  %s3196_s22 = sld [smem:[#allocation10 + $0x1f]] }
  0xe9   : > { %636 = vadd.xlane.f32.xlu1 %v635_v24  ;;  %v784_v36 = vrot.slane %v783_v34, 2  ;;  %v804_v52 = vadd.f32 %v803_v50, %v802_v48  ;;  %v838_v46 = vstv %s3035_s11  ;;  %vm849_vm5 = vcmp.lt.s32.totalorder %v3022_v1, 16  ;;  %v3062_v48 = vld [vmem:[#allocation9] sm:$0xff]  ;;  %s3214_s27 = sld [smem:[#allocation10 + $0x1e]]  ;;  %s3220_s12 = sld [smem:[#allocation10 + $0x20]] }
  0xea   : > { %619 = vadd.xlane.f32.xlu0 %v618_v25  ;;  %v793_v32 = vrot.slane %v792_v30, 2  ;;  %v813_v53 = vadd.f32 %v812_v51, %v811_v49  ;;  %4391 = vst [vmem:[#allocation44_spill] sm:$0xff] %v3062_v48  ;;  %v3064_v49 = vld [vmem:[#allocation9 + $0x8] sm:$0xff]  ;;  %v842_v51 = vstv %s3039_s0  ;;  %vm872_vm6 = vcmp.lt.s32.totalorder %v3022_v1, 15  ;;  %s3136_s0 = sld [smem:[#allocation10 + $0x18]]  ;;  %s3218_s21 = sld [smem:[#allocation10 + $0xe]] }
  0xeb   : > { %v785_v38 = vadd.f32 %v784_v36, %v783_v34  ;;  %v805_v54 = vrot.slane %v804_v52, 2  ;;  %4392 = vst [vmem:[#allocation45_spill] sm:$0xff] %v3064_v49  ;;  %vm893_vm7 = vcmp.lt.s32.totalorder %v3022_v1, 1  ;;  %v3104_v10 = vrot.slane %v3062_v48, 3  ;;  %s3232_s15 = sld [smem:[#allocation10 + $0x21]]  ;;  %s3245_s6 = sld [smem:[#allocation10 + $0x10]] }
  0xec   : > { %v794_v35 = vadd.f32 %v793_v32, %v792_v30  ;;  %v814_v55 = vrot.slane %v813_v53, 2  ;;  %vm922_vm8 = vcmp.lt.s32.totalorder %v3022_v1, 127  ;;  %vm943_vm9 = vcmp.lt.s32.totalorder %v3022_v1, 113  ;;  %s3247_s19 = sld [smem:[#allocation10 + $0x22]]  ;;  %s3253_s14 = sld [smem:[#allocation10 + $0x11]] }
  0xed   : > { %639 = vadd.xlane.f32.xlu1 %v638_v31  ;;  %v786_v41 = vrot.slane %v785_v38, 1  ;;  %v806_v56 = vadd.f32 %v805_v54, %v804_v52  ;;  %v827_v54 = vstv %s3041_s24  ;;  %s3148_s24 = sld [smem:[#allocation10 + $0x19]]  ;;  %vm964_vm10 = vcmp.lt.s32.totalorder %v3022_v1, 112  ;;  %s3255_s4 = sld [smem:[#allocation10 + $0x23]] }
  0xee   : > { %622 = vadd.xlane.f32.xlu0 %v621_v33  ;;  %v795_v37 = vrot.slane %v794_v35, 1  ;;  %v815_v57 = vadd.f32 %v814_v55, %v813_v53  ;;  %v3076_v55 = vrot.slane %v3062_v48, 1  ;;  %vm985_vm11 = vcmp.lt.s32.totalorder %v3022_v1, 111  ;;  %s4446_s2 = sld [smem:[#allocation54_spill]]  ;;  %s3618_s11 = sld [smem:[#allocation13 + $0x13]] }
  0xef   : > { %v787_v45 = vadd.f32 %v786_v41, %v785_v38  ;;  %v807_v58 = vrot.slane %v806_v56, 1  ;;  %vm710_vm12 = vcmask 254976   ;;  %s4455_s3 = sld [smem:[#allocation55_spill]] }
  0xf0   : > { %v796_v39 = vadd.f32 %v795_v37, %v794_v35  ;;  %v816_v59 = vrot.slane %v815_v57, 1 }
  0xf1   : > { %v2953_v47 = vmul.f32 0.03125, %v787_v45  ;;  %v808_v60 = vadd.f32 %v807_v58, %v806_v56  ;;  %v3079_v56 = vrot.slane %v3064_v49, 1 }
  0xf2   : > { %v2949_v43 = vmul.f32 0.03125, %v796_v39  ;;  %v817_v61 = vadd.f32 %v816_v59, %v815_v57  ;;  %v861_v57 = vstv %s3043_s16  ;;  %v865_v59 = vstv %s3045_s7  ;;  %s3116_s7 = sld [smem:[#allocation10 + $0x5]]  ;;  %s3622_s16 = sld [smem:[#allocation13 + $0x14]] }
  0xf3   : > { %v2981_v62 = vmul.f32 0.03125, %v808_v60 }
  0xf4   : > { %v2985_v63 = vmul.f32 0.03125, %v817_v61  ;;  %4452 = sst [smem:[#allocation48_spill]] %s3618_s11 }
  0xfe   : > { %830 = vrot.lane.b32.xlu1 %v2949_v43, %s4296_s18 }
 0x102   : > { %845 = vrot.lane.b32.xlu1 %v2953_v47, %s4294_s13 }
 0x104   : > { %828 = vrot.lane.b32.xlu0 %v2953_v47, %s4296_s18 }
 0x106   : > { %847 = vrot.lane.b32.xlu1 %v2949_v43, %s4294_s13 }
 0x108   : > { %868 = vrot.lane.b32.xlu0 %v2953_v47, %s4292_s17 }
 0x10a   : > { %870 = vrot.lane.b32.xlu1 %v2949_v43, %s4292_s17 }
 0x10c   : > { %889 = vrot.lane.b32.xlu0 %v2953_v47, %s4290_s5 }
 0x10e   : > { %891 = vrot.lane.b32.xlu1 %v2949_v43, %s4290_s5 }
 0x110   : > { %918 = vrot.lane.b32.xlu0 %v2953_v47, %s4288_s9 }
 0x112   : > { %920 = vrot.lane.b32.xlu1 %v2949_v43, %s4288_s9 }
 0x114   : > { %939 = vrot.lane.b32.xlu0 %v2953_v47, %s4286_s26 }
 0x116   : > { %941 = vrot.lane.b32.xlu1 %v2949_v43, %s4286_s26 }
 0x118   : > { %960 = vrot.lane.b32.xlu0 %v2953_v47, %s4284_s20 }
 0x11a   : > { %962 = vrot.lane.b32.xlu1 %v2949_v43, %s4284_s20 }
 0x11c   : > { %981 = vrot.lane.b32.xlu0 %v2953_v47, %s4282_s8 }
 0x11e   : > { %983 = vrot.lane.b32.xlu1 %v2949_v43, %s4282_s8 }
 0x120   : > { %998 = vrot.lane.b32.xlu0 %v2981_v62, %s4296_s18 }
 0x122   : > { %1000 = vrot.lane.b32.xlu1 %v2985_v63, %s4296_s18  ;;  %s3166_s18 = sld [smem:[#allocation10 + $0x9]] }
 0x124   : > { %1014 = vrot.lane.b32.xlu0 %v2981_v62, %s4294_s13 }
 0x126   : > { %1016 = vrot.lane.b32.xlu1 %v2985_v63, %s4294_s13  ;;  %s3156_s13 = sld [smem:[#allocation10 + $0x1a]] }
 0x128   : > { %1030 = vrot.lane.b32.xlu0 %v2981_v62, %s4292_s17 }
 0x12a   : > { %1032 = vrot.lane.b32.xlu1 %v2985_v63, %s4292_s17  ;;  %s3072_s17 = sld [smem:[#allocation10 + $0x15]] }
 0x12c   : > { %1046 = vrot.lane.b32.xlu0 %v2981_v62, %s4290_s5 }
 0x12e   : > { %1048 = vrot.lane.b32.xlu1 %v2985_v63, %s4290_s5  ;;  %s3058_s5 = sld [smem:[#allocation10 + $0x16]] }
 0x130   : > { %1070 = vrot.lane.b32.xlu0 %v2981_v62, %s4288_s9 }
 0x132   : > { %1072 = vrot.lane.b32.xlu1 %v2985_v63, %s4288_s9  ;;  %s3056_s9 = sld [smem:[#allocation10 + $0x3]] }
 0x134   : > { %1086 = vrot.lane.b32.xlu0 %v2981_v62, %s4286_s26  ;;  %v915_v19 = vstv %s3058_s5  ;;  %s3146_s5 = sld [smem:[#allocation10 + $0x7]] }
 0x136   : > { %1088 = vrot.lane.b32.xlu1 %v2985_v63, %s4286_s26  ;;  %s3054_s26 = sld [smem:[#allocation10 + $0x4]] }
 0x138   : > { %1102 = vrot.lane.b32.xlu0 %v2981_v62, %s4284_s20 }
 0x13a   : > { %1104 = vrot.lane.b32.xlu1 %v2985_v63, %s4284_s20  ;;  %s3049_s20 = sld [smem:[#allocation10 + $0x14]] }
 0x13c   : > { %1118 = vrot.lane.b32.xlu0 %v2981_v62, %s4282_s8 }
 0x13e   : > { %1120 = vrot.lane.b32.xlu1 %v2985_v63, %s4282_s8  ;;  %s3047_s8 = sld [smem:[#allocation10 + $0x2]] }
 0x16e   : > { %v631_v4 = vpop.xlane.xlu1 %630 }
 0x16f   : > { %v614_v5 = vpop.xlane.xlu0 %613  ;;  %v641_v8 = vmul.f32 0.00390625, %v631_v4 }
 0x170   : > { %v625_v6 = vmul.f32 0.00390625, %v614_v5 }
 0x171   : > { %v684_v16 = vrot.slane %v641_v8, %v653_v7  ;;  %v882_v8 = vstv %s3047_s8  ;;  %s3612_s8 = sld [smem:[#allocation13 + $0x1]] }
 0x172   : > { %v634_v11 = vpop.xlane.xlu1 %633  ;;  %v654_v14 = vrot.slane %v625_v6, %v653_v7  ;;  %v3095_v6 = vrot.slane %v3062_v48, 2  ;;  %v3098_v7 = vrot.slane %v3064_v49, 2 }
 0x173   : > { %v642_v12 = vmul.f32 0.00390625, %v634_v11  ;;  %v617_v13 = vpop.xlane.xlu0 %616 }
 0x174   : > { %v626_v15 = vmul.f32 0.00390625, %v617_v13 }
 0x175   : > { %v688_v17 = vrot.slane %v642_v12, %v658_v9 }
 0x176   : > { %v659_v20 = vrot.slane %v626_v15, %v658_v9  ;;  %v637_v21 = vpop.xlane.xlu1 %636  ;;  %v886_v9 = vstv %s3049_s20  ;;  %v911_v15 = vstv %s3054_s26  ;;  %s3118_s20 = sld [smem:[#allocation10 + $0x17]]  ;;  %s3134_s26 = sld [smem:[#allocation10 + $0x6]] }
 0x177   : > { %v689_v22 = vsel %vm660_vm0, %v688_v17, %v684_v16  ;;  %v643_v23 = vmul.f32 0.00390625, %v637_v21  ;;  %v620_v24 = vpop.xlane.xlu0 %619 }
 0x178   : > { %v661_v25 = vsel %vm660_vm0, %v659_v20, %v654_v14  ;;  %v627_v26 = vmul.f32 0.00390625, %v620_v24  ;;  %v3113_v14 = vrot.slane %v3064_v49, 3 }
 0x179   : > { %v693_v27 = vrot.slane %v643_v23, %v665_v18 }
 0x17a   : > { %v666_v29 = vrot.slane %v627_v26, %v665_v18  ;;  %v640_v30 = vpop.xlane.xlu1 %639  ;;  %v3140_v26 = vmul.f32 %v911_v15, %v2953_v47 }
 0x17b   : > { %v694_v31 = vsel %vm667_vm1, %v693_v27, %v689_v22  ;;  %v644_v32 = vmul.f32 0.00390625, %v640_v30  ;;  %v623_v33 = vpop.xlane.xlu0 %622  ;;  %v3144_v27 = vrot.slane %v3062_v48, 5 }
 0x17c   : > { %v668_v34 = vsel %vm667_vm1, %v666_v29, %v661_v25  ;;  %v628_v35 = vmul.f32 0.00390625, %v623_v33  ;;  %v907_v25 = vstv %s3072_s17  ;;  %s3154_s17 = sld [smem:[#allocation10 + $0x8]]  ;;  %v3159_v33 = vmul.f32 %v911_v15, %v2949_v43 }
 0x17d   : > { %v698_v36 = vrot.slane %v644_v32, %v672_v28  ;;  %v3209_v15 = vrot.slane %v3064_v49, 6 }
 0x17e   : > { %v673_v37 = vrot.slane %v628_v35, %v672_v28  ;;  %v831_v38 = vpop.permute.xlu1 %830 }
 0x17f   : > { %v829_v39 = vpop.permute.xlu0 %828  ;;  %v699_v40 = vsel %vm674_vm2, %v698_v36, %v694_v31  ;;  %4394 = vst [vmem:[#allocation47_spill] sm:$0xff] %v3209_v15 }
 0x180   : > { %v675_v41 = vsel %vm674_vm2, %v673_v37, %v668_v34  ;;  %v833_v52 = vsel %vm832_vm4, %v829_v39, %v831_v38  ;;  %v834_v53 = vsel %vm832_vm4, %v831_v38, %v829_v39  ;;  %v916_v34 = vmul.f32 %v915_v19, %v2953_v47 }
 0x181   : > { %v3051_v42 = vsel %vm701_vm3, %v675_v41, %v699_v40  ;;  %v3089_v4 = vmul.f32 %v834_v53, %v3062_v48  ;;  %v3092_v5 = vmul.f32 %v833_v52, %v3064_v49  ;;  %v917_v47 = vmul.f32 %v915_v19, %v2949_v43 }
 0x182   : > { %4390 = vst [vmem:[#allocation43_spill] sm:$0xff] %v3051_v42  ;;  %v846_v44 = vpop.permute.xlu1 %845  ;;  %v4399_v43 = vstv %s3134_s26  ;;  %s3626_s26 = sld [smem:[#allocation13 + $0x15]] }
 0x183   : > { %v869_v45 = vpop.permute.xlu0 %868  ;;  %v843_v21 = vmul.f32 %v842_v51, %v3089_v4  ;;  %v844_v22 = vmul.f32 %v842_v51, %v3092_v5  ;;  %v3182_v51 = vrot.slane %v3064_v49, 5 }
 0x185   : > { %v1170_v38 = vadd.f32 %v843_v21, %v827_v54  ;;  %v1171_v39 = vadd.f32 %v844_v22, %v827_v54  ;;  %v957_v21 = vstv %s3136_s0  ;;  %s3230_s0 = sld [smem:[#allocation10 + $0xf]] }
 0x186   : > { %v848_v58 = vpop.permute.xlu1 %847 }
 0x187   : > { %v850_v60 = vsel %vm849_vm5, %v846_v44, %v848_v58  ;;  %v851_v61 = vsel %vm849_vm5, %v848_v58, %v846_v44  ;;  %v890_v3 = vpop.permute.xlu0 %889  ;;  %v936_v58 = vstv %s3118_s20  ;;  %s3212_s20 = sld [smem:[#allocation10 + $0xc]] }
 0x188   : > { %v3107_v11 = vmul.f32 %v3076_v55, %v851_v61  ;;  %v3110_v12 = vmul.f32 %v3079_v56, %v850_v60  ;;  %v3202_v61 = vrot.slane %v3062_v48, 6  ;;  %4454 = sst [smem:[#allocation50_spill]] %s3626_s26 }
 0x18a   : > { %v871_v13 = vpop.permute.xlu1 %870  ;;  %v866_v28 = vmul.f32 %v865_v59, %v3107_v11  ;;  %v867_v29 = vmul.f32 %v865_v59, %v3110_v12  ;;  %4393 = vst [vmem:[#allocation46_spill] sm:$0xff] %v3202_v61 }
 0x18b   : > { %v873_v16 = vsel %vm872_vm6, %v869_v45, %v871_v13  ;;  %v874_v17 = vsel %vm872_vm6, %v871_v13, %v869_v45  ;;  %v919_v20 = vpop.permute.xlu0 %918 }
 0x18c   : > { %v3129_v23 = vmul.f32 %v3095_v6, %v874_v17  ;;  %v3132_v24 = vmul.f32 %v3098_v7, %v873_v16 }
 0x18e   : > { %v887_v30 = vmul.f32 %v886_v9, %v3129_v23  ;;  %v888_v31 = vmul.f32 %v886_v9, %v3132_v24  ;;  %v892_v32 = vpop.permute.xlu1 %891 }
 0x18f   : > { %v894_v35 = vsel %vm893_vm7, %v890_v3, %v892_v32  ;;  %v895_v36 = vsel %vm893_vm7, %v892_v32, %v890_v3  ;;  %v940_v37 = vpop.permute.xlu0 %939 }
 0x190   : > { %v1172_v40 = vadd.f32 %v887_v30, %v866_v28  ;;  %v1173_v41 = vadd.f32 %v888_v31, %v867_v29  ;;  %v3176_v44 = vmul.f32 %v3104_v10, %v895_v36  ;;  %v3179_v45 = vmul.f32 %v3113_v14, %v894_v35 }
 0x191   : > { %v978_v29 = vstv %s3148_s24  ;;  %s3630_s24 = sld [smem:[#allocation13 + $0x17]] }
 0x192   : > { %v3188_v52 = vadd.f32 %v1172_v40, %v1170_v38  ;;  %v3190_v53 = vadd.f32 %v1173_v41, %v1171_v39  ;;  %v921_v54 = vpop.permute.xlu1 %920  ;;  %v908_v59 = vmul.f32 %v907_v25, %v3176_v44  ;;  %v909_v60 = vmul.f32 %v907_v25, %v3179_v45 }
 0x193   : > { %v961_v3 = vpop.permute.xlu0 %960  ;;  %v923_v9 = vsel %vm922_vm8, %v919_v20, %v921_v54  ;;  %v924_v13 = vsel %vm922_vm8, %v921_v54, %v919_v20  ;;  %v3223_v20 = vrot.slane %v3062_v48, 7  ;;  %v3226_v25 = vrot.slane %v3064_v49, 7 }
 0x194   : > { %v1174_v17 = vadd.f32 %v916_v34, %v908_v59  ;;  %v1175_v19 = vadd.f32 %v917_v47, %v909_v60  ;;  %v3235_v30 = vmul.f32 %v3144_v27, %v923_v9  ;;  %v3238_v31 = vmul.f32 %v3182_v51, %v924_v13 }
 0x195   : > { %v1063_v54 = vstv %s3186_s25  ;;  %s4449_s25 = smov 113  }
 0x196   : > { %v942_v22 = vpop.permute.xlu1 %941  ;;  %v937_v0 = vmul.f32 %v936_v58, %v3235_v30  ;;  %v938_v39 = vmul.f32 %v936_v58, %v3238_v31  ;;  %v3273_v9 = vmul.f32 %v1063_v54, %v2985_v63 }
 0x197   : > { %v944_v32 = vsel %vm943_vm9, %v940_v37, %v942_v22  ;;  %v945_v34 = vsel %vm943_vm9, %v942_v22, %v940_v37  ;;  %v982_v35 = vpop.permute.xlu0 %981  ;;  %v1067_v22 = vstv %s3196_s22  ;;  %s3596_s22 = sld [smem:[#allocation13 + $0x4]] }
 0x198   : > { %v950_v37 = vmul.f32 %v3202_v61, %v944_v32  ;;  %v951_v41 = vmul.f32 %v3209_v15, %v945_v34  ;;  %v3270_v34 = vmul.f32 %v1063_v54, %v2981_v62  ;;  %v3276_v58 = vmul.f32 %v1067_v22, %v2981_v62 }
 0x19a   : > { %v963_v59 = vpop.permute.xlu1 %962  ;;  %v958_v28 = vmul.f32 %v957_v21, %v950_v37  ;;  %v959_v36 = vmul.f32 %v957_v21, %v951_v41  ;;  %v3279_v21 = vmul.f32 %v1067_v22, %v2985_v63  ;;  %v3289_v63 = vld [vmem:[#allocation9 + $0x10] sm:$0x1]  ;;  %v3291_v22 = vld [vmem:[#allocation9 + $0x18] sm:$0x1] }
 0x19b   : > { %v999_v40 = vpop.permute.xlu0 %998  ;;  %v965_v32 = vsel %vm964_vm10, %v961_v3, %v963_v59  ;;  %v966_v50 = vsel %vm964_vm10, %v963_v59, %v961_v3  ;;  %v840_v3 = vmul.f32 %v838_v46, %v3092_v5 }
 0x19c   : > { %v1176_v13 = vadd.f32 %v958_v28, %v937_v0  ;;  %v1177_v47 = vadd.f32 %v959_v36, %v938_v39  ;;  %v954_v39 = vmul.f32 %v4399_v43, %v950_v37 }
 0x19e   : > { %v984_v54 = vpop.permute.xlu1 %983  ;;  %v1190_v28 = vadd.f32 %v1176_v13, %v1174_v17  ;;  %v1191_v36 = vadd.f32 %v1177_v47, %v1175_v19  ;;  %v3304_v19 = vmul.f32 %v3223_v20, %v965_v32  ;;  %v3307_v47 = vmul.f32 %v3226_v25, %v966_v50 }
 0x19f   : > { %v1015_v62 = vpop.permute.xlu0 %1014  ;;  %v839_v13 = vmul.f32 %v838_v46, %v3089_v4  ;;  %v862_v50 = vmul.f32 %v861_v57, %v3107_v11  ;;  %v863_v4 = vmul.f32 %v861_v57, %v3110_v12 }
 0x1a0   : > { %v3298_v59 = vadd.f32 %v1190_v28, %v3188_v52  ;;  %v3301_v17 = vadd.f32 %v1191_v36, %v3190_v53  ;;  %v986_v52 = vsel %vm985_vm11, %v982_v35, %v984_v54  ;;  %v987_v53 = vsel %vm985_vm11, %v984_v54, %v982_v35 }
 0x1a1   : > { %v988_v46 = vmul.f32 %v986_v52, %v3289_v63  ;;  %v989_v5 = vmul.f32 %v987_v53, %v3291_v22  ;;  %v883_v36 = vmul.f32 %v882_v8, %v3129_v23  ;;  %v884_v35 = vmul.f32 %v882_v8, %v3132_v24 }
 0x1a2   : > { %v1001_v32 = vpop.permute.xlu1 %1000  ;;  %v979_v57 = vmul.f32 %v978_v29, %v3304_v19  ;;  %v980_v12 = vmul.f32 %v978_v29, %v3307_v47  ;;  %v4395_v52 = vstv %s3156_s13  ;;  %v4397_v8 = vstv %s3056_s9  ;;  %s3608_s13 = sld [smem:[#allocation13 + $0x12]]  ;;  %s3610_s9 = sld [smem:[#allocation14 + $0x1]] }
 0x1a3   : > { %v1031_v28 = vpop.permute.xlu0 %1030  ;;  %v1002_v54 = vsel %vm832_vm4, %v999_v40, %v1001_v32  ;;  %v1003_v11 = vsel %vm832_vm4, %v1001_v32, %v999_v40  ;;  %v996_v53 = vmul.f32 %v4395_v52, %v988_v46  ;;  %v4396_v23 = vmov %v4395_v52 }
 0x1a4   : > { %v997_v38 = vmul.f32 %v4396_v23, %v989_v5  ;;  %v904_v24 = vmul.f32 %v4397_v8, %v3176_v44  ;;  %v4398_v18 = vmov %v4397_v8  ;;  %v4400_v40 = vmov %v4399_v43 }
 0x1a5   : > { %v905_v16 = vmul.f32 %v4398_v18, %v3179_v45  ;;  %v955_v32 = vmul.f32 %v4400_v40, %v951_v41  ;;  %v1178_v60 = vadd.f32 %v996_v53, %v979_v57  ;;  %v1004_v29 = vmul.f32 %v1003_v11, %v3062_v48 }
 0x1a6   : > { %v1017_v0 = vpop.permute.xlu1 %1016  ;;  %v1179_v42 = vadd.f32 %v997_v38, %v980_v12  ;;  %v1005_v52 = vmul.f32 %v1002_v54, %v3064_v49  ;;  %v4401_v44 = vstv %s3116_s7  ;;  %v1136_v41 = vadd.f32 %v883_v36, %v862_v50  ;;  %s3624_s7 = sld [smem:[#allocation13 + $0x3]] }
 0x1a7   : > { %v1047_v23 = vpop.permute.xlu0 %1046  ;;  %v933_v18 = vmul.f32 %v4401_v44, %v3235_v30  ;;  %v4402_v45 = vmov %v4401_v44  ;;  %v1018_v37 = vsel %vm849_vm5, %v1015_v62, %v1017_v0  ;;  %v1019_v38 = vsel %vm849_vm5, %v1017_v0, %v1015_v62 }
 0x1a8   : > { %v934_v43 = vmul.f32 %v4402_v45, %v3238_v31  ;;  %v1137_v11 = vadd.f32 %v884_v35, %v863_v4  ;;  %v1020_v54 = vmul.f32 %v1019_v38, %v3076_v55  ;;  %v1021_v57 = vmul.f32 %v1018_v37, %v3079_v56 }
 0x1a9   : > { %v4403_v12 = vstv %s3037_s23  ;;  %v1140_v40 = vadd.f32 %v954_v39, %v933_v18  ;;  %v4405_v31 = vstv %s3168_s1  ;;  %v4407_v0 = vstv %s3172_s29  ;;  %s4441_s1 = smov 17   ;;  %s3620_s23 = sld [smem:[#allocation13 + $0x2]] }
 0x1aa   : > { %v1134_v53 = vadd.f32 %v839_v13, %v4403_v12  ;;  %v4404_v8 = vmov %v4403_v12  ;;  %v1141_v44 = vadd.f32 %v955_v32, %v934_v43  ;;  %v1033_v49 = vpop.permute.xlu1 %1032  ;;  %v1012_v45 = vmul.f32 %v4405_v31, %v1004_v29  ;;  %s3649_s29 = sld [smem:[#allocation13 + $0x8]] }
 0x1ab   : > { %v1135_v30 = vadd.f32 %v840_v3, %v4404_v8  ;;  %v4406_v48 = vmov %v4405_v31  ;;  %v1028_v62 = vmul.f32 %v4407_v0, %v1020_v54  ;;  %v4408_v50 = vmov %v4407_v0  ;;  %v1071_v36 = vpop.permute.xlu0 %1070 }
 0x1ac   : > { %v1013_v2 = vmul.f32 %v4406_v48, %v1005_v52  ;;  %v1029_v4 = vmul.f32 %v4408_v50, %v1021_v57  ;;  %v1138_v35 = vadd.f32 %v3140_v26, %v904_v24  ;;  %v1139_v13 = vadd.f32 %v3159_v33, %v905_v16  ;;  %4453 = sst [smem:[#allocation49_spill]] %s3624_s7 }
 0x1ad   : > { %v1034_v39 = vsel %vm872_vm6, %v1031_v28, %v1033_v49  ;;  %v1035_v3 = vsel %vm872_vm6, %v1033_v49, %v1031_v28  ;;  %v3389_v32 = vadd.f32 %v1136_v41, %v1134_v53  ;;  %v3391_v48 = vadd.f32 %v1137_v11, %v1135_v30 }
 0x1ae   : > { %v1180_v18 = vadd.f32 %v1028_v62, %v1012_v45  ;;  %v1181_v26 = vadd.f32 %v1029_v4, %v1013_v2  ;;  %v1154_v24 = vadd.f32 %v1140_v40, %v1138_v35  ;;  %v1155_v33 = vadd.f32 %v1141_v44, %v1139_v13  ;;  %v1049_v12 = vpop.permute.xlu1 %1048 }
 0x1af   : > { %v4409_v16 = vstv %s3154_s17  ;;  %v1036_v28 = vmul.f32 %v1035_v3, %v3095_v6  ;;  %v1037_v41 = vmul.f32 %v1034_v39, %v3098_v7  ;;  %v4411_v11 = vstv %s3146_s5  ;;  %v1087_v62 = vpop.permute.xlu0 %1086  ;;  %s3628_s5 = sld [smem:[#allocation13 + $0x5]]  ;;  %s3632_s17 = sld [smem:[#allocation13 + $0x6]] }
 0x1b0   : > { %v992_v43 = vmul.f32 %v4409_v16, %v988_v46  ;;  %v4410_v37 = vmov %v4409_v16  ;;  %v3397_v8 = vadd.f32 %v1180_v18, %v1178_v60  ;;  %v3399_v49 = vadd.f32 %v1181_v26, %v1179_v42 }
 0x1b1   : > { %v993_v38 = vmul.f32 %v4410_v37, %v989_v5  ;;  %v975_v2 = vmul.f32 %v4411_v11, %v3304_v19  ;;  %v4412_v53 = vmov %v4411_v11  ;;  %v4413_v46 = vstv %s3166_s18  ;;  %s3606_s18 = sld [smem:[#allocation14]] }
 0x1b2   : > { %v976_v30 = vmul.f32 %v4412_v53, %v3307_v47  ;;  %v1008_v40 = vmul.f32 %v4413_v46, %v1004_v29  ;;  %v4414_v5 = vmov %v4413_v46  ;;  %v4415_v44 = vstv %s3170_s10  ;;  %s4450_s10 = smov 112  }
 0x1b3   : > { %v1009_v60 = vmul.f32 %v4414_v5, %v1005_v52  ;;  %v1024_v42 = vmul.f32 %v4415_v44, %v1020_v54  ;;  %v4416_v31 = vmov %v4415_v44  ;;  %v1050_v0 = vsel %vm893_vm7, %v1047_v23, %v1049_v12  ;;  %v1073_v54 = vpop.permute.xlu1 %1072 }
 0x1b4   : > { %v1025_v45 = vmul.f32 %v4416_v31, %v1021_v57  ;;  %v1051_v19 = vsel %vm893_vm7, %v1049_v12, %v1047_v23  ;;  %v1142_v47 = vadd.f32 %v992_v43, %v975_v2  ;;  %v1143_v50 = vadd.f32 %v993_v38, %v976_v30 }
 0x1b5   : > { %v1052_v29 = vmul.f32 %v1051_v19, %v3104_v10  ;;  %v1053_v52 = vmul.f32 %v1050_v0, %v3113_v14  ;;  %v4417_v4 = vstv %s3194_s30  ;;  %v1074_v39 = vsel %vm922_vm8, %v1071_v36, %v1073_v54  ;;  %s3651_s30 = sld [smem:[#allocation13 + $0x1a]] }
 0x1b6   : > { %v1044_v35 = vmul.f32 %v4417_v4, %v1036_v28  ;;  %v4418_v57 = vmov %v4417_v4  ;;  %v1075_v23 = vsel %vm922_vm8, %v1073_v54, %v1071_v36  ;;  %v4419_v3 = vstv %s3212_s20  ;;  %s3634_s20 = sld [smem:[#allocation13 + $0x18]] }
 0x1b7   : > { %v1045_v13 = vmul.f32 %v4418_v57, %v1037_v41  ;;  %v1056_v18 = vmul.f32 %v4419_v3, %v1052_v29  ;;  %v4420_v26 = vmov %v4419_v3  ;;  %v4421_v43 = vstv %s3214_s27  ;;  %v1089_v19 = vpop.permute.xlu1 %1088  ;;  %s4443_s27 = smov 15  }
 0x1b8   : > { %v1057_v16 = vmul.f32 %v4420_v26, %v1053_v52  ;;  %v1060_v37 = vmul.f32 %v4421_v43, %v1052_v29  ;;  %v4422_v38 = vmov %v4421_v43  ;;  %v1144_v11 = vadd.f32 %v1024_v42, %v1008_v40 }
 0x1b9   : > { %v1061_v12 = vmul.f32 %v4422_v38, %v1053_v52  ;;  %v1145_v2 = vadd.f32 %v1025_v45, %v1009_v60  ;;  %v1076_v53 = vmul.f32 %v1074_v39, %v3144_v27  ;;  %v1077_v30 = vmul.f32 %v1075_v23, %v3182_v51  ;;  %v1103_v60 = vpop.permute.xlu0 %1102 }
 0x1ba   : > { %v4423_v46 = vstv %s3184_s28  ;;  %v1182_v31 = vadd.f32 %v1060_v37, %v1044_v35  ;;  %v4425_v54 = vstv %s3218_s21  ;;  %v4427_v29 = vstv %s3220_s12  ;;  %s4442_s12 = smov 16   ;;  %s4444_s28 = smov 1  }
 0x1bb   : > { %v1040_v5 = vmul.f32 %v4423_v46, %v1036_v28  ;;  %v4424_v44 = vmov %v4423_v46  ;;  %v1183_v0 = vadd.f32 %v1061_v12, %v1045_v13  ;;  %v1080_v4 = vmul.f32 %v4425_v54, %v1076_v53  ;;  %v1105_v38 = vpop.permute.xlu1 %1104  ;;  %s4451_s21 = smov 111  }
 0x1bc   : > { %v1041_v36 = vmul.f32 %v4424_v44, %v1037_v41  ;;  %v4426_v57 = vmov %v4425_v54  ;;  %v1084_v26 = vmul.f32 %v4427_v29, %v1076_v53  ;;  %v4428_v52 = vmov %v4427_v29 }
 0x1bd   : > { %v1081_v3 = vmul.f32 %v4426_v57, %v1077_v30  ;;  %v1085_v40 = vmul.f32 %v4428_v52, %v1077_v30  ;;  %v1146_v42 = vadd.f32 %v1056_v18, %v1040_v5  ;;  %v1090_v39 = vsel %vm943_vm9, %v1087_v62, %v1089_v19  ;;  %v1119_v44 = vpop.permute.xlu0 %1118 }
 0x1be   : > { %v1147_v45 = vadd.f32 %v1057_v16, %v1041_v36  ;;  %v1091_v28 = vsel %vm943_vm9, %v1089_v19, %v1087_v62  ;;  %v1148_v41 = vadd.f32 %v1080_v4, %v3270_v34  ;;  %v1184_v13 = vadd.f32 %v1084_v26, %v3276_v58 }
 0x1bf   : > { %v1149_v35 = vadd.f32 %v1081_v3, %v3273_v9  ;;  %v1185_v23 = vadd.f32 %v1085_v40, %v3279_v21  ;;  %v1156_v43 = vadd.f32 %v1144_v11, %v1142_v47  ;;  %v1157_v37 = vadd.f32 %v1145_v2, %v1143_v50 }
 0x1c0   : > { %v1092_v18 = vmul.f32 %v1090_v39, %v3202_v61  ;;  %v1093_v16 = vmul.f32 %v1091_v28, %v3209_v15  ;;  %v1158_v62 = vadd.f32 %v1148_v41, %v1146_v42  ;;  %v1194_v53 = vadd.f32 %v1184_v13, %v1182_v31 }
 0x1c1   : > { %v1159_v12 = vadd.f32 %v1149_v35, %v1147_v45  ;;  %v1195_v34 = vadd.f32 %v1185_v23, %v1183_v0  ;;  %v1162_v30 = vadd.f32 %v1154_v24, %v3389_v32  ;;  %v1163_v9 = vadd.f32 %v1155_v33, %v3391_v48  ;;  %v1121_v33 = vpop.permute.xlu1 %1120 }
 0x1c2   : > { %v4429_v58 = vstv %s3230_s0  ;;  %v1164_v50 = vadd.f32 %v1158_v62, %v1156_v43  ;;  %v1200_v2 = vadd.f32 %v1194_v53, %v3397_v8  ;;  %v4431_v36 = vstv %s3232_s15  ;;  %s4448_s15 = smov 127   ;;  %s3699_s0 = sld [smem:[#allocation13 + $0xe]] }
 0x1c3   : > { %v1096_v46 = vmul.f32 %v4429_v58, %v1092_v18  ;;  %v4430_v21 = vmov %v4429_v58  ;;  %v1165_v11 = vadd.f32 %v1159_v12, %v1157_v37  ;;  %v1201_v5 = vadd.f32 %v1195_v34, %v3399_v49 }
 0x1c4   : > { %v1097_v47 = vmul.f32 %v4430_v21, %v1093_v16  ;;  %v1100_v31 = vmul.f32 %v4431_v36, %v1092_v18  ;;  %v4432_v0 = vmov %v4431_v36  ;;  %v1106_v48 = vsel %vm964_vm10, %v1103_v60, %v1105_v38  ;;  %v703_v36 = vld [vmem:[%s4446_s2] sm:$0x3]  ;;  %s3715_s2 = sld [smem:[#allocation13 + $0xf]] }
 0x1c5   : > { %v1101_v32 = vmul.f32 %v4432_v0, %v1093_v16  ;;  %v1107_v24 = vsel %vm964_vm10, %v1105_v38, %v1103_v60  ;;  %v1108_v8 = vmul.f32 %v1106_v48, %v3223_v20  ;;  %v1166_v49 = vadd.f32 %v1164_v50, %v1162_v30  ;;  %v4447_v48 = vld [vmem:[#allocation43_spill] sm:$0xff] }
 0x1c6   : > { %v1109_v19 = vmul.f32 %v1107_v24, %v3226_v25  ;;  %v1167_v54 = vadd.f32 %v1165_v11, %v1163_v9  ;;  %v1202_v4 = vadd.f32 %v1200_v2, %v3298_v59  ;;  %v1203_v57 = vadd.f32 %v1201_v5, %v3301_v17  ;;  %v4445_v5 = vld [vmem:[#allocation42_spill] sm:$0xff] }
 0x1c7   : > { %v1122_v3 = vsel %vm985_vm11, %v1119_v44, %v1121_v33  ;;  %v1123_v29 = vsel %vm985_vm11, %v1121_v33, %v1119_v44  ;;  %v4433_v26 = vstv %s3245_s6  ;;  %v4435_v42 = vstv %s3247_s19  ;;  %s3600_s6 = sld [smem:[#allocation13 + $0xd]]  ;;  %s3604_s19 = sld [smem:[#allocation13 + $0x1f]] }
 0x1c8   : > { %v1112_v52 = vmul.f32 %v4433_v26, %v1108_v8  ;;  %v4434_v40 = vmov %v4433_v26  ;;  %v1116_v45 = vmul.f32 %v4435_v42, %v1108_v8  ;;  %v4436_v39 = vmov %v4435_v42 }
 0x1c9   : > { %v1113_v60 = vmul.f32 %v4434_v40, %v1109_v19  ;;  %v1117_v28 = vmul.f32 %v4436_v39, %v1109_v19  ;;  %v1124_v59 = vmul.f32 %v1122_v3, %v3289_v63  ;;  %v1125_v41 = vmul.f32 %v1123_v29, %v3291_v22  ;;  %v704_v40 = vld [vmem:[%s4455_s3] sm:$0x3]  ;;  %s3717_s3 = sld [smem:[#allocation13 + $0x21]] }
 0x1ca   : > { %v1150_v17 = vadd.f32 %v1112_v52, %v1096_v46  ;;  %v1186_v13 = vadd.f32 %v1116_v45, %v1100_v31  ;;  %v4437_v43 = vstv %s3253_s14  ;;  %v4439_v38 = vstv %s3255_s4  ;;  %s3598_s4 = sld [smem:[#allocation13 + $0x16]]  ;;  %s3602_s14 = sld [smem:[#allocation13]] }
 0x1cb   : > { %v1151_v35 = vadd.f32 %v1113_v60, %v1097_v47  ;;  %v1187_v23 = vadd.f32 %v1117_v28, %v1101_v32  ;;  %v1128_v37 = vmul.f32 %v4437_v43, %v1124_v59  ;;  %v4438_v18 = vmov %v4437_v43 }
 0x1cc   : > { %v1129_v16 = vmul.f32 %v4438_v18, %v1125_v41  ;;  %v1132_v62 = vmul.f32 %v4439_v38, %v1124_v59  ;;  %v4440_v12 = vmov %v4439_v38  ;;  %v3524_v44 = vsub.s32 0, %v4445_v5 }
 0x1cd   : > { %v1133_v53 = vmul.f32 %v4440_v12, %v1125_v41  ;;  %v1160_v34 = vadd.f32 %v1150_v17, %v1128_v37  ;;  %v3530_v31 = vsub.s32 1, %v4445_v5  ;;  %v1279_v42 = vstv %s3596_s22  ;;  %s3679_s22 = sld [smem:[#allocation13 + $0xb]] }
 0x1ce   : > { %v1161_v30 = vadd.f32 %v1151_v35, %v1129_v16  ;;  %v1196_v9 = vadd.f32 %v1186_v13, %v1132_v62  ;;  %v708_v0 = vrot.slane %v703_v36, %v3524_v44  ;;  %v1415_v39 = vstv %s3600_s6  ;;  %s3689_s6 = sld [smem:[#allocation13 + $0xc]] }
 0x1cf   : > { %v1197_v58 = vadd.f32 %v1187_v23, %v1133_v53  ;;  %v1168_v21 = vadd.f32 %v1166_v49, %v1160_v34  ;;  %v723_v32 = vrot.slane %v703_v36, %v3530_v31  ;;  %v1419_v28 = vstv %s3604_s19  ;;  %s3691_s19 = sld [smem:[#allocation13 + $0x1e]] }
 0x1d0   : > { %v1169_v50 = vadd.f32 %v1167_v54, %v1161_v30  ;;  %v1204_v11 = vadd.f32 %v1202_v4, %v1196_v9  ;;  %v709_v24 = vmul.f32 %v708_v0, %v4447_v48  ;;  %v1283_v45 = vstv %s3598_s4  ;;  %s3681_s4 = sld [smem:[#allocation13 + $0x1d]] }
 0x1d1   : > { %v1205_v2 = vadd.f32 %v1203_v57, %v1197_v58  ;;  %v3505_v46 = vmax.f32 %v1168_v21, 0.0  ;;  %v724_v33 = vmul.f32 %v723_v32, %v4447_v48  ;;  %v1211_v59 = vstv %s3606_s18 }
 0x1d2   : > { %v3507_v47 = vmax.f32 %v1169_v50, 0.0  ;;  %v711_v8 = vsel %vm710_vm12, %v709_v24, 0.0  ;;  %v3554_v49 = vmax.f32 %v1204_v11, 0.0  ;;  %v1213_v41 = vstv %s3610_s9  ;;  %s4013_s9 = sld [smem:[#allocation16 + $0x1]] }
 0x1d3   : > { %1214 = vrot.lane.b32.xlu0 %v3505_v46, %s4441_s1  ;;  %v725_v19 = vsel %vm710_vm12, %v724_v33, 0.0  ;;  %v3556_v54 = vmax.f32 %v1205_v2, 0.0  ;;  %v1223_v17 = vstv %s3602_s14  ;;  %v1227_v35 = vstv %s3608_s13  ;;  %s2565_s14 = smov [#allocation18]  }
 0x1d4   : > { %1216 = vrot.lane.b32.xlu1 %v3507_v47, %s4441_s1  ;;  %v1239_v13 = vstv %s3612_s8  ;;  %v1243_v23 = vstv %s3618_s11  ;;  %v1255_v43 = vstv %s3620_s23  ;;  %v718_v37 = vrot.slane %v704_v40, %v3524_v44  ;;  %s3737_s11 = sld [smem:[#allocation13 + $0x23]]  ;;  %s2402_s18 = sshll.u32 %s2565_s14, 4  ;;  %s2403_s18 = int_to_ptr.vmem [resolvable:$false] %s2402_s18 }
 0x1d5   : > { %v1259_v18 = vstv %s3622_s16  ;;  %v732_v38 = vrot.slane %v704_v40, %v3530_v31  ;;  %v3674_v62 = vmul.f32 %v1279_v42, %v3505_v46  ;;  %v3677_v12 = vmul.f32 %v1279_v42, %v3507_v47  ;;  %v4458_v40 = vld [vmem:[#allocation44_spill] sm:$0xff]  ;;  %s4512_s8 = sld [smem:[#allocation40_spill]]  ;;  %s4515_s16 = sld [smem:[#allocation41_spill]] }
 0x1d6   : > { %v3684_v30 = vmul.f32 %v1283_v45, %v3505_v46  ;;  %v3687_v9 = vmul.f32 %v1283_v45, %v3507_v47  ;;  %v3694_v58 = vmul.f32 %v1415_v39, %v3556_v54  ;;  %v3697_v50 = vmul.f32 %v1419_v28, %v3556_v54  ;;  %s2404_s13 = scalar_lea.vmem %s2403_s18, 2048 }
 0x1d7   : > { %1230 = vrot.lane.b32.xlu0 %v3505_v46, %s4442_s12  ;;  %v3704_v11 = vmul.f32 %v1415_v39, %v3554_v49  ;;  %v3707_v2 = vmul.f32 %v1419_v28, %v3554_v49  ;;  %v1271_v36 = vstv %s3624_s7  ;;  %v1275_v0 = vstv %s3626_s26  ;;  %s3729_s26 = sld [smem:[#allocation13 + $0x22]]  ;;  %s3735_s7 = sld [smem:[#allocation13 + $0x11]] }
 0x1d8   : > { %1232 = vrot.lane.b32.xlu1 %v3507_v47, %s4442_s12  ;;  %4456 = vst [vmem:[#allocation43_spill] sm:$0xff] %v3697_v50  ;;  %v4465_v5 = vstv %s3630_s24 }
 0x1d9   : > { %4457 = vst [vmem:[#allocation51_spill] sm:$0xff] %v3707_v2 }
 0x1db   : > { %1246 = vrot.lane.b32.xlu0 %v3505_v46, %s4443_s27 }
 0x1dc   : > { %1248 = vrot.lane.b32.xlu1 %v3507_v47, %s4443_s27 }
 0x1df   : > { %1262 = vrot.lane.b32.xlu0 %v3505_v46, %s4444_s28 }
 0x1fe   : > { %712 = vadd.xlane.f32.xlu0 %v711_v8 }
 0x200   : > { %726 = vadd.xlane.f32.xlu1 %v725_v19 }
 0x211   : > { %1264 = vrot.lane.b32.xlu1 %v3507_v47, %s4444_s28 }
 0x214   : > { %1286 = vrot.lane.b32.xlu0 %v3505_v46, %s4448_s15 }
 0x215   : > { %1288 = vrot.lane.b32.xlu1 %v3507_v47, %s4448_s15 }
 0x218   : > { %1302 = vrot.lane.b32.xlu0 %v3505_v46, %s4449_s25 }
 0x219   : > { %1304 = vrot.lane.b32.xlu1 %v3507_v47, %s4449_s25 }
 0x21c   : > { %1318 = vrot.lane.b32.xlu0 %v3505_v46, %s4450_s10 }
 0x21d   : > { %1320 = vrot.lane.b32.xlu1 %v3507_v47, %s4450_s10 }
 0x220   : > { %1334 = vrot.lane.b32.xlu0 %v3505_v46, %s4451_s21 }
 0x221   : > { %1336 = vrot.lane.b32.xlu1 %v3507_v47, %s4451_s21 }
 0x224   : > { %1350 = vrot.lane.b32.xlu0 %v3554_v49, %s4441_s1 }
 0x225   : > { %1352 = vrot.lane.b32.xlu1 %v3556_v54, %s4441_s1  ;;  %s3701_s1 = sld [smem:[#allocation13 + $0x20]] }
 0x228   : > { %1366 = vrot.lane.b32.xlu0 %v3554_v49, %s4442_s12 }
 0x229   : > { %1368 = vrot.lane.b32.xlu1 %v3556_v54, %s4442_s12  ;;  %s3727_s12 = sld [smem:[#allocation13 + $0x10]] }
 0x22c   : > { %1382 = vrot.lane.b32.xlu0 %v3554_v49, %s4443_s27 }
 0x22d   : > { %1384 = vrot.lane.b32.xlu1 %v3556_v54, %s4443_s27  ;;  %s3641_s27 = sld [smem:[#allocation13 + $0x7]] }
 0x230   : > { %1398 = vrot.lane.b32.xlu0 %v3554_v49, %s4444_s28 }
 0x231   : > { %1400 = vrot.lane.b32.xlu1 %v3556_v54, %s4444_s28  ;;  %s3643_s28 = sld [smem:[#allocation13 + $0x19]] }
 0x234   : > { %1422 = vrot.lane.b32.xlu0 %v3554_v49, %s4448_s15 }
 0x235   : > { %1424 = vrot.lane.b32.xlu1 %v3556_v54, %s4448_s15  ;;  %s3659_s15 = sld [smem:[#allocation13 + $0x9]] }
 0x238   : > { %1438 = vrot.lane.b32.xlu0 %v3554_v49, %s4449_s25 }
 0x239   : > { %1440 = vrot.lane.b32.xlu1 %v3556_v54, %s4449_s25  ;;  %s3661_s25 = sld [smem:[#allocation13 + $0x1b]] }
 0x23c   : > { %1454 = vrot.lane.b32.xlu0 %v3554_v49, %s4450_s10 }
 0x23d   : > { %1456 = vrot.lane.b32.xlu1 %v3556_v54, %s4450_s10  ;;  %s3667_s10 = sld [smem:[#allocation13 + $0xa]] }
 0x240   : > { %1470 = vrot.lane.b32.xlu0 %v3554_v49, %s4451_s21  ;;  %v1311_v49 = vstv %s3632_s17 }
 0x241   : > { %1472 = vrot.lane.b32.xlu1 %v3556_v54, %s4451_s21  ;;  %s3669_s21 = sld [smem:[#allocation13 + $0x1c]]  ;;  %v1315_v54 = vstv %s3634_s20 }
 0x245   : > { %v3590_v4 = vpop.permute.xlu0 %1214 }
 0x246   : > { %v3594_v3 = vpop.permute.xlu1 %1216 }
 0x247   : > { %v1219_v46 = vsel %vm832_vm4, %v3594_v3, %v3590_v4  ;;  %v1218_v32 = vsel %vm832_vm4, %v3590_v4, %v3594_v3 }
 0x248   : > { %v1220_v42 = vmul.f32 %v1219_v46, %v4458_v40 }
 0x249   : > { %v3592_v57 = vpop.permute.xlu0 %1230 }
 0x24a   : > { %v3616_v26 = vpop.permute.xlu1 %1232  ;;  %v1228_v39 = vmul.f32 %v1227_v35, %v1220_v42 }
 0x24d   : > { %v3614_v29 = vpop.permute.xlu0 %1246 }
 0x24e   : > { %v3645_v60 = vpop.permute.xlu1 %1248 }
 0x251   : > { %v3636_v52 = vpop.permute.xlu0 %1262 }
 0x28b   : > { %v713_v16 = vpop.xlane.xlu0 %712 }
 0x28c   : > { %v714_v53 = vmax.f32 %v713_v16, 0.0 }
 0x28d   : > { %v727_v34 = vpop.xlane.xlu1 %726 }
 0x28e   : > { %v728_v21 = vmax.f32 %v727_v34, 0.0  ;;  %v719_v47 = vmul.f32 %v718_v37, %v714_v53  ;;  %v4459_v37 = vld [vmem:[#allocation45_spill] sm:$0xff]  ;;  %v1224_v53 = vmul.f32 %v1223_v17, %v1220_v42 }
 0x28f   : > { %v3723_v24 = vpop.permute.xlu0 %1286  ;;  %v1221_v16 = vmul.f32 %v1218_v32, %v4459_v37  ;;  %v1251_v32 = vsel %vm872_vm6, %v3645_v60, %v3614_v29 }
 0x290   : > { %v733_v48 = vmul.f32 %v732_v38, %v728_v21  ;;  %v1252_v40 = vmul.f32 %v1251_v32, %v3095_v6 }
 0x291   : > { %v1265_v19 = vpop.permute.xlu1 %1264  ;;  %v1225_v34 = vmul.f32 %v1223_v17, %v1221_v16  ;;  %v1229_v8 = vmul.f32 %v1227_v35, %v1221_v16 }
 0x292   : > { %v734_v45 = vadd.f32 %v733_v48, %v719_v47  ;;  %v1250_v47 = vsel %vm872_vm6, %v3614_v29, %v3645_v60  ;;  %v1234_v29 = vsel %vm849_vm5, %v3592_v57, %v3616_v26  ;;  %v1256_v16 = vmul.f32 %v1255_v43, %v1252_v40 }
 0x293   : > { %v1303_v3 = vpop.permute.xlu0 %1302  ;;  %v1253_v4 = vmul.f32 %v1250_v47, %v3098_v7  ;;  %v1237_v47 = vmul.f32 %v1234_v29, %v3079_v56  ;;  %v1487_v35 = vadd.f32 %v1225_v34, %v1211_v59  ;;  %v1266_v29 = vsel %vm893_vm7, %v3636_v52, %v1265_v19 }
 0x294   : > { %v735_v21 = vsub.f32 0.0, %v734_v45  ;;  %v1260_v45 = vmul.f32 %v1259_v18, %v1252_v40  ;;  %v3816_v34 = vadd.f32 %v1228_v39, %v1213_v41  ;;  %v1269_v39 = vmul.f32 %v1266_v29, %v3113_v14 }
 0x295   : > { %v1289_v48 = vpop.permute.xlu1 %1288 }
 0x296   : > { %v736_v46 = vmul.f32 1.442695, %v735_v21  ;;  %v1235_v21 = vsel %vm849_vm5, %v3616_v26, %v3592_v57  ;;  %v1486_v57 = vadd.f32 %v1224_v53, %v1211_v59  ;;  %v1267_v26 = vsel %vm893_vm7, %v1265_v19, %v3636_v52 }
 0x297   : > { %v1319_v17 = vpop.permute.xlu0 %1318  ;;  %v1257_v53 = vmul.f32 %v1255_v43, %v1253_v4  ;;  %v1268_v60 = vmul.f32 %v1267_v26, %v3104_v10  ;;  %v1290_v59 = vsel %vm922_vm8, %v3723_v24, %v1289_v48  ;;  %v3820_v52 = vadd.f32 %v1229_v8, %v1213_v41 }
 0x298   : > { %2203 = vpow2.f32 %v736_v46  ;;  %v1236_v46 = vmul.f32 %v1235_v21, %v3076_v55  ;;  %v1241_v26 = vmul.f32 %v1239_v13, %v1237_v47  ;;  %v1261_v41 = vmul.f32 %v1259_v18, %v1253_v4 }
 0x299   : > { %v1305_v37 = vpop.permute.xlu1 %1304  ;;  %v1292_v8 = vmul.f32 %v1290_v59, %v3144_v27  ;;  %v1272_v29 = vmul.f32 %v1271_v36, %v1268_v60  ;;  %v1273_v33 = vmul.f32 %v1271_v36, %v1269_v39 }
 0x29a   : > { %v1306_v32 = vsel %vm943_vm9, %v1303_v3, %v1305_v37  ;;  %v1307_v42 = vsel %vm943_vm9, %v1305_v37, %v1303_v3  ;;  %v1291_v3 = vsel %vm922_vm8, %v1289_v48, %v3723_v24  ;;  %v1240_v37 = vmul.f32 %v1239_v13, %v1236_v46 }
 0x29b   : > { %v1335_v21 = vpop.permute.xlu0 %1334  ;;  %v1308_v19 = vmul.f32 %v1306_v32, %v3202_v61  ;;  %v1309_v40 = vmul.f32 %v1307_v42, %v3209_v15  ;;  %v1244_v24 = vmul.f32 %v1243_v23, %v1236_v46  ;;  %v1245_v48 = vmul.f32 %v1243_v23, %v1237_v47 }
 0x29c   : > { %v1293_v32 = vmul.f32 %v1291_v3, %v3182_v51  ;;  %v1488_v13 = vadd.f32 %v1256_v16, %v1240_v37  ;;  %v1489_v46 = vadd.f32 %v1257_v53, %v1241_v26  ;;  %v1276_v16 = vmul.f32 %v1275_v0, %v1268_v60 }
 0x29d   : > { %v1321_v43 = vpop.permute.xlu1 %1320  ;;  %v1524_v28 = vadd.f32 %v1260_v45, %v1244_v24  ;;  %v1312_v18 = vmul.f32 %v1311_v49, %v1308_v19  ;;  %v1313_v4 = vmul.f32 %v1311_v49, %v1309_v40  ;;  %v1316_v59 = vmul.f32 %v1315_v54, %v1308_v19 }
 0x29e   : > { %v1317_v3 = vmul.f32 %v1315_v54, %v1309_v40  ;;  %v1277_v53 = vmul.f32 %v1275_v0, %v1269_v39  ;;  %v4463_v45 = vstv %s3628_s5  ;;  %v1300_v15 = vmul.f32 %v4465_v5, %v1292_v8 }
 0x29f   : > { %v1351_v42 = vpop.permute.xlu0 %1350  ;;  %v1296_v37 = vmul.f32 %v4463_v45, %v1292_v8  ;;  %v4464_v26 = vmov %v4463_v45  ;;  %v4466_v61 = vmov %v4465_v5  ;;  %v1525_v2 = vadd.f32 %v1261_v41, %v1245_v48 }
 0x2a0   : > { %v1297_v24 = vmul.f32 %v4464_v26, %v1293_v32  ;;  %v1301_v50 = vmul.f32 %v4466_v61, %v1293_v32  ;;  %v1322_v54 = vsel %vm964_vm10, %v1319_v17, %v1321_v43  ;;  %v1323_v36 = vsel %vm964_vm10, %v1321_v43, %v1319_v17 }
 0x2a1   : > { %v1337_v23 = vpop.permute.xlu1 %1336  ;;  %v1492_v19 = vadd.f32 %v1312_v18, %v1296_v37  ;;  %v1528_v40 = vadd.f32 %v1316_v59, %v1300_v15  ;;  %v1505_v45 = vadd.f32 %v1489_v46, %v1487_v35  ;;  %v1490_v5 = vadd.f32 %v3674_v62, %v1272_v29  ;;  %v2215_v29 = vld [vmem:[#allocation9] sm:$0xff]  ;;  %v2216_v18 = vld [vmem:[#allocation9 + $0x8] sm:$0xff] }
 0x2a2   : > { %v2204_v47 = vpop.eup %2203  ;;  %v1493_v0 = vadd.f32 %v1313_v4, %v1297_v24  ;;  %v1529_v39 = vadd.f32 %v1317_v3, %v1301_v50  ;;  %v1491_v61 = vadd.f32 %v3677_v12, %v1273_v33  ;;  %v1526_v48 = vadd.f32 %v3684_v30, %v1276_v16 }
 0x2a3   : > { %v738_v38 = vadd.f32 1.0, %v2204_v47  ;;  %v1367_v49 = vpop.permute.xlu0 %1366  ;;  %v1504_v47 = vadd.f32 %v1488_v13, %v1486_v57  ;;  %v1338_v41 = vsel %vm985_vm11, %v1335_v21, %v1337_v23  ;;  %v1339_v17 = vsel %vm985_vm11, %v1337_v23, %v1335_v21 }
 0x2a4   : > { %v1324_v15 = vmul.f32 %v1322_v54, %v3223_v20  ;;  %v1325_v50 = vmul.f32 %v1323_v36, %v3226_v25  ;;  %v1507_v33 = vadd.f32 %v1493_v0, %v1491_v61  ;;  %v1542_v57 = vadd.f32 %v1528_v40, %v1526_v48 }
 0x2a5   : > { %2205 = vrcp.f32 %v738_v38  ;;  %v1353_v60 = vpop.permute.xlu1 %1352  ;;  %v1527_v38 = vadd.f32 %v3687_v9, %v1277_v53  ;;  %v1506_v9 = vadd.f32 %v1492_v19, %v1490_v5  ;;  %v1340_v21 = vmul.f32 %v1338_v41, %v3289_v63 }
 0x2a6   : > { %v1354_v62 = vsel %vm832_vm4, %v1351_v42, %v1353_v60  ;;  %v1355_v12 = vsel %vm832_vm4, %v1353_v60, %v1351_v42  ;;  %v1341_v8 = vmul.f32 %v1339_v17, %v3291_v22  ;;  %v1540_v42 = vadd.f32 %v1524_v28, %v3816_v34 }
 0x2a7   : > { %v1383_v43 = vpop.permute.xlu0 %1382  ;;  %v1543_v35 = vadd.f32 %v1529_v39, %v1527_v38  ;;  %v1541_v46 = vadd.f32 %v1525_v2, %v3820_v52  ;;  %v1356_v23 = vmul.f32 %v2215_v29, %v1355_v12  ;;  %v1357_v4 = vmul.f32 %v2216_v18, %v1354_v62 }
 0x2a8   : > { %v4467_v22 = vstv %s3641_s27  ;;  %v4469_v53 = vstv %s3643_s28  ;;  %v3894_v52 = vadd.f32 %v1506_v9, %v1504_v47  ;;  %v3896_v37 = vadd.f32 %v1507_v33, %v1505_v45 }
 0x2a9   : > { %v1369_v30 = vpop.permute.xlu1 %1368  ;;  %v1328_v59 = vmul.f32 %v4467_v22, %v1324_v15  ;;  %v4468_v3 = vmov %v4467_v22  ;;  %v1332_v28 = vmul.f32 %v4469_v53, %v1324_v15  ;;  %v3898_v26 = vadd.f32 %v1542_v57, %v1540_v42 }
 0x2aa   : > { %v1370_v32 = vsel %vm849_vm5, %v1367_v49, %v1369_v30  ;;  %v1371_v13 = vsel %vm849_vm5, %v1369_v30, %v1367_v49  ;;  %v1329_v16 = vmul.f32 %v4468_v3, %v1325_v50  ;;  %v3901_v54 = vadd.f32 %v1543_v35, %v1541_v46 }
 0x2ab   : > { %v1399_v63 = vpop.permute.xlu0 %1398  ;;  %v1372_v2 = vmul.f32 %v1371_v13, %v3076_v55  ;;  %v1373_v24 = vmul.f32 %v1370_v32, %v3079_v56  ;;  %v4470_v36 = vstv %s3649_s29  ;;  %v4472_v0 = vstv %s3651_s30  ;;  %s4518_s30 = sld [smem:[#allocation63_spill]] }
 0x2ac   : > { %v1344_v60 = vmul.f32 %v4470_v36, %v1340_v21  ;;  %v4471_v19 = vmov %v4470_v36  ;;  %v1348_v40 = vmul.f32 %v4472_v0, %v1340_v21  ;;  %v4473_v39 = vmov %v4469_v53 }
 0x2ad   : > { %v1385_v34 = vpop.permute.xlu1 %1384  ;;  %v1345_v55 = vmul.f32 %v4471_v19, %v1341_v8  ;;  %v1333_v47 = vmul.f32 %v4473_v39, %v1325_v50  ;;  %v4474_v45 = vmov %v4472_v0  ;;  %v4475_v61 = vstv %s3659_s15 }
 0x2ae   : > { %v1349_v5 = vmul.f32 %v4474_v45, %v1341_v8  ;;  %v1360_v56 = vmul.f32 %v4475_v61, %v1356_v23  ;;  %v4476_v48 = vmov %v4475_v61  ;;  %v4477_v17 = vstv %s3667_s10 }
 0x2af   : > { %v2206_v49 = vpop.eup %2205  ;;  %v1361_v38 = vmul.f32 %v4476_v48, %v1357_v4  ;;  %v1423_v41 = vpop.permute.xlu0 %1422  ;;  %v1376_v15 = vmul.f32 %v4477_v17, %v1372_v2  ;;  %v1386_v62 = vsel %vm872_vm6, %v1383_v43, %v1385_v34  ;;  %v1387_v12 = vsel %vm872_vm6, %v1385_v34, %v1383_v43 }
 0x2b0   : > { %v744_v9 = vrot.slane %v2206_v49, %v3524_v44  ;;  %v4478_v50 = vstv %s3661_s25  ;;  %v4480_v21 = vmov %v4477_v17  ;;  %v4481_v32 = vstv %s3669_s21 }
 0x2b1   : > { %v1401_v30 = vpop.permute.xlu1 %1400  ;;  %v1364_v33 = vmul.f32 %v4478_v50, %v1356_v23  ;;  %v4479_v57 = vmov %v4478_v50  ;;  %v1377_v8 = vmul.f32 %v4480_v21, %v1373_v24  ;;  %v1380_v13 = vmul.f32 %v4481_v32, %v1372_v2  ;;  %s4519_s15 = smov %s4518_s30 }
 0x2b2   : > { %v1365_v35 = vmul.f32 %v4479_v57, %v1357_v4  ;;  %v1494_v42 = vadd.f32 %v1344_v60, %v1328_v59  ;;  %v1495_v46 = vadd.f32 %v1345_v55, %v1329_v16  ;;  %v1530_v29 = vadd.f32 %v1348_v40, %v1332_v28  ;;  %750 = vbcast.lane.b32.xlu1 %v744_v9, 264 }
 0x2b3   : > { %v4482_v18 = vmov %v4481_v32  ;;  %v1388_v3 = vmul.f32 %v1387_v12, %v3095_v6  ;;  %v1389_v43 = vmul.f32 %v1386_v62, %v3098_v7  ;;  %v1402_v23 = vsel %vm893_vm7, %v1399_v63, %v1401_v30  ;;  %746 = vbcast.lane.b32.xlu0 %v744_v9, 256  ;;  %v1439_v6 = vpop.permute.xlu0 %1438 }
 0x2b4   : > { %v1381_v22 = vmul.f32 %v4482_v18, %v1373_v24  ;;  %v1403_v4 = vsel %vm893_vm7, %v1401_v30, %v1399_v63  ;;  %v1531_v59 = vadd.f32 %v1349_v5, %v1333_v47  ;;  %v1496_v16 = vadd.f32 %v1376_v15, %v1360_v56 }
 0x2b5   : > { %v1404_v53 = vmul.f32 %v1403_v4, %v3104_v10  ;;  %v1405_v28 = vmul.f32 %v1402_v23, %v3113_v14  ;;  %v1425_v2 = vpop.permute.xlu1 %1424  ;;  %v1497_v7 = vadd.f32 %v1377_v8, %v1361_v38  ;;  %v1532_v34 = vadd.f32 %v1380_v13, %v1364_v33 }
 0x2b6   : > { %v1426_v63 = vsel %vm922_vm8, %v1423_v41, %v1425_v2  ;;  %v1427_v24 = vsel %vm922_vm8, %v1425_v2, %v1423_v41  ;;  %v1533_v36 = vadd.f32 %v1381_v22, %v1365_v35  ;;  %v4483_v60 = vstv %s3689_s6  ;;  %758 = vbcast.lane.b32.xlu1 %v744_v9, 280  ;;  %v4495_v22 = vld [vmem:[#allocation51_spill] sm:$0xff] }
 0x2b7   : > { %v1408_v10 = vmul.f32 %v4483_v60, %v1404_v53  ;;  %v4484_v14 = vmov %v4483_v60  ;;  %v763_v55 = vrot.slane %v2206_v49, %v3530_v31  ;;  %v4485_v0 = vstv %s3679_s22  ;;  %754 = vbcast.lane.b32.xlu0 %v744_v9, 272  ;;  %v1455_v9 = vpop.permute.xlu0 %1454  ;;  %s4520_s22 = sld [smem:[#allocation64_spill]] }
 0x2b8   : > { %v1409_v19 = vmul.f32 %v4484_v14, %v1405_v28  ;;  %v1392_v40 = vmul.f32 %v4485_v0, %v1388_v3  ;;  %v4486_v39 = vmov %v4485_v0  ;;  %v1428_v45 = vmul.f32 %v1426_v63, %v3144_v27  ;;  %v4498_v63 = vld [vmem:[#allocation47_spill] sm:$0xff] }
 0x2b9   : > { %v1393_v47 = vmul.f32 %v4486_v39, %v1389_v43  ;;  %v1429_v5 = vmul.f32 %v1427_v24, %v3182_v51  ;;  %v4487_v61 = vstv %s3681_s4  ;;  %v4489_v41 = vstv %s3691_s19  ;;  %v1441_v12 = vpop.permute.xlu1 %1440  ;;  %s4521_s4 = sld [smem:[#allocation36_spill]] }
 0x2ba   : > { %v1396_v56 = vmul.f32 %v4487_v61, %v1388_v3  ;;  %v4488_v48 = vmov %v4487_v61  ;;  %v1412_v17 = vmul.f32 %v4489_v41, %v1404_v53  ;;  %v4490_v15 = vmov %v4489_v41  ;;  %769 = vbcast.lane.b32.xlu1 %v763_v55, 264 }
 0x2bb   : > { %v1397_v38 = vmul.f32 %v4488_v48, %v1389_v43  ;;  %v1413_v62 = vmul.f32 %v4490_v15, %v1405_v28  ;;  %v4491_v30 = vstv %s3699_s0  ;;  %v4493_v33 = vstv %s3701_s1  ;;  %v4496_v43 = vld [vmem:[#allocation43_spill] sm:$0xff]  ;;  %765 = vbcast.lane.b32.xlu0 %v763_v55, 256  ;;  %v4497_v28 = vld [vmem:[#allocation46_spill] sm:$0xff] }
 0x2bc   : > { %v1432_v31 = vmul.f32 %v4491_v30, %v1428_v45  ;;  %v4492_v49 = vmov %v4491_v30  ;;  %v1436_v57 = vmul.f32 %v4493_v33, %v1428_v45  ;;  %v4494_v35 = vmov %v4493_v33  ;;  %v2218_v30 = vld [vmem:[#allocation9 + $0x18] sm:$0x1] }
 0x2bd   : > { %v1433_v50 = vmul.f32 %v4492_v49, %v1429_v5  ;;  %v1437_v27 = vmul.f32 %v4494_v35, %v1429_v5  ;;  %v1498_v21 = vadd.f32 %v1408_v10, %v1392_v40  ;;  %v1499_v51 = vadd.f32 %v1409_v19, %v1393_v47  ;;  %v1457_v24 = vpop.permute.xlu1 %1456 }
 0x2be   : > { %v1442_v8 = vsel %vm943_vm9, %v1439_v6, %v1441_v12  ;;  %v1443_v32 = vsel %vm943_vm9, %v1441_v12, %v1439_v6  ;;  %v1500_v13 = vadd.f32 %v1432_v31, %v3704_v11  ;;  %v1536_v3 = vadd.f32 %v1436_v57, %v4495_v22  ;;  %777 = vbcast.lane.b32.xlu1 %v763_v55, 280 }
 0x2bf   : > { %v1501_v18 = vadd.f32 %v1433_v50, %v3694_v58  ;;  %v1537_v23 = vadd.f32 %v1437_v27, %v4496_v43  ;;  %v1534_v4 = vadd.f32 %v1412_v17, %v1396_v56  ;;  %v1535_v53 = vadd.f32 %v1413_v62, %v1397_v38  ;;  %773 = vbcast.lane.b32.xlu0 %v763_v55, 272  ;;  %v2217_v62 = vld [vmem:[#allocation9 + $0x10] sm:$0x1]  ;;  %p4523_p4 = scmp.ne.s32.totalorder %s4521_s4, 0 }
 0x2c0   : > { %v1444_v2 = vmul.f32 %v1442_v8, %v4497_v28  ;;  %v1445_v6 = vmul.f32 %v1443_v32, %v4498_v63  ;;  %v1508_v60 = vadd.f32 %v1496_v16, %v1494_v42  ;;  %v1509_v11 = vadd.f32 %v1497_v7, %v1495_v46  ;;  %v1471_v42 = vpop.permute.xlu0 %1470 }
 0x2c1   : > { %v1510_v10 = vadd.f32 %v1500_v13, %v1498_v21  ;;  %v1511_v58 = vadd.f32 %v1501_v18, %v1499_v51  ;;  %v1544_v14 = vadd.f32 %v1532_v34, %v1530_v29  ;;  %v1545_v19 = vadd.f32 %v1533_v36, %v1531_v59  ;;  %v1473_v59 = vpop.permute.xlu1 %1472 }
 0x2c2   : > { %v1546_v0 = vadd.f32 %v1536_v3, %v1534_v4  ;;  %v1547_v40 = vadd.f32 %v1537_v23, %v1535_v53  ;;  %v4499_v39 = vstv %s3715_s2  ;;  %v4501_v61 = vstv %s3717_s3  ;;  %s4001_s2 = sld [smem:[#allocation16]]  ;;  %s4011_s3 = sld [smem:[#allocation2]] }
 0x2c3   : > { %v1448_v47 = vmul.f32 %v4499_v39, %v1444_v2  ;;  %v4500_v45 = vmov %v4499_v39  ;;  %v1452_v56 = vmul.f32 %v4501_v61, %v1444_v2  ;;  %v4502_v48 = vmov %v4501_v61 }
 0x2c4   : > { %v1449_v5 = vmul.f32 %v4500_v45, %v1445_v6  ;;  %v1453_v38 = vmul.f32 %v4502_v48, %v1445_v6  ;;  %v1516_v41 = vadd.f32 %v1510_v10, %v1508_v60  ;;  %v1517_v17 = vadd.f32 %v1511_v58, %v1509_v11 }
 0x2c5   : > { %v1458_v46 = vsel %vm964_vm10, %v1455_v9, %v1457_v24  ;;  %v1459_v29 = vsel %vm964_vm10, %v1457_v24, %v1455_v9  ;;  %v1474_v34 = vsel %vm985_vm11, %v1471_v42, %v1473_v59  ;;  %v1475_v36 = vsel %vm985_vm11, %v1473_v59, %v1471_v42 }
 0x2c6   : > { %v1460_v16 = vmul.f32 %v1458_v46, %v3223_v20  ;;  %v1461_v7 = vmul.f32 %v1459_v29, %v3226_v25  ;;  %v1552_v55 = vadd.f32 %v1546_v0, %v1544_v14  ;;  %v1553_v15 = vadd.f32 %v1547_v40, %v1545_v19 }
 0x2c7   : > { %v1476_v12 = vmul.f32 %v2217_v62, %v1474_v34  ;;  %v1477_v20 = vmul.f32 %v2218_v30, %v1475_v36  ;;  %v4503_v31 = vstv %s3727_s12  ;;  %v4505_v33 = vstv %s3729_s26  ;;  %s4511_s12 = sld [smem:[#allocation38_spill]]  ;;  %v4513_v62 = vld [vmem:[#allocation42_spill] sm:$0xff]  ;;  %s4517_s26 = sld [smem:[#allocation33_spill]] }
 0x2c8   : > { %v1464_v25 = vmul.f32 %v4503_v31, %v1460_v16  ;;  %v4504_v49 = vmov %v4503_v31  ;;  %v1468_v57 = vmul.f32 %v4505_v33, %v1460_v16  ;;  %v4506_v35 = vmov %v4505_v33 }
 0x2c9   : > { %v1465_v50 = vmul.f32 %v4504_v49, %v1461_v7  ;;  %v1469_v1 = vmul.f32 %v4506_v35, %v1461_v7  ;;  %v4507_v27 = vstv %s3735_s7  ;;  %v4509_v8 = vstv %s3737_s11  ;;  %v4043_v35 = vld [vmem:[%s4512_s8 + $0x10] sm:$0xff]  ;;  %s4516_s7 = sld [smem:[#allocation39_spill]] }
 0x2ca   : > { %v1480_v21 = vmul.f32 %v4507_v27, %v1476_v12  ;;  %v4508_v51 = vmov %v4507_v27  ;;  %v1484_v32 = vmul.f32 %v4509_v8, %v1476_v12  ;;  %v4510_v13 = vmov %v4509_v8  ;;  %v4047_v27 = vld [vmem:[%s4512_s8 + $0x18] sm:$0xff] }
 0x2cb   : > { %v1481_v9 = vmul.f32 %v4508_v51, %v1477_v20  ;;  %v1485_v18 = vmul.f32 %v4510_v13, %v1477_v20  ;;  %v1502_v22 = vadd.f32 %v1464_v25, %v1448_v47  ;;  %v1503_v3 = vadd.f32 %v1465_v50, %v1449_v5 }
 0x2cc   : > { %v1538_v43 = vadd.f32 %v1468_v57, %v1452_v56  ;;  %v1539_v23 = vadd.f32 %v1469_v1, %v1453_v38  ;;  %v1518_v4 = vadd.f32 %v1516_v41, %v3894_v52  ;;  %v1519_v53 = vadd.f32 %v1517_v17, %v3896_v37 }
 0x2cd   : > { %v1554_v28 = vadd.f32 %v1552_v55, %v3898_v26  ;;  %v1555_v2 = vadd.f32 %v1553_v15, %v3901_v54  ;;  %v1512_v63 = vadd.f32 %v1502_v22, %v1480_v21  ;;  %v1513_v6 = vadd.f32 %v1503_v3, %v1481_v9  ;;  %s1979_s11 = sshll.u32 %s4511_s12, 1  ;;  %v4051_v9 = vld [vmem:[%s4512_s8] sm:$0xff]  ;;  %s2066_s24 = sshll.u32 %s4517_s26, 10 }
 0x2ce   : > { %v1548_v24 = vadd.f32 %v1538_v43, %v1484_v32  ;;  %v1549_v60 = vadd.f32 %v1539_v23, %v1485_v18  ;;  %v1564_v19 = vstv %s4001_s2  ;;  %v1567_v37 = vstv %s4011_s3  ;;  %s4033_s23 = scalar_lea.vmem [#allocation20], %s1979_s11  ;;  %v4055_v32 = vld [vmem:[%s4512_s8 + $0x8] sm:$0xff]  ;;  %v2223_v23 = vld [vmem:[%s4515_s16 + $0x10] sm:$0xff]  ;;  %s2068_s20 = sshll.u32 %s4517_s26, 5 }
 0x2cf   : > { %v1520_v11 = vadd.f32 %v1518_v4, %v1512_v63  ;;  %v1521_v10 = vadd.f32 %v1519_v53, %v1513_v6  ;;  %v1571_v47 = vstv %s4013_s9  ;;  %v2564_v34 = vmov 1966171168   ;;  %v2224_v53 = vld [vmem:[%s4515_s16 + $0x18] sm:$0xff]  ;;  %s4083_s5 = scalar_lea.vmem [#allocation18], %s4516_s7  ;;  %s1740_s27 = sshll.u32 %s4033_s23, 4  ;;  %s4119_s27 = int_to_ptr.vmem [resolvable:$true] %s1740_s27 }
 0x2d0   : > { %v1556_v58 = vadd.f32 %v1554_v28, %v1548_v24  ;;  %v1557_v14 = vadd.f32 %v1555_v2, %v1549_v60  ;;  %v1664_v36 = vunpack.c.l.s4 %v2564_v34  ;;  %v4514_v25 = vlaneseq  ;;  %v4065_v2 = vld [vmem:[%s4512_s8 + $0x30] sm:$0xff]  ;;  %v4069_v6 = vld [vmem:[%s4512_s8 + $0x38] sm:$0xff]  ;;  %s1723_s17 = sshll.u32 %s4083_s5, 4  ;;  %s4106_s25 = scalar_lea.hbm %s4518_s30, %s2066_s24  ;;  %s4108_s17 = int_to_ptr.vmem [resolvable:$true] %s1723_s17 }
 0x2d1   : > { %v1558_v0 = vmax.f32 %v1520_v11, 0.0  ;;  %v1559_v40 = vmax.f32 %v1521_v10, 0.0  ;;  %v2227_v11 = vld [vmem:[%s4515_s16] sm:$0xff]  ;;  %s4117_s6 = scalar_lea.hbm %s4520_s22, %s2068_s20  ;;  %s4522_s19 = sand.u32 1, %s4517_s26  }
 0x2d2   : > { %v1560_v52 = vmax.f32 %v1556_v58, 0.0  ;;  %v1561_v39 = vmax.f32 %v1557_v14, 0.0  ;;  %v1665_v55 = vunpack.c.0.s8 %v1664_v36  ;;  %vm1680_vm13 = vcmp.lt.s32.totalorder %v4514_v25, 256  ;;  %v2228_v58 = vld [vmem:[%s4515_s16 + $0x8] sm:$0xff]  ;;  %s4137_s0 = scalar_lea.sflag [#allocation19], %s4522_s19  ;;  %s2398_s1 = scalar_lea.vmem %s4108_s17, 1024 }
 0x2d3   : > { %v1565_v45 = vmul.f32 %v1564_v19, %v1558_v0  ;;  %v1566_v26 = vmul.f32 %v1564_v19, %v1559_v40  ;;  %v4075_v19 = vld [vmem:[%s4512_s8 + $0x20] sm:$0xff]  ;;  %v4079_v40 = vld [vmem:[%s4512_s8 + $0x28] sm:$0xff]  ;;  %p2399_p9 = scmp.ne.s32.totalorder %s4108_s17, %s2398_s1  ;;  %p2405_p7 = scmp.lt.s32.totalorder %s4108_s17, %s2403_s18 }
 0x2d4   : > { %v1572_v54 = vmul.f32 %v1571_v47, %v1560_v52  ;;  %v1573_v56 = vmul.f32 %v1571_v47, %v1561_v39  ;;  %v1668_v12 = vsub.s32 %v1665_v55, %v4513_v62  ;;  %p2406_p1 = scmp.lt.s32.totalorder %s2404_s13, %s2398_s1 }
 0x2d5   : > { %v1568_v5 = vadd.f32 %v1567_v37, %v1565_v45  ;;  %v1569_v61 = vadd.f32 %v1567_v37, %v1566_v26  ;;  %p2400_p2 = pnand %p2399_p9, %p4523_p4 }
 0x2d6   : > { %p2407_p10 = por %p2406_p1, %p2405_p7 }
 0x2d7   : > { %v1574_v48 = vadd.f32 %v1572_v54, %v1568_v5  ;;  %v1575_v38 = vadd.f32 %v1573_v56, %v1569_v61  ;;  %v2231_v5 = vld [vmem:[%s4515_s16 + $0x30] sm:$0xff]  ;;  %v2232_v54 = vld [vmem:[%s4515_s16 + $0x38] sm:$0xff]  ;;  %p2401_p5 = pneg %p2400_p2 }
 0x2d9   : > { %v1576_v41 = vsub.f32 0.0, %v1574_v48  ;;  %v1577_v17 = vsub.f32 0.0, %v1575_v38  ;;  %p2408_p8 = pnand %p2407_p10, %p2401_p5 }
 0x2db   : > { %v1578_v42 = vmul.f32 1.442695, %v1576_v41  ;;  %v1580_v46 = vmul.f32 1.442695, %v1577_v17  ;;  %v2233_v17 = vld [vmem:[%s4515_s16 + $0x20] sm:$0xff] }
 0x2dd   : > { %2207 = vpow2.f32 %v1578_v42 }
 0x2de   : > { %2209 = vpow2.f32 %v1580_v46  ;;  %v2234_v46 = vld [vmem:[%s4515_s16 + $0x28] sm:$0xff] }
 0x2e7   : > { %v2208_v29 = vpop.eup %2207 }
 0x2e8   : > { %v2210_v59 = vpop.eup %2209  ;;  %v1582_v16 = vadd.f32 1.0, %v2208_v29 }
 0x2e9   : > { %v1583_v7 = vadd.f32 1.0, %v2210_v59 }
 0x2ea   : > { %2211 = vrcp.f32 %v1582_v16 }
 0x2eb   : > { %2213 = vrcp.f32 %v1583_v7 }
 0x2f4   : > { %v2212_v15 = vpop.eup %2211 }
 0x2f5   : > { %v2214_v30 = vpop.eup %2213  ;;  %v4037_v33 = vrot.slane %v2212_v15, %v3524_v44 }
 0x2f6   : > { %v1662_v20 = vcombine.low %v2212_v15, %v2214_v30  ;;  %v4040_v57 = vrot.slane %v2214_v30, %v3524_v44 }
 0x2f8   : > { %v1669_v31 = vrot.slane %v1662_v20, %v1668_v12 }
 0x2fa   : > { %v1676_v49 = vrot.slane %v1669_v31, %v1668_v12 }
 0x2fc   : > { %1682 = vst.msk [vmem:[%s4033_s23] sm:$0x3] %vm1680_vm13, %v1676_v49 }
 0x324   : > { %v751_v50 = vpop.permute.xlu1 %750 }
 0x325   : > { %v1630_v1 = vmul.f32 %v4043_v35, %v751_v50  ;;  %v1631_v21 = vmul.f32 %v4047_v27, %v751_v50  ;;  %v747_v51 = vpop.permute.xlu0 %746 }
 0x326   : > { %v1628_v8 = vmul.f32 %v4051_v9, %v747_v51  ;;  %v1629_v44 = vmul.f32 %v4055_v32, %v747_v51 }
 0x327   : > { %v1638_v13 = vmul.f32 %v1630_v1, %v4037_v33  ;;  %v1639_v18 = vmul.f32 %v1631_v21, %v4040_v57 }
 0x328   : > { %v1636_v22 = vmul.f32 %v1628_v8, %v4037_v33  ;;  %v1637_v3 = vmul.f32 %v1629_v44, %v4040_v57  ;;  %v759_v43 = vpop.permute.xlu1 %758 }
 0x329   : > { %v1646_v4 = vadd.f32 %v2223_v23, %v1638_v13  ;;  %v1647_v28 = vadd.f32 %v2224_v53, %v1639_v18  ;;  %v1634_v63 = vmul.f32 %v4065_v2, %v759_v43  ;;  %v1635_v24 = vmul.f32 %v4069_v6, %v759_v43  ;;  %v755_v60 = vpop.permute.xlu0 %754 }
 0x32a   : > { %v1644_v10 = vadd.f32 %v2227_v11, %v1636_v22  ;;  %v1645_v14 = vadd.f32 %v2228_v58, %v1637_v3  ;;  %v1632_v0 = vmul.f32 %v4075_v19, %v755_v60  ;;  %v1633_v52 = vmul.f32 %v4079_v40, %v755_v60 }
 0x32b   : > { %1654 = vst [vmem:[%s4083_s5 + $0x10] sm:$0xff] %v1646_v4  ;;  %1655 = vst [vmem:[%s4083_s5 + $0x18] sm:$0xff] %v1647_v28  ;;  %v1642_v39 = vmul.f32 %v1634_v63, %v4037_v33  ;;  %v1643_v37 = vmul.f32 %v1635_v24, %v4040_v57 }
 0x32c   : > { %1652 = vst [vmem:[%s4083_s5] sm:$0xff] %v1644_v10  ;;  %1653 = vst [vmem:[%s4083_s5 + $0x8] sm:$0xff] %v1645_v14  ;;  %v1640_v47 = vmul.f32 %v1632_v0, %v4037_v33  ;;  %v1641_v45 = vmul.f32 %v1633_v52, %v4040_v57  ;;  %v770_v26 = vpop.permute.xlu1 %769 }
 0x32d   : > { %v1650_v61 = vadd.f32 %v2231_v5, %v1642_v39  ;;  %v1651_v56 = vadd.f32 %v2232_v54, %v1643_v37  ;;  %v1590_v48 = vmul.f32 %v2223_v23, %v770_v26  ;;  %v1591_v38 = vmul.f32 %v2224_v53, %v770_v26  ;;  %v766_v41 = vpop.permute.xlu0 %765 }
 0x32e   : > { %v1648_v42 = vadd.f32 %v2233_v17, %v1640_v47  ;;  %v1649_v29 = vadd.f32 %v2234_v46, %v1641_v45  ;;  %v1588_v59 = vmul.f32 %v2227_v11, %v766_v41  ;;  %v1589_v16 = vmul.f32 %v2228_v58, %v766_v41 }
 0x32f   : > { %1658 = vst [vmem:[%s4083_s5 + $0x30] sm:$0xff] %v1650_v61  ;;  %1659 = vst [vmem:[%s4083_s5 + $0x38] sm:$0xff] %v1651_v56  ;;  %v1606_v7 = vmul.f32 %v4037_v33, %v1590_v48  ;;  %v1607_v34 = vmul.f32 %v4040_v57, %v1591_v38 }
 0x330   : > { %1656 = vst [vmem:[%s4083_s5 + $0x20] sm:$0xff] %v1648_v42  ;;  %1657 = vst [vmem:[%s4083_s5 + $0x28] sm:$0xff] %v1649_v29  ;;  %v1604_v36 = vmul.f32 %v4037_v33, %v1588_v59  ;;  %v1605_v55 = vmul.f32 %v4040_v57, %v1589_v16  ;;  %v778_v15 = vpop.permute.xlu1 %777 }
 0x331   : > { %v4126_v62 = vadd.f32 %v4043_v35, %v1606_v7  ;;  %v4129_v12 = vadd.f32 %v4047_v27, %v1607_v34  ;;  %v4131_v30 = vmul.f32 %v2231_v5, %v778_v15  ;;  %v4133_v20 = vmul.f32 %v2232_v54, %v778_v15  ;;  %v774_v31 = vpop.permute.xlu0 %773 }
 0x332   : > { %2411 = shalt.err (!%p2408_p8)
}
 0x333   : > { %s2412_s2 = scalar_lea.hbm %s4106_s25, 1024  ;;  %s2416_s8 = scalar_lea.hbm %s4519_s15, 2048 }
 0x334   : > { %p2413_p12 = scmp.ne.s32.totalorder %s4106_s25, %s2412_s2  ;;  %p2417_p13 = scmp.lt.u32.totalorder %s4106_s25, %s4519_s15 }
 0x335   : > { %p2418_p6 = scmp.lt.u32.totalorder %s2416_s8, %s2412_s2  ;;  %p2420_p9 = scmp.lt.u32.totalorder %s2412_s2, %s4106_s25 }
 0x336   : > { %p2414_p3 = pnand %p2413_p12, %p4523_p4 }
 0x337   : > { %p2419_p0 = por %p2418_p6, %p2417_p13 }
 0x338   : > { %p2415_p11 = pneg %p2414_p3 }
 0x339   : > { %p2421_p2 = por %p2420_p9, %p2419_p0 }
 0x33b   : > { %p2422_p5 = pnand %p2421_p2, %p2415_p11 }
 0x33d   : > { %2425 = shalt.err (!%p2422_p5)
}
 0x33e   : > { %s2566_s16 = smov 256   ;;  %s4524_s5 = smov 16   ;;  %v1612_v25 = vadd.f32 %v4051_v9, %v1604_v36  ;;  %v1613_v49 = vadd.f32 %v4055_v32, %v1605_v55  ;;  %v1592_v50 = vmul.f32 %v2233_v17, %v774_v31  ;;  %v1593_v35 = vmul.f32 %v2234_v46, %v774_v31 }
 0x33f   : > { %2098 = dma.vmem_to_hbm [thread:$0]  (%p4523_p4), %s4108_s17, 1024, %s4106_s25, %s4137_s0, %s2566_s16, %s2566_s16, %s4524_s5  }
 0x340   : > { %s2426_s20 = scalar_lea.vmem %s4119_s27, 32  ;;  %s2567_s28 = smov [#allocation20]  }
 0x341   : > { %p2427_p7 = scmp.ne.s32.totalorder %s4119_s27, %s2426_s20  ;;  %s2430_s29 = sshll.u32 %s2567_s28, 4  ;;  %s2431_s29 = int_to_ptr.vmem [resolvable:$false] %s2430_s29 }
 0x342   : > { %s2432_s30 = scalar_lea.vmem %s2431_s29, 64  ;;  %p2433_p8 = scmp.lt.s32.totalorder %s4119_s27, %s2431_s29 }
 0x343   : > { %p2428_p1 = pnand %p2427_p7, %p4523_p4  ;;  %p2434_p12 = scmp.lt.s32.totalorder %s2432_s30, %s2426_s20 }
 0x345   : > { %p2429_p10 = pneg %p2428_p1  ;;  %p2435_p3 = por %p2434_p12, %p2433_p8 }
 0x347   : > { %p2436_p11 = pnand %p2435_p3, %p2429_p10 }
 0x349   : > { %2439 = shalt.err (!%p2436_p11)
}
 0x34a   : > { %s2440_s17 = scalar_lea.hbm %s4117_s6, 32  ;;  %s2444_s21 = scalar_lea.hbm %s4520_s22, 64 }
 0x34b   : > { %p2441_p13 = scmp.ne.s32.totalorder %s4117_s6, %s2440_s17  ;;  %p2445_p9 = scmp.lt.u32.totalorder %s4117_s6, %s4520_s22 }
 0x34c   : > { %p2446_p2 = scmp.lt.u32.totalorder %s2444_s21, %s2440_s17  ;;  %p2448_p7 = scmp.lt.u32.totalorder %s2440_s17, %s4117_s6 }
 0x34d   : > { %p2442_p6 = pnand %p2441_p13, %p4523_p4 }
 0x34e   : > { %p2447_p5 = por %p2446_p2, %p2445_p9 }
 0x34f   : > { %p2443_p0 = pneg %p2442_p6 }
 0x350   : > { %p2449_p1 = por %p2448_p7, %p2447_p5 }
 0x352   : > { %p2450_p10 = pnand %p2449_p1, %p2443_p0 }
 0x354   : > { %2453 = shalt.err (!%p2450_p10)
}
 0x355   : > { %2099 = dma.vmem_to_hbm [thread:$0]  (%p4523_p4), %s4119_s27, 32, %s4117_s6, %s4137_s0   ;;  %v1610_v1 = vmul.f32 %v4037_v33, %v4131_v30  ;;  %v1611_v27 = vmul.f32 %v4040_v57, %v4133_v20  ;;  %v1608_v21 = vmul.f32 %v4037_v33, %v1592_v50  ;;  %v1609_v51 = vmul.f32 %v4040_v57, %v1593_v35 }
 0x356   : > { %s581_s14 = scalar_lea.vmem [#allocation17], %s4516_s7  ;;  %s4525_s6 = sld [smem:[#allocation62_spill]] }
 0x357   : > { %1622 = vst [vmem:[%s581_s14 + $0x10] sm:$0xff] %v4126_v62  ;;  %1623 = vst [vmem:[%s581_s14 + $0x18] sm:$0xff] %v4129_v12  ;;  %s1707_s18 = sshll.u32 %s581_s14, 4  ;;  %v1618_v9 = vadd.f32 %v4065_v2, %v1610_v1  ;;  %v1619_v8 = vadd.f32 %v4069_v6, %v1611_v27  ;;  %v1616_v32 = vadd.f32 %v4075_v19, %v1608_v21  ;;  %s1684_s13 = scalar_lea.sflag [#allocation5], %s4511_s12  ;;  %s4208_s18 = int_to_ptr.vmem [resolvable:$true] %s1707_s18 }
 0x358   : > { %1620 = vst [vmem:[%s581_s14] sm:$0xff] %v1612_v25  ;;  %1621 = vst [vmem:[%s581_s14 + $0x8] sm:$0xff] %v1613_v49  ;;  %v1617_v44 = vadd.f32 %v4079_v40, %v1609_v51  ;;  %s2454_s2 = scalar_lea.vmem %s4208_s18, 1024  ;;  %s2568_s26 = smov [#allocation17]  }
 0x359   : > { %1626 = vst [vmem:[%s581_s14 + $0x30] sm:$0xff] %v1618_v9  ;;  %1627 = vst [vmem:[%s581_s14 + $0x38] sm:$0xff] %v1619_v8  ;;  %p2455_p8 = scmp.ne.s32.totalorder %s4208_s18, %s2454_s2  ;;  %s2458_s3 = sshll.u32 %s2568_s26, 4  ;;  %s2459_s3 = int_to_ptr.vmem [resolvable:$false] %s2458_s3 }
 0x35a   : > { %1624 = vst [vmem:[%s581_s14 + $0x20] sm:$0xff] %v1616_v32  ;;  %1625 = vst [vmem:[%s581_s14 + $0x28] sm:$0xff] %v1617_v44  ;;  %p2461_p11 = scmp.lt.s32.totalorder %s4208_s18, %s2459_s3 }
 0x35b   : > { %p2456_p12 = pnand %p2455_p8, %p4523_p4 }
 0x35c   : > { %s4206_s0 = scalar_lea.hbm %s4525_s6, %s2066_s24  ;;  %s2460_s24 = scalar_lea.vmem %s2459_s3, 2048 }
 0x35d   : > { %p2457_p3 = pneg %p2456_p12  ;;  %p2462_p13 = scmp.lt.s32.totalorder %s2460_s24, %s2454_s2 }
 0x35f   : > { %p2463_p6 = por %p2462_p13, %p2461_p11 }
 0x361   : > { %p2464_p0 = pnand %p2463_p6, %p2457_p3 }
 0x363   : > { %2467 = shalt.err (!%p2464_p0)
}
 0x364   : > { %s2468_s9 = scalar_lea.hbm %s4206_s0, 1024  ;;  %s2472_s23 = scalar_lea.hbm %s4525_s6, 2048 }
 0x365   : > { %p2469_p9 = scmp.ne.s32.totalorder %s4206_s0, %s2468_s9  ;;  %p2473_p7 = scmp.lt.u32.totalorder %s4206_s0, %s4525_s6 }
 0x366   : > { %p2474_p1 = scmp.lt.u32.totalorder %s2472_s23, %s2468_s9  ;;  %p2476_p8 = scmp.lt.u32.totalorder %s2468_s9, %s4206_s0 }
 0x367   : > { %p2470_p2 = pnand %p2469_p9, %p4523_p4 }
 0x368   : > { %p2475_p10 = por %p2474_p1, %p2473_p7 }
 0x369   : > { %p2471_p5 = pneg %p2470_p2 }
 0x36a   : > { %p2477_p12 = por %p2476_p8, %p2475_p10 }
 0x36c   : > { %p2478_p3 = pnand %p2477_p12, %p2471_p5 }
 0x36e   : > { %2481 = shalt.err (!%p2478_p3)
}
 0x36f   : > { %2097 = dma.vmem_to_hbm [thread:$0]  (%p4523_p4), %s4208_s18, 1024, %s4206_s0, %s1684_s13, %s2566_s16, %s2566_s16, %s4524_s5  }
 0x370 PF: > { %s4526_s29 = sld [smem:[#allocation29_spill]]  ;;  %s4527_s30 = sld [smem:[#allocation37_spill]] }
 0x371   : > { %s4528_s17 = sld [smem:[#allocation32_spill]] }
 0x376   : > { %s1752_s25 = sand.u32 1, %s4526_s29   ;;  %p4529_p11 = scmp.ne.s32.totalorder %s4527_s30, 0 }
 0x377   : > { %p4530_p13 = scmp.ge.s32.totalorder %s4528_s17, 2  ;;  %s1753_s10 = scalar_lea.sflag [#allocation5], %s1752_s25 }
 0x379   : > { %p2130_p6 = pnand %p4530_p13, %p4529_p11 }
 0x37b   : > { %2523 = dma.done.wait (!%p2130_p6), %s1753_s10, 1024  }
 0x37c   : > { %2525 = vsyncadd (!%p2130_p6), %s1753_s10, 4294966272  ;;  %s4531_s4 = sadd.s32 4294967294, %s4528_s17  }
 0x37d   : > { %s1761_s21 = sand.u32 1, %s4531_s4  }
 0x37e   : > { %s1762_s19 = scalar_lea.sflag [#allocation19], %s1761_s21 }
 0x37f   : > { %2527 = dma.done.wait (!%p2130_p6), %s1762_s19, 1056  }
 0x380   : > { %2529 = vsyncadd (!%p2130_p6), %s1762_s19, 4294966240  ;;  %s4532_s30 = sld [smem:[#allocation34_spill]]  ;;  %s4533_s27 = sld [smem:[#allocation30_spill]] }
 0x381   : > { %s4534_s28 = sld [smem:[#allocation31_spill]]  ;;  %s4535_s29 = sld [smem:[#allocation35_spill]] }
 0x386   : > { %p37_p4 = scmp.ge.s32.totalorder %s4532_s30, 4  }
 0x388   :  { %39 = sbr.rel (!%p37_p4) target bundleno = 27 (0x1b), region = 179 }
 0x38f   :  { %1776 = vsyncpa [#allocation4], 1 }
 0x390   :  { %1778 = vsyncpa [#allocation4 + $0x1], 1 }
 0x391   :  { %1779 = vsyncpa [#allocation8], 1 }
 0x392   :  { %1781 = vsyncpa [#allocation8 + $0x1], 1 }
 0x393   :  { %1782 = vsyncpa [#allocation5], 1 }
 0x394   :  { %1784 = vsyncpa [#allocation5 + $0x1], 1 }
 0x395   :  { %1785 = vsyncpa [#allocation19], 1 }
 0x396   :  { %1787 = vsyncpa [#allocation19 + $0x1], 1 }
 0x397   :  { %1788 = vsyncpa [#allocation6], 1 }
 0x398   :  { %1790 = vsyncpa [#allocation6 + $0x1], 1 }
 0x399   :  { %1791 = vsyncpa [#allocation12], 1 }
 0x39a   :  { %1792 = vsyncpa [#allocation15], 1 }

</bundles_post_ra>
